<compile_context>
chip_gen: v7x
topology: tpu7x:2x2x1
jax: 0.10.0
libtpu: 0.0.40
codegen_flags: <defaults>
</compile_context>

<pallas_src>
import functools

import numpy as np
import jax
import jax.numpy as jnp
from jax.experimental import pallas as pl
from jax.experimental.pallas import tpu as pltpu


# ----------------------------------------------------------------------------
# Constants (fixed by the CifarNet architecture: 3x32x32 input)
# ----------------------------------------------------------------------------
C1, C1P = 6, 8            # conv1 out channels (real / padded per-width block)
C2 = 16                   # conv2 out channels
F1, F2, NCLS = 120, 84, 10
FP = 128                  # padded FC width (lane-dense)
KIN = 128                 # padded conv1 K  (32 width * 3 ch = 96 -> 128 lanes)
NH1 = 128                 # conv1 output half block (14 pooled widths * 8 -> 128)
N1 = 2 * NH1              # conv1 output lanes: [even widths | odd widths]
NH2 = 128                 # conv2 output half block (5 pooled widths * 16 -> 128)
N2 = 2 * NH2
IMG_MAX = 32              # max images per grid step


# ----------------------------------------------------------------------------
# Fused kernel: conv1+relu+pool1+conv2+relu+pool2+fc1+relu+fc2+relu+fc3+log_softmax
# ----------------------------------------------------------------------------
def _cifarnet_kernel(x_ref, w1_ref, b1_ref, w2_ref, b2_ref,
                     wf1_ref, bf1_ref, wf2_ref, bf2_ref, wf3_ref, bf3_ref,
                     o_ref, *, img):
    """Forward for one block of `img` images.

    x_ref  : (2, img*16, 128)  even / odd image rows (lane = width*3 + ch, padded)
    w1_ref : (5, 128, 256)     conv1 taps; cols = [even out widths | odd out widths]
    w2_ref : (5, 128, 256)     conv2 taps over pooled conv1 lanes
    wf1_ref: (5, 128, 128)     fc1 taps (one per pooled conv2 row, NCHW flatten folded)
    o_ref  : (img, 128)        log-softmax (classes 0..9 real, rest padding)
    """
    f32 = jnp.float32
    rows16 = img * 16              # 16 row slots per image in the flat layout
    m1 = rows16 - 2                # conv1 output rows computed (flat)

    xe0 = x_ref[0, 0:m1, :]
    xo0 = x_ref[1, 0:m1, :]
    xe1 = x_ref[0, 1:1 + m1, :]
    xo1 = x_ref[1, 1:1 + m1, :]
    xe2 = x_ref[0, 2:2 + m1, :]
    xo2 = x_ref[1, 2:2 + m1, :]

    # ---- conv1: even output rows (r = 2*ph) and odd output rows (r = 2*ph+1).
    # Flat output row g = i*16 + ph; intra-image ph >= 14 rows are garbage and
    # are never consumed downstream.
    ea = jnp.dot(xe0, w1_ref[0], preferred_element_type=f32)
    ea = ea + jnp.dot(xo0, w1_ref[1], preferred_element_type=f32)
    ea = ea + jnp.dot(xe1, w1_ref[2], preferred_element_type=f32)
    ea = ea + jnp.dot(xo1, w1_ref[3], preferred_element_type=f32)
    ea = ea + jnp.dot(xe2, w1_ref[4], preferred_element_type=f32)

    oa = jnp.dot(xo0, w1_ref[0], preferred_element_type=f32)
    oa = oa + jnp.dot(xe1, w1_ref[1], preferred_element_type=f32)
    oa = oa + jnp.dot(xo1, w1_ref[2], preferred_element_type=f32)
    oa = oa + jnp.dot(xe2, w1_ref[3], preferred_element_type=f32)
    oa = oa + jnp.dot(xo2, w1_ref[4], preferred_element_type=f32)

    # 2x2 pool: height = even/odd row max, width = lane half-split max; + bias, ReLU.
    t = jnp.maximum(ea, oa) + b1_ref[...]                       # (m1, 256)
    p = jnp.maximum(jnp.maximum(t[:, :NH1], t[:, NH1:]), 0.0)   # (m1, 128)
    # Pad so conv2's sliding windows cover a full rows16-row output.
    p = jnp.concatenate([p, jnp.zeros((6, NH1), f32)], axis=0)  # (rows16+4, 128)

    # ---- conv2 + bias + ReLU + width pool (flat row g2 = i*16 + r2; r2<=9 valid)
    acc2 = jnp.dot(p[0:rows16, :], w2_ref[0], preferred_element_type=f32)
    for kh in range(1, 5):
        acc2 = acc2 + jnp.dot(p[kh:kh + rows16, :], w2_ref[kh],
                              preferred_element_type=f32)
    h2 = acc2 + b2_ref[...]                                     # (rows16, 256)
    c2 = jnp.maximum(jnp.maximum(h2[:, :NH2], h2[:, NH2:]), 0.0)  # (rows16, 128)
    c2 = c2.reshape(img, 16, NH2)                               # layout-free split

    # ---- fc1 + ReLU: 5 taps; each tap finishes the 2x2 pool height max ----
    z = jnp.zeros((img, FP), f32) + bf1_ref[...]
    for ho in range(5):
        rows = jnp.maximum(c2[:, 2 * ho, :], c2[:, 2 * ho + 1, :])   # (img, 128)
        z = z + jnp.dot(rows, wf1_ref[ho], preferred_element_type=f32)
    a = jnp.maximum(z, 0.0)

    # ---- fc2 + ReLU, fc3 ----
    a = jnp.maximum(jnp.dot(a, wf2_ref[...], preferred_element_type=f32)
                    + bf2_ref[...], 0.0)
    logits = (jnp.dot(a, wf3_ref[...], preferred_element_type=f32)
              + bf3_ref[...])                                   # (img, 128)

    # ---- log_softmax over the 10 real classes (mask padded lanes) ----
    lane = jax.lax.broadcasted_iota(jnp.int32, (img, FP), 1)
    logits = jnp.where(lane < NCLS, logits, -1e30)
    m = jnp.max(logits, axis=-1, keepdims=True)
    s = logits - m
    lse = jnp.log(jnp.sum(jnp.exp(s), axis=-1, keepdims=True))
    o_ref[...] = s - lse


# ----------------------------------------------------------------------------
# Host-side parameter packing (one-time; folds layouts / transposes into weights)
# ----------------------------------------------------------------------------
def pack_params(p):
    w1 = np.asarray(p["conv1_w"], np.float32)   # (6, 3, 5, 5)   (n, c, kh, kw)
    b1 = np.asarray(p["conv1_b"], np.float32)
    w2 = np.asarray(p["conv2_w"], np.float32)   # (16, 6, 5, 5)
    b2 = np.asarray(p["conv2_b"], np.float32)
    f1w = np.asarray(p["fc1_w"], np.float32)    # (120, 400)
    f1b = np.asarray(p["fc1_b"], np.float32)
    f2w = np.asarray(p["fc2_w"], np.float32)    # (84, 120)
    f2b = np.asarray(p["fc2_b"], np.float32)
    f3w = np.asarray(p["fc3_w"], np.float32)    # (10, 84)
    f3b = np.asarray(p["fc3_b"], np.float32)

    # conv1: x-row lane = wi*3 + ch (wi = 0..31).  Output column layout:
    # even output widths (wo = 2*pw) at lane pw*8 + n, odd widths at 128 + pw*8 + n.
    w1big = np.zeros((5, KIN, N1), np.float32)
    b1big = np.zeros((1, N1), np.float32)
    for kh in range(5):
        for kw in range(5):
            for wo in range(28):
                wi = wo + kw
                col = (wo % 2) * NH1 + (wo // 2) * C1P
                w1big[kh, wi * 3:wi * 3 + 3, col:col + C1] = w1[:, :, kh, kw].T
    for wo in range(28):
        col = (wo % 2) * NH1 + (wo // 2) * C1P
        b1big[0, col:col + C1] = b1

    # conv2: LHS lane = pw_in*8 + c_in (pooled conv1).  Output column layout:
    # even output widths at j*16 + n, odd at 128 + j*16 + n  (j = wo2 // 2).
    w2big = np.zeros((5, NH1, N2), np.float32)
    b2big = np.zeros((1, N2), np.float32)
    for kh in range(5):
        for kw in range(5):
            for wo in range(10):
                pw_in = wo + kw
                col = (wo % 2) * NH2 + (wo // 2) * C2
                w2big[kh, pw_in * C1P:pw_in * C1P + C1,
                      col:col + C2] = w2[:, :, kh, kw].T
    for wo in range(10):
        col = (wo % 2) * NH2 + (wo // 2) * C2
        b2big[0, col:col + C2] = b2

    # fc1: LHS lane = w*16 + c (pooled conv2); PyTorch view(-1, 400) flatten
    # index = c*25 + ho*5 + w, taken one tap per pooled row ho.
    f1r = f1w.reshape(F1, C2, 5, 5)             # (n, c, h, w)
    wf1 = np.zeros((5, NH2, FP), np.float32)
    for ho in range(5):
        for wo in range(5):
            wf1[ho, wo * C2:(wo + 1) * C2, :F1] = f1r[:, :, ho, wo].T
    bf1 = np.zeros((1, FP), np.float32)
    bf1[0, :F1] = f1b

    wf2 = np.zeros((FP, FP), np.float32)
    wf2[:F1, :F2] = f2w.T
    bf2 = np.zeros((1, FP), np.float32)
    bf2[0, :F2] = f2b

    wf3 = np.zeros((FP, FP), np.float32)
    wf3[:F2, :NCLS] = f3w.T
    bf3 = np.zeros((1, FP), np.float32)
    bf3[0, :NCLS] = f3b

    return tuple(jnp.asarray(a) for a in
                 (w1big, b1big, w2big, b2big, wf1, bf1, wf2, bf2, wf3, bf3))


# ----------------------------------------------------------------------------
# Forward wrapper
# ----------------------------------------------------------------------------
def _choose_img(batch):
    # Aim for >= 2 grid steps when the batch allows it (v7x megacore), cap at 32.
    half = (batch + 1) // 2
    return max(8, min(IMG_MAX, ((half + 7) // 8) * 8))


@jax.jit
def cifarnet_forward(packed, x_nchw):
    (w1big, b1big, w2big, b2big, wf1, bf1, wf2, bf2, wf3, bf3) = packed
    B = x_nchw.shape[0]
    img = _choose_img(B)
    Bp = ((B + img - 1) // img) * img

    # NCHW -> (B, 32, W*C) rows, pad lanes 96->128 and batch to Bp, then
    # de-interleave even/odd image rows for the fused conv1 + height pool.
    x = jnp.transpose(x_nchw.astype(jnp.float32), (0, 2, 3, 1)).reshape(B, 32, 96)
    x = jnp.pad(x, ((0, Bp - B), (0, 0), (0, KIN - 96)))
    x2 = jnp.stack([x[:, 0::2, :], x[:, 1::2, :]], axis=0)      # (2, Bp, 16, 128)
    x2 = x2.reshape(2, Bp * 16, KIN)

    kernel = functools.partial(_cifarnet_kernel, img=img)
    out = pl.pallas_call(
        kernel,
        out_shape=jax.ShapeDtypeStruct((Bp, FP), jnp.float32),
        grid=(Bp // img,),
        in_specs=[
            pl.BlockSpec((2, img * 16, KIN), lambda i: (0, i, 0)),   # x (even/odd rows)
            pl.BlockSpec((5, KIN, N1), lambda i: (0, 0, 0)),         # w1
            pl.BlockSpec((1, N1), lambda i: (0, 0)),                 # b1
            pl.BlockSpec((5, NH1, N2), lambda i: (0, 0, 0)),         # w2
            pl.BlockSpec((1, N2), lambda i: (0, 0)),                 # b2
            pl.BlockSpec((5, NH2, FP), lambda i: (0, 0, 0)),         # wf1
            pl.BlockSpec((1, FP), lambda i: (0, 0)),                 # bf1
            pl.BlockSpec((FP, FP), lambda i: (0, 0)),                # wf2
            pl.BlockSpec((1, FP), lambda i: (0, 0)),                 # bf2
            pl.BlockSpec((FP, FP), lambda i: (0, 0)),                # wf3
            pl.BlockSpec((1, FP), lambda i: (0, 0)),                 # bf3
        ],
        out_specs=pl.BlockSpec((img, FP), lambda i: (i, 0)),
        compiler_params=pltpu.CompilerParams(
            dimension_semantics=("parallel",),
            vmem_limit_bytes=32 * 1024 * 1024,
        ),
    )(x2, w1big, b1big, w2big, b2big, wf1, bf1, wf2, bf2, wf3, bf3)

    return out[:B, :NCLS]


# ----------------------------------------------------------------------------
# Parameters (PyTorch layout / default-like init) and pure-JAX reference
# ----------------------------------------------------------------------------
def init_params(key):
    ks = jax.random.split(key, 10)

    def uniform(k, shape, fan_in):
        bound = 1.0 / np.sqrt(fan_in)
        return jax.random.uniform(k, shape, jnp.float32, -bound, bound)

    return {
        "conv1_w": uniform(ks[0], (6, 3, 5, 5), 3 * 5 * 5),
        "conv1_b": uniform(ks[1], (6,), 3 * 5 * 5),
        "conv2_w": uniform(ks[2], (16, 6, 5, 5), 6 * 5 * 5),
        "conv2_b": uniform(ks[3], (16,), 6 * 5 * 5),
        "fc1_w": uniform(ks[4], (120, 400), 400),
        "fc1_b": uniform(ks[5], (120,), 400),
        "fc2_w": uniform(ks[6], (84, 120), 120),
        "fc2_b": uniform(ks[7], (84,), 120),
        "fc3_w": uniform(ks[8], (10, 84), 84),
        "fc3_b": uniform(ks[9], (10,), 84),
    }


def cifarnet_reference(params, x_nchw):
    """Pure-JAX (XLA) reference with the exact PyTorch semantics."""
    x = x_nchw.astype(jnp.float32)

    def conv(h, w, b):
        y = jax.lax.conv_general_dilated(
            h, w, window_strides=(1, 1), padding="VALID",
            dimension_numbers=("NCHW", "OIHW", "NCHW"))
        return y + b[None, :, None, None]

    def pool(h):
        return jax.lax.reduce_window(h, -jnp.inf, jax.lax.max,
                                     (1, 1, 2, 2), (1, 1, 2, 2), "VALID")

    x = pool(jax.nn.relu(conv(x, params["conv1_w"], params["conv1_b"])))
    x = pool(jax.nn.relu(conv(x, params["conv2_w"], params["conv2_b"])))
    x = x.reshape(x.shape[0], 16 * 5 * 5)       # NCHW flatten, like view(-1, 400)
    x = jax.nn.relu(x @ params["fc1_w"].T + params["fc1_b"])
    x = jax.nn.relu(x @ params["fc2_w"].T + params["fc2_b"])
    x = x @ params["fc3_w"].T + params["fc3_b"]
    return jax.nn.log_softmax(x, axis=-1)


if __name__ == "__main__":
    key = jax.random.PRNGKey(0)
    pkey, xkey = jax.random.split(key)
    params = init_params(pkey)
    packed = pack_params(params)

    # CIFAR-shaped input (the 16*5*5 flatten requires 3x32x32): (B, 3, 32, 32)
    x = jax.random.normal(xkey, (2, 3, 32, 32), dtype=jnp.float32)

    out = cifarnet_forward(packed, x)
    out = jax.block_until_ready(out)

    assert out.shape == (2, 10)
    assert bool(jnp.all(jnp.isfinite(out)))
    # probabilities sum to 1
    assert bool(jnp.allclose(jnp.sum(jnp.exp(out), axis=-1), 1.0, atol=1e-4))
    # match the pure-JAX reference forward
    ref = cifarnet_reference(params, x)
    assert bool(jnp.allclose(out, ref, atol=2e-3, rtol=2e-3)), (
        "max abs err %e" % float(jnp.max(jnp.abs(out - ref))))

    print("KERNEL_OK")
</pallas_src>

<mosaic_0001>
module attributes {stable_mosaic.version = 11 : i64} {
  func.func @_cifarnet_kernel(%arg0: i32, %arg1: memref<2x128x128xf32, #tpu.memory_space<vmem>>, %arg2: memref<5x128x256xf32, #tpu.memory_space<vmem>>, %arg3: memref<1x256xf32, #tpu.memory_space<vmem>>, %arg4: memref<5x128x256xf32, #tpu.memory_space<vmem>>, %arg5: memref<1x256xf32, #tpu.memory_space<vmem>>, %arg6: memref<5x128x128xf32, #tpu.memory_space<vmem>>, %arg7: memref<1x128xf32, #tpu.memory_space<vmem>>, %arg8: memref<128x128xf32, #tpu.memory_space<vmem>>, %arg9: memref<1x128xf32, #tpu.memory_space<vmem>>, %arg10: memref<128x128xf32, #tpu.memory_space<vmem>>, %arg11: memref<1x128xf32, #tpu.memory_space<vmem>>, %arg12: memref<8x128xf32, #tpu.memory_space<vmem>>) attributes {dimension_semantics = [#tpu.dimension_semantics<parallel>], iteration_bounds = array<i64: 1>, scalar_prefetch = 0 : i64, scratch_operands = 0 : i64, tpu.core_type = #tpu.core_type<tc>, window_params = [{transform_indices = @transform_0, window_bounds = array<i64: 2, 128, 128>}, {pipeline_mode = #tpu.pipeline_mode<synchronous>, transform_indices = @transform_1, window_bounds = array<i64: 5, 128, 256>}, {pipeline_mode = #tpu.pipeline_mode<synchronous>, transform_indices = @transform_2, window_bounds = array<i64: 1, 256>}, {pipeline_mode = #tpu.pipeline_mode<synchronous>, transform_indices = @transform_3, window_bounds = array<i64: 5, 128, 256>}, {pipeline_mode = #tpu.pipeline_mode<synchronous>, transform_indices = @transform_4, window_bounds = array<i64: 1, 256>}, {pipeline_mode = #tpu.pipeline_mode<synchronous>, transform_indices = @transform_5, window_bounds = array<i64: 5, 128, 128>}, {pipeline_mode = #tpu.pipeline_mode<synchronous>, transform_indices = @transform_6, window_bounds = array<i64: 1, 128>}, {pipeline_mode = #tpu.pipeline_mode<synchronous>, transform_indices = @transform_7, window_bounds = array<i64: 128, 128>}, {pipeline_mode = #tpu.pipeline_mode<synchronous>, transform_indices = @transform_8, window_bounds = array<i64: 1, 128>}, {pipeline_mode = #tpu.pipeline_mode<synchronous>, transform_indices = @transform_9, window_bounds = array<i64: 128, 128>}, {pipeline_mode = #tpu.pipeline_mode<synchronous>, transform_indices = @transform_10, window_bounds = array<i64: 1, 128>}, {transform_indices = @transform_11, window_bounds = array<i64: 8, 128>}]} {
    %c0 = arith.constant 0 : index
    %c0_0 = arith.constant 0 : index
    %c0_1 = arith.constant 0 : index
    %0 = vector.load %arg1[%c0, %c0_0, %c0_1] : memref<2x128x128xf32, #tpu.memory_space<vmem>>, vector<1x126x128xf32>
    %1 = vector.shape_cast %0 : vector<1x126x128xf32> to vector<126x128xf32>
    %c1 = arith.constant 1 : index
    %c0_2 = arith.constant 0 : index
    %c0_3 = arith.constant 0 : index
    %2 = vector.load %arg1[%c1, %c0_2, %c0_3] : memref<2x128x128xf32, #tpu.memory_space<vmem>>, vector<1x126x128xf32>
    %3 = vector.shape_cast %2 : vector<1x126x128xf32> to vector<126x128xf32>
    %c0_4 = arith.constant 0 : index
    %c1_5 = arith.constant 1 : index
    %c0_6 = arith.constant 0 : index
    %4 = vector.load %arg1[%c0_4, %c1_5, %c0_6] : memref<2x128x128xf32, #tpu.memory_space<vmem>>, vector<1x126x128xf32>
    %5 = vector.shape_cast %4 : vector<1x126x128xf32> to vector<126x128xf32>
    %c1_7 = arith.constant 1 : index
    %c1_8 = arith.constant 1 : index
    %c0_9 = arith.constant 0 : index
    %6 = vector.load %arg1[%c1_7, %c1_8, %c0_9] : memref<2x128x128xf32, #tpu.memory_space<vmem>>, vector<1x126x128xf32>
    %7 = vector.shape_cast %6 : vector<1x126x128xf32> to vector<126x128xf32>
    %c0_10 = arith.constant 0 : index
    %c2 = arith.constant 2 : index
    %c0_11 = arith.constant 0 : index
    %8 = vector.load %arg1[%c0_10, %c2, %c0_11] : memref<2x128x128xf32, #tpu.memory_space<vmem>>, vector<1x126x128xf32>
    %9 = vector.shape_cast %8 : vector<1x126x128xf32> to vector<126x128xf32>
    %c1_12 = arith.constant 1 : index
    %c2_13 = arith.constant 2 : index
    %c0_14 = arith.constant 0 : index
    %10 = vector.load %arg1[%c1_12, %c2_13, %c0_14] : memref<2x128x128xf32, #tpu.memory_space<vmem>>, vector<1x126x128xf32>
    %11 = vector.shape_cast %10 : vector<1x126x128xf32> to vector<126x128xf32>
    %c0_15 = arith.constant 0 : index
    %c0_16 = arith.constant 0 : index
    %c0_17 = arith.constant 0 : index
    %12 = vector.load %arg2[%c0_15, %c0_16, %c0_17] : memref<5x128x256xf32, #tpu.memory_space<vmem>>, vector<1x128x256xf32>
    %13 = vector.shape_cast %12 : vector<1x128x256xf32> to vector<128x256xf32>
    %cst = arith.constant dense<0.000000e+00> : vector<126x256xf32>
    %14 = tpu.matmul %1, %13, %cst {dimension_numbers = #tpu.dot_dimension_numbers<[1], [0], [0], [1], [0, 0, 1, 1], [], []>} : vector<126x128xf32>, vector<128x256xf32>, vector<126x256xf32> -> vector<126x256xf32>
    %c1_18 = arith.constant 1 : index
    %c0_19 = arith.constant 0 : index
    %c0_20 = arith.constant 0 : index
    %15 = vector.load %arg2[%c1_18, %c0_19, %c0_20] : memref<5x128x256xf32, #tpu.memory_space<vmem>>, vector<1x128x256xf32>
    %16 = vector.shape_cast %15 : vector<1x128x256xf32> to vector<128x256xf32>
    %cst_21 = arith.constant dense<0.000000e+00> : vector<126x256xf32>
    %17 = tpu.matmul %3, %16, %cst_21 {dimension_numbers = #tpu.dot_dimension_numbers<[1], [0], [0], [1], [0, 0, 1, 1], [], []>} : vector<126x128xf32>, vector<128x256xf32>, vector<126x256xf32> -> vector<126x256xf32>
    %18 = arith.addf %14, %17 : vector<126x256xf32>
    %c2_22 = arith.constant 2 : index
    %c0_23 = arith.constant 0 : index
    %c0_24 = arith.constant 0 : index
    %19 = vector.load %arg2[%c2_22, %c0_23, %c0_24] : memref<5x128x256xf32, #tpu.memory_space<vmem>>, vector<1x128x256xf32>
    %20 = vector.shape_cast %19 : vector<1x128x256xf32> to vector<128x256xf32>
    %cst_25 = arith.constant dense<0.000000e+00> : vector<126x256xf32>
    %21 = tpu.matmul %5, %20, %cst_25 {dimension_numbers = #tpu.dot_dimension_numbers<[1], [0], [0], [1], [0, 0, 1, 1], [], []>} : vector<126x128xf32>, vector<128x256xf32>, vector<126x256xf32> -> vector<126x256xf32>
    %22 = arith.addf %18, %21 : vector<126x256xf32>
    %c3 = arith.constant 3 : index
    %c0_26 = arith.constant 0 : index
    %c0_27 = arith.constant 0 : index
    %23 = vector.load %arg2[%c3, %c0_26, %c0_27] : memref<5x128x256xf32, #tpu.memory_space<vmem>>, vector<1x128x256xf32>
    %24 = vector.shape_cast %23 : vector<1x128x256xf32> to vector<128x256xf32>
    %cst_28 = arith.constant dense<0.000000e+00> : vector<126x256xf32>
    %25 = tpu.matmul %7, %24, %cst_28 {dimension_numbers = #tpu.dot_dimension_numbers<[1], [0], [0], [1], [0, 0, 1, 1], [], []>} : vector<126x128xf32>, vector<128x256xf32>, vector<126x256xf32> -> vector<126x256xf32>
    %26 = arith.addf %22, %25 : vector<126x256xf32>
    %c4 = arith.constant 4 : index
    %c0_29 = arith.constant 0 : index
    %c0_30 = arith.constant 0 : index
    %27 = vector.load %arg2[%c4, %c0_29, %c0_30] : memref<5x128x256xf32, #tpu.memory_space<vmem>>, vector<1x128x256xf32>
    %28 = vector.shape_cast %27 : vector<1x128x256xf32> to vector<128x256xf32>
    %cst_31 = arith.constant dense<0.000000e+00> : vector<126x256xf32>
    %29 = tpu.matmul %9, %28, %cst_31 {dimension_numbers = #tpu.dot_dimension_numbers<[1], [0], [0], [1], [0, 0, 1, 1], [], []>} : vector<126x128xf32>, vector<128x256xf32>, vector<126x256xf32> -> vector<126x256xf32>
    %30 = arith.addf %26, %29 : vector<126x256xf32>
    %c0_32 = arith.constant 0 : index
    %c0_33 = arith.constant 0 : index
    %c0_34 = arith.constant 0 : index
    %31 = vector.load %arg2[%c0_32, %c0_33, %c0_34] : memref<5x128x256xf32, #tpu.memory_space<vmem>>, vector<1x128x256xf32>
    %32 = vector.shape_cast %31 : vector<1x128x256xf32> to vector<128x256xf32>
    %cst_35 = arith.constant dense<0.000000e+00> : vector<126x256xf32>
    %33 = tpu.matmul %3, %32, %cst_35 {dimension_numbers = #tpu.dot_dimension_numbers<[1], [0], [0], [1], [0, 0, 1, 1], [], []>} : vector<126x128xf32>, vector<128x256xf32>, vector<126x256xf32> -> vector<126x256xf32>
    %c1_36 = arith.constant 1 : index
    %c0_37 = arith.constant 0 : index
    %c0_38 = arith.constant 0 : index
    %34 = vector.load %arg2[%c1_36, %c0_37, %c0_38] : memref<5x128x256xf32, #tpu.memory_space<vmem>>, vector<1x128x256xf32>
    %35 = vector.shape_cast %34 : vector<1x128x256xf32> to vector<128x256xf32>
    %cst_39 = arith.constant dense<0.000000e+00> : vector<126x256xf32>
    %36 = tpu.matmul %5, %35, %cst_39 {dimension_numbers = #tpu.dot_dimension_numbers<[1], [0], [0], [1], [0, 0, 1, 1], [], []>} : vector<126x128xf32>, vector<128x256xf32>, vector<126x256xf32> -> vector<126x256xf32>
    %37 = arith.addf %33, %36 : vector<126x256xf32>
    %c2_40 = arith.constant 2 : index
    %c0_41 = arith.constant 0 : index
    %c0_42 = arith.constant 0 : index
    %38 = vector.load %arg2[%c2_40, %c0_41, %c0_42] : memref<5x128x256xf32, #tpu.memory_space<vmem>>, vector<1x128x256xf32>
    %39 = vector.shape_cast %38 : vector<1x128x256xf32> to vector<128x256xf32>
    %cst_43 = arith.constant dense<0.000000e+00> : vector<126x256xf32>
    %40 = tpu.matmul %7, %39, %cst_43 {dimension_numbers = #tpu.dot_dimension_numbers<[1], [0], [0], [1], [0, 0, 1, 1], [], []>} : vector<126x128xf32>, vector<128x256xf32>, vector<126x256xf32> -> vector<126x256xf32>
    %41 = arith.addf %37, %40 : vector<126x256xf32>
    %c3_44 = arith.constant 3 : index
    %c0_45 = arith.constant 0 : index
    %c0_46 = arith.constant 0 : index
    %42 = vector.load %arg2[%c3_44, %c0_45, %c0_46] : memref<5x128x256xf32, #tpu.memory_space<vmem>>, vector<1x128x256xf32>
    %43 = vector.shape_cast %42 : vector<1x128x256xf32> to vector<128x256xf32>
    %cst_47 = arith.constant dense<0.000000e+00> : vector<126x256xf32>
    %44 = tpu.matmul %9, %43, %cst_47 {dimension_numbers = #tpu.dot_dimension_numbers<[1], [0], [0], [1], [0, 0, 1, 1], [], []>} : vector<126x128xf32>, vector<128x256xf32>, vector<126x256xf32> -> vector<126x256xf32>
    %45 = arith.addf %41, %44 : vector<126x256xf32>
    %c4_48 = arith.constant 4 : index
    %c0_49 = arith.constant 0 : index
    %c0_50 = arith.constant 0 : index
    %46 = vector.load %arg2[%c4_48, %c0_49, %c0_50] : memref<5x128x256xf32, #tpu.memory_space<vmem>>, vector<1x128x256xf32>
    %47 = vector.shape_cast %46 : vector<1x128x256xf32> to vector<128x256xf32>
    %cst_51 = arith.constant dense<0.000000e+00> : vector<126x256xf32>
    %48 = tpu.matmul %11, %47, %cst_51 {dimension_numbers = #tpu.dot_dimension_numbers<[1], [0], [0], [1], [0, 0, 1, 1], [], []>} : vector<126x128xf32>, vector<128x256xf32>, vector<126x256xf32> -> vector<126x256xf32>
    %49 = arith.addf %45, %48 : vector<126x256xf32>
    %50 = arith.maximumf %30, %49 : vector<126x256xf32>
    %c0_52 = arith.constant 0 : index
    %c0_53 = arith.constant 0 : index
    %51 = vector.load %arg3[%c0_52, %c0_53] : memref<1x256xf32, #tpu.memory_space<vmem>>, vector<1x256xf32>
    %52 = vector.broadcast %51 : vector<1x256xf32> to vector<126x256xf32>
    %53 = arith.addf %50, %52 : vector<126x256xf32>
    %54 = vector.extract_strided_slice %53 {offsets = [0, 0], sizes = [126, 128], strides = [1, 1]} : vector<126x256xf32> to vector<126x128xf32>
    %55 = vector.extract_strided_slice %53 {offsets = [0, 128], sizes = [126, 128], strides = [1, 1]} : vector<126x256xf32> to vector<126x128xf32>
    %56 = arith.maximumf %54, %55 : vector<126x128xf32>
    %cst_54 = arith.constant 0.000000e+00 : f32
    %57 = vector.broadcast %cst_54 : f32 to vector<126x128xf32>
    %58 = arith.maximumf %56, %57 : vector<126x128xf32>
    %cst_55 = arith.constant 0.000000e+00 : f32
    %59 = vector.broadcast %cst_55 : f32 to vector<6x128xf32>
    %60 = tpu.concatenate %58, %59 in 0 : vector<126x128xf32>, vector<6x128xf32> -> vector<132x128xf32>
    %61 = vector.extract_strided_slice %60 {offsets = [0, 0], sizes = [128, 128], strides = [1, 1]} : vector<132x128xf32> to vector<128x128xf32>
    %c0_56 = arith.constant 0 : index
    %c0_57 = arith.constant 0 : index
    %c0_58 = arith.constant 0 : index
    %62 = vector.load %arg4[%c0_56, %c0_57, %c0_58] : memref<5x128x256xf32, #tpu.memory_space<vmem>>, vector<1x128x256xf32>
    %63 = vector.shape_cast %62 : vector<1x128x256xf32> to vector<128x256xf32>
    %cst_59 = arith.constant dense<0.000000e+00> : vector<128x256xf32>
    %64 = tpu.matmul %61, %63, %cst_59 {dimension_numbers = #tpu.dot_dimension_numbers<[1], [0], [0], [1], [0, 0, 1, 1], [], []>} : vector<128x128xf32>, vector<128x256xf32>, vector<128x256xf32> -> vector<128x256xf32>
    %65 = vector.extract_strided_slice %60 {offsets = [1, 0], sizes = [128, 128], strides = [1, 1]} : vector<132x128xf32> to vector<128x128xf32>
    %c1_60 = arith.constant 1 : index
    %c0_61 = arith.constant 0 : index
    %c0_62 = arith.constant 0 : index
    %66 = vector.load %arg4[%c1_60, %c0_61, %c0_62] : memref<5x128x256xf32, #tpu.memory_space<vmem>>, vector<1x128x256xf32>
    %67 = vector.shape_cast %66 : vector<1x128x256xf32> to vector<128x256xf32>
    %cst_63 = arith.constant dense<0.000000e+00> : vector<128x256xf32>
    %68 = tpu.matmul %65, %67, %cst_63 {dimension_numbers = #tpu.dot_dimension_numbers<[1], [0], [0], [1], [0, 0, 1, 1], [], []>} : vector<128x128xf32>, vector<128x256xf32>, vector<128x256xf32> -> vector<128x256xf32>
    %69 = arith.addf %64, %68 : vector<128x256xf32>
    %70 = vector.extract_strided_slice %60 {offsets = [2, 0], sizes = [128, 128], strides = [1, 1]} : vector<132x128xf32> to vector<128x128xf32>
    %c2_64 = arith.constant 2 : index
    %c0_65 = arith.constant 0 : index
    %c0_66 = arith.constant 0 : index
    %71 = vector.load %arg4[%c2_64, %c0_65, %c0_66] : memref<5x128x256xf32, #tpu.memory_space<vmem>>, vector<1x128x256xf32>
    %72 = vector.shape_cast %71 : vector<1x128x256xf32> to vector<128x256xf32>
    %cst_67 = arith.constant dense<0.000000e+00> : vector<128x256xf32>
    %73 = tpu.matmul %70, %72, %cst_67 {dimension_numbers = #tpu.dot_dimension_numbers<[1], [0], [0], [1], [0, 0, 1, 1], [], []>} : vector<128x128xf32>, vector<128x256xf32>, vector<128x256xf32> -> vector<128x256xf32>
    %74 = arith.addf %69, %73 : vector<128x256xf32>
    %75 = vector.extract_strided_slice %60 {offsets = [3, 0], sizes = [128, 128], strides = [1, 1]} : vector<132x128xf32> to vector<128x128xf32>
    %c3_68 = arith.constant 3 : index
    %c0_69 = arith.constant 0 : index
    %c0_70 = arith.constant 0 : index
    %76 = vector.load %arg4[%c3_68, %c0_69, %c0_70] : memref<5x128x256xf32, #tpu.memory_space<vmem>>, vector<1x128x256xf32>
    %77 = vector.shape_cast %76 : vector<1x128x256xf32> to vector<128x256xf32>
    %cst_71 = arith.constant dense<0.000000e+00> : vector<128x256xf32>
    %78 = tpu.matmul %75, %77, %cst_71 {dimension_numbers = #tpu.dot_dimension_numbers<[1], [0], [0], [1], [0, 0, 1, 1], [], []>} : vector<128x128xf32>, vector<128x256xf32>, vector<128x256xf32> -> vector<128x256xf32>
    %79 = arith.addf %74, %78 : vector<128x256xf32>
    %80 = vector.extract_strided_slice %60 {offsets = [4, 0], sizes = [128, 128], strides = [1, 1]} : vector<132x128xf32> to vector<128x128xf32>
    %c4_72 = arith.constant 4 : index
    %c0_73 = arith.constant 0 : index
    %c0_74 = arith.constant 0 : index
    %81 = vector.load %arg4[%c4_72, %c0_73, %c0_74] : memref<5x128x256xf32, #tpu.memory_space<vmem>>, vector<1x128x256xf32>
    %82 = vector.shape_cast %81 : vector<1x128x256xf32> to vector<128x256xf32>
    %cst_75 = arith.constant dense<0.000000e+00> : vector<128x256xf32>
    %83 = tpu.matmul %80, %82, %cst_75 {dimension_numbers = #tpu.dot_dimension_numbers<[1], [0], [0], [1], [0, 0, 1, 1], [], []>} : vector<128x128xf32>, vector<128x256xf32>, vector<128x256xf32> -> vector<128x256xf32>
    %84 = arith.addf %79, %83 : vector<128x256xf32>
    %c0_76 = arith.constant 0 : index
    %c0_77 = arith.constant 0 : index
    %85 = vector.load %arg5[%c0_76, %c0_77] : memref<1x256xf32, #tpu.memory_space<vmem>>, vector<1x256xf32>
    %86 = vector.broadcast %85 : vector<1x256xf32> to vector<128x256xf32>
    %87 = arith.addf %84, %86 : vector<128x256xf32>
    %88 = vector.extract_strided_slice %87 {offsets = [0, 0], sizes = [128, 128], strides = [1, 1]} : vector<128x256xf32> to vector<128x128xf32>
    %89 = vector.extract_strided_slice %87 {offsets = [0, 128], sizes = [128, 128], strides = [1, 1]} : vector<128x256xf32> to vector<128x128xf32>
    %90 = arith.maximumf %88, %89 : vector<128x128xf32>
    %cst_78 = arith.constant 0.000000e+00 : f32
    %91 = vector.broadcast %cst_78 : f32 to vector<128x128xf32>
    %92 = arith.maximumf %90, %91 : vector<128x128xf32>
    %93 = vector.shape_cast %92 : vector<128x128xf32> to vector<8x16x128xf32>
    %cst_79 = arith.constant 0.000000e+00 : f32
    %94 = vector.broadcast %cst_79 : f32 to vector<8x128xf32>
    %c0_80 = arith.constant 0 : index
    %c0_81 = arith.constant 0 : index
    %95 = vector.load %arg7[%c0_80, %c0_81] : memref<1x128xf32, #tpu.memory_space<vmem>>, vector<1x128xf32>
    %96 = vector.broadcast %95 : vector<1x128xf32> to vector<8x128xf32>
    %97 = arith.addf %94, %96 : vector<8x128xf32>
    %98 = vector.extract_strided_slice %93 {offsets = [0, 0, 0], sizes = [8, 1, 128], strides = [1, 1, 1]} : vector<8x16x128xf32> to vector<8x1x128xf32>
    %99 = vector.shape_cast %98 : vector<8x1x128xf32> to vector<8x128xf32>
    %100 = vector.extract_strided_slice %93 {offsets = [0, 1, 0], sizes = [8, 1, 128], strides = [1, 1, 1]} : vector<8x16x128xf32> to vector<8x1x128xf32>
    %101 = vector.shape_cast %100 : vector<8x1x128xf32> to vector<8x128xf32>
    %102 = arith.maximumf %99, %101 : vector<8x128xf32>
    %c0_82 = arith.constant 0 : index
    %c0_83 = arith.constant 0 : index
    %c0_84 = arith.constant 0 : index
    %103 = vector.load %arg6[%c0_82, %c0_83, %c0_84] : memref<5x128x128xf32, #tpu.memory_space<vmem>>, vector<1x128x128xf32>
    %104 = vector.shape_cast %103 : vector<1x128x128xf32> to vector<128x128xf32>
    %cst_85 = arith.constant dense<0.000000e+00> : vector<8x128xf32>
    %105 = tpu.matmul %102, %104, %cst_85 {dimension_numbers = #tpu.dot_dimension_numbers<[1], [0], [0], [1], [0, 0, 1, 1], [], []>} : vector<8x128xf32>, vector<128x128xf32>, vector<8x128xf32> -> vector<8x128xf32>
    %106 = arith.addf %97, %105 : vector<8x128xf32>
    %107 = vector.extract_strided_slice %93 {offsets = [0, 2, 0], sizes = [8, 1, 128], strides = [1, 1, 1]} : vector<8x16x128xf32> to vector<8x1x128xf32>
    %108 = vector.shape_cast %107 : vector<8x1x128xf32> to vector<8x128xf32>
    %109 = vector.extract_strided_slice %93 {offsets = [0, 3, 0], sizes = [8, 1, 128], strides = [1, 1, 1]} : vector<8x16x128xf32> to vector<8x1x128xf32>
    %110 = vector.shape_cast %109 : vector<8x1x128xf32> to vector<8x128xf32>
    %111 = arith.maximumf %108, %110 : vector<8x128xf32>
    %c1_86 = arith.constant 1 : index
    %c0_87 = arith.constant 0 : index
    %c0_88 = arith.constant 0 : index
    %112 = vector.load %arg6[%c1_86, %c0_87, %c0_88] : memref<5x128x128xf32, #tpu.memory_space<vmem>>, vector<1x128x128xf32>
    %113 = vector.shape_cast %112 : vector<1x128x128xf32> to vector<128x128xf32>
    %cst_89 = arith.constant dense<0.000000e+00> : vector<8x128xf32>
    %114 = tpu.matmul %111, %113, %cst_89 {dimension_numbers = #tpu.dot_dimension_numbers<[1], [0], [0], [1], [0, 0, 1, 1], [], []>} : vector<8x128xf32>, vector<128x128xf32>, vector<8x128xf32> -> vector<8x128xf32>
    %115 = arith.addf %106, %114 : vector<8x128xf32>
    %116 = vector.extract_strided_slice %93 {offsets = [0, 4, 0], sizes = [8, 1, 128], strides = [1, 1, 1]} : vector<8x16x128xf32> to vector<8x1x128xf32>
    %117 = vector.shape_cast %116 : vector<8x1x128xf32> to vector<8x128xf32>
    %118 = vector.extract_strided_slice %93 {offsets = [0, 5, 0], sizes = [8, 1, 128], strides = [1, 1, 1]} : vector<8x16x128xf32> to vector<8x1x128xf32>
    %119 = vector.shape_cast %118 : vector<8x1x128xf32> to vector<8x128xf32>
    %120 = arith.maximumf %117, %119 : vector<8x128xf32>
    %c2_90 = arith.constant 2 : index
    %c0_91 = arith.constant 0 : index
    %c0_92 = arith.constant 0 : index
    %121 = vector.load %arg6[%c2_90, %c0_91, %c0_92] : memref<5x128x128xf32, #tpu.memory_space<vmem>>, vector<1x128x128xf32>
    %122 = vector.shape_cast %121 : vector<1x128x128xf32> to vector<128x128xf32>
    %cst_93 = arith.constant dense<0.000000e+00> : vector<8x128xf32>
    %123 = tpu.matmul %120, %122, %cst_93 {dimension_numbers = #tpu.dot_dimension_numbers<[1], [0], [0], [1], [0, 0, 1, 1], [], []>} : vector<8x128xf32>, vector<128x128xf32>, vector<8x128xf32> -> vector<8x128xf32>
    %124 = arith.addf %115, %123 : vector<8x128xf32>
    %125 = vector.extract_strided_slice %93 {offsets = [0, 6, 0], sizes = [8, 1, 128], strides = [1, 1, 1]} : vector<8x16x128xf32> to vector<8x1x128xf32>
    %126 = vector.shape_cast %125 : vector<8x1x128xf32> to vector<8x128xf32>
    %127 = vector.extract_strided_slice %93 {offsets = [0, 7, 0], sizes = [8, 1, 128], strides = [1, 1, 1]} : vector<8x16x128xf32> to vector<8x1x128xf32>
    %128 = vector.shape_cast %127 : vector<8x1x128xf32> to vector<8x128xf32>
    %129 = arith.maximumf %126, %128 : vector<8x128xf32>
    %c3_94 = arith.constant 3 : index
    %c0_95 = arith.constant 0 : index
    %c0_96 = arith.constant 0 : index
    %130 = vector.load %arg6[%c3_94, %c0_95, %c0_96] : memref<5x128x128xf32, #tpu.memory_space<vmem>>, vector<1x128x128xf32>
    %131 = vector.shape_cast %130 : vector<1x128x128xf32> to vector<128x128xf32>
    %cst_97 = arith.constant dense<0.000000e+00> : vector<8x128xf32>
    %132 = tpu.matmul %129, %131, %cst_97 {dimension_numbers = #tpu.dot_dimension_numbers<[1], [0], [0], [1], [0, 0, 1, 1], [], []>} : vector<8x128xf32>, vector<128x128xf32>, vector<8x128xf32> -> vector<8x128xf32>
    %133 = arith.addf %124, %132 : vector<8x128xf32>
    %134 = vector.extract_strided_slice %93 {offsets = [0, 8, 0], sizes = [8, 1, 128], strides = [1, 1, 1]} : vector<8x16x128xf32> to vector<8x1x128xf32>
    %135 = vector.shape_cast %134 : vector<8x1x128xf32> to vector<8x128xf32>
    %136 = vector.extract_strided_slice %93 {offsets = [0, 9, 0], sizes = [8, 1, 128], strides = [1, 1, 1]} : vector<8x16x128xf32> to vector<8x1x128xf32>
    %137 = vector.shape_cast %136 : vector<8x1x128xf32> to vector<8x128xf32>
    %138 = arith.maximumf %135, %137 : vector<8x128xf32>
    %c4_98 = arith.constant 4 : index
    %c0_99 = arith.constant 0 : index
    %c0_100 = arith.constant 0 : index
    %139 = vector.load %arg6[%c4_98, %c0_99, %c0_100] : memref<5x128x128xf32, #tpu.memory_space<vmem>>, vector<1x128x128xf32>
    %140 = vector.shape_cast %139 : vector<1x128x128xf32> to vector<128x128xf32>
    %cst_101 = arith.constant dense<0.000000e+00> : vector<8x128xf32>
    %141 = tpu.matmul %138, %140, %cst_101 {dimension_numbers = #tpu.dot_dimension_numbers<[1], [0], [0], [1], [0, 0, 1, 1], [], []>} : vector<8x128xf32>, vector<128x128xf32>, vector<8x128xf32> -> vector<8x128xf32>
    %142 = arith.addf %133, %141 : vector<8x128xf32>
    %cst_102 = arith.constant 0.000000e+00 : f32
    %143 = vector.broadcast %cst_102 : f32 to vector<8x128xf32>
    %144 = arith.maximumf %142, %143 : vector<8x128xf32>
    %c0_103 = arith.constant 0 : index
    %c0_104 = arith.constant 0 : index
    %145 = vector.load %arg8[%c0_103, %c0_104] : memref<128x128xf32, #tpu.memory_space<vmem>>, vector<128x128xf32>
    %cst_105 = arith.constant dense<0.000000e+00> : vector<8x128xf32>
    %146 = tpu.matmul %144, %145, %cst_105 {dimension_numbers = #tpu.dot_dimension_numbers<[1], [0], [0], [1], [0, 0, 1, 1], [], []>} : vector<8x128xf32>, vector<128x128xf32>, vector<8x128xf32> -> vector<8x128xf32>
    %c0_106 = arith.constant 0 : index
    %c0_107 = arith.constant 0 : index
    %147 = vector.load %arg9[%c0_106, %c0_107] : memref<1x128xf32, #tpu.memory_space<vmem>>, vector<1x128xf32>
    %148 = vector.broadcast %147 : vector<1x128xf32> to vector<8x128xf32>
    %149 = arith.addf %146, %148 : vector<8x128xf32>
    %cst_108 = arith.constant 0.000000e+00 : f32
    %150 = vector.broadcast %cst_108 : f32 to vector<8x128xf32>
    %151 = arith.maximumf %149, %150 : vector<8x128xf32>
    %c0_109 = arith.constant 0 : index
    %c0_110 = arith.constant 0 : index
    %152 = vector.load %arg10[%c0_109, %c0_110] : memref<128x128xf32, #tpu.memory_space<vmem>>, vector<128x128xf32>
    %cst_111 = arith.constant dense<0.000000e+00> : vector<8x128xf32>
    %153 = tpu.matmul %151, %152, %cst_111 {dimension_numbers = #tpu.dot_dimension_numbers<[1], [0], [0], [1], [0, 0, 1, 1], [], []>} : vector<8x128xf32>, vector<128x128xf32>, vector<8x128xf32> -> vector<8x128xf32>
    %c0_112 = arith.constant 0 : index
    %c0_113 = arith.constant 0 : index
    %154 = vector.load %arg11[%c0_112, %c0_113] : memref<1x128xf32, #tpu.memory_space<vmem>>, vector<1x128xf32>
    %155 = vector.broadcast %154 : vector<1x128xf32> to vector<8x128xf32>
    %156 = arith.addf %153, %155 : vector<8x128xf32>
    %157 = tpu.iota {dimensions = array<i32: 1>} : vector<8x128xi32>
    %c10_i32 = arith.constant 10 : i32
    %158 = vector.broadcast %c10_i32 : i32 to vector<8x128xi32>
    %159 = arith.cmpi slt, %157, %158 : vector<8x128xi32>
    %cst_114 = arith.constant -1.000000e+30 : f32
    %160 = vector.broadcast %cst_114 : f32 to vector<8x128xf32>
    %161 = arith.select %159, %156, %160 : vector<8x128xi1>, vector<8x128xf32>
    %cst_115 = arith.constant dense<0xFF800000> : vector<8xf32>
    %162 = vector.multi_reduction <maximumf>, %161, %cst_115 [1] : vector<8x128xf32> to vector<8xf32>
    %163 = vector.shape_cast %162 : vector<8xf32> to vector<8x1xf32>
    %164 = vector.broadcast %163 : vector<8x1xf32> to vector<8x128xf32>
    %165 = arith.subf %161, %164 : vector<8x128xf32>
    %166 = math.exp %165 : vector<8x128xf32>
    %cst_116 = arith.constant dense<0.000000e+00> : vector<8xf32>
    %167 = vector.multi_reduction <add>, %166, %cst_116 [1] : vector<8x128xf32> to vector<8xf32>
    %168 = vector.shape_cast %167 : vector<8xf32> to vector<8x1xf32>
    %169 = math.log %168 : vector<8x1xf32>
    %170 = vector.broadcast %169 : vector<8x1xf32> to vector<8x128xf32>
    %171 = arith.subf %165, %170 : vector<8x128xf32>
    %c0_117 = arith.constant 0 : index
    %c0_118 = arith.constant 0 : index
    %172 = vector.load %arg12[%c0_117, %c0_118] : memref<8x128xf32, #tpu.memory_space<vmem>>, vector<8x128xf32>
    tpu.vector_store %arg12[%c0_117, %c0_118], %171 {strides = array<i32>} : memref<8x128xf32, #tpu.memory_space<vmem>>, vector<8x128xf32>,
    return
  }
  func.func @transform_0(%arg0: i32) -> (i32, i32, i32) {
    %c0_i32 = arith.constant 0 : i32
    %c0_i32_0 = arith.constant 0 : i32
    %c0_i32_1 = arith.constant 0 : i32
    return %c0_i32, %arg0, %c0_i32_0 : i32, i32, i32
  }
  func.func @transform_1(%arg0: i32) -> (i32, i32, i32) {
    %c0_i32 = arith.constant 0 : i32
    %c0_i32_0 = arith.constant 0 : i32
    %c0_i32_1 = arith.constant 0 : i32
    %c0_i32_2 = arith.constant 0 : i32
    return %c0_i32, %c0_i32_0, %c0_i32_1 : i32, i32, i32
  }
  func.func @transform_2(%arg0: i32) -> (i32, i32) {
    %c0_i32 = arith.constant 0 : i32
    %c0_i32_0 = arith.constant 0 : i32
    %c0_i32_1 = arith.constant 0 : i32
    return %c0_i32, %c0_i32_0 : i32, i32
  }
  func.func @transform_3(%arg0: i32) -> (i32, i32, i32) {
    %c0_i32 = arith.constant 0 : i32
    %c0_i32_0 = arith.constant 0 : i32
    %c0_i32_1 = arith.constant 0 : i32
    %c0_i32_2 = arith.constant 0 : i32
    return %c0_i32, %c0_i32_0, %c0_i32_1 : i32, i32, i32
  }
  func.func @transform_4(%arg0: i32) -> (i32, i32) {
    %c0_i32 = arith.constant 0 : i32
    %c0_i32_0 = arith.constant 0 : i32
    %c0_i32_1 = arith.constant 0 : i32
    return %c0_i32, %c0_i32_0 : i32, i32
  }
  func.func @transform_5(%arg0: i32) -> (i32, i32, i32) {
    %c0_i32 = arith.constant 0 : i32
    %c0_i32_0 = arith.constant 0 : i32
    %c0_i32_1 = arith.constant 0 : i32
    %c0_i32_2 = arith.constant 0 : i32
    return %c0_i32, %c0_i32_0, %c0_i32_1 : i32, i32, i32
  }
  func.func @transform_6(%arg0: i32) -> (i32, i32) {
    %c0_i32 = arith.constant 0 : i32
    %c0_i32_0 = arith.constant 0 : i32
    %c0_i32_1 = arith.constant 0 : i32
    return %c0_i32, %c0_i32_0 : i32, i32
  }
  func.func @transform_7(%arg0: i32) -> (i32, i32) {
    %c0_i32 = arith.constant 0 : i32
    %c0_i32_0 = arith.constant 0 : i32
    %c0_i32_1 = arith.constant 0 : i32
    return %c0_i32, %c0_i32_0 : i32, i32
  }
  func.func @transform_8(%arg0: i32) -> (i32, i32) {
    %c0_i32 = arith.constant 0 : i32
    %c0_i32_0 = arith.constant 0 : i32
    %c0_i32_1 = arith.constant 0 : i32
    return %c0_i32, %c0_i32_0 : i32, i32
  }
  func.func @transform_9(%arg0: i32) -> (i32, i32) {
    %c0_i32 = arith.constant 0 : i32
    %c0_i32_0 = arith.constant 0 : i32
    %c0_i32_1 = arith.constant 0 : i32
    return %c0_i32, %c0_i32_0 : i32, i32
  }
  func.func @transform_10(%arg0: i32) -> (i32, i32) {
    %c0_i32 = arith.constant 0 : i32
    %c0_i32_0 = arith.constant 0 : i32
    %c0_i32_1 = arith.constant 0 : i32
    return %c0_i32, %c0_i32_0 : i32, i32
  }
  func.func @transform_11(%arg0: i32) -> (i32, i32) {
    %c0_i32 = arith.constant 0 : i32
    %c0_i32_0 = arith.constant 0 : i32
    return %arg0, %c0_i32 : i32, i32
  }
}

</mosaic_0001>

<bundles_post_ra>
// kernel: cifarnet_forward.1
= control target key start
LH: loop header
LB: loop body
LE: loop exit
PB: predicated region body
PF: predicated region fallthrough
CT: control target
= control target key end

     0   :  { %v6168_v3 = vmov 0.0   ;;  %vm2293_vm0 = vcmask 1046528   ;;  %vm2209_vm1 = vcmask 1045504   ;;  %vm2973_vm2 = vcmask 1044480   ;;  %s9158_s1 = inlined_call_operand.vmem [shape: f32[5,128,256], index: 1, kind: input, shape index: {}]   ;;  %s9159_s0 = inlined_call_operand.vmem [shape: f32[2,128,128], index: 0, kind: input, shape index: {}]   ;;  %s9160_s3 = inlined_call_operand.vmem [shape: f32[5,128,256], index: 3, kind: input, shape index: {}]   ;;  %s9161_s2 = inlined_call_operand.vmem [shape: f32[1,256], index: 2, kind: input, shape index: {}]   ;;  %s9162_s5 = inlined_call_operand.vmem [shape: f32[5,128,128], index: 5, kind: input, shape index: {}]   ;;  %s9163_s4 = inlined_call_operand.vmem [shape: f32[1,256], index: 4, kind: input, shape index: {}]   ;;  %s9164_s7 = inlined_call_operand.vmem [shape: f32[128,128], index: 7, kind: input, shape index: {}]   ;;  %s9165_s6 = inlined_call_operand.vmem [shape: f32[1,128], index: 6, kind: input, shape index: {}]   ;;  %s9166_s9 = inlined_call_operand.vmem [shape: f32[128,128], index: 9, kind: input, shape index: {}]   ;;  %s9167_s8 = inlined_call_operand.vmem [shape: f32[1,128], index: 8, kind: input, shape index: {}]   ;;  %s9168_s10 = inlined_call_operand.vmem [shape: f32[1,128], index: 10, kind: input, shape index: {}]   ;;  %s9169_s11 = inlined_call_operand.vmem [shape: f32[8,128], index: 11, kind: output, shape index: {}]  }
   0x1   :  { %v4433_v0 = vld [vmem:[%s9158_s1 + $0x108] sm:$0xff]  ;;  %v4435_v1 = vld [vmem:[%s9158_s1 + $0x118] sm:$0xff]  ;;  %264 = vmatprep.mubr.f32.mxu1 %v6168_v3  ;;  %425 = vmatprep.mubr.f32.mxu0 %v6168_v3  ;;  %v4432_v6 = vld [vmem:[%s9158_s1 + $0x100] sm:$0xff]  ;;  %vm3249_vm3 = vcmask 1043456   ;;  %vm6170_vm4 = vmmov 0   ;;  %vm3633_vm5 = vcmask 1041409  }
   0x2   :  { %v136_v2 = vld [vmem:[%s9158_s1 + $0x8] sm:$0xff]  ;;  %v6242_v4 = vpack.c.bf16 %v4435_v1, %v4433_v0  ;;  %v138_v5 = vld [vmem:[%s9158_s1 + $0x18] sm:$0xff]  ;;  %v4434_v7 = vld [vmem:[%s9158_s1 + $0x110] sm:$0xff]  ;;  %vm3636_vm6 = vcmask 1042434   ;;  %vm3639_vm7 = vcmask 1043459   ;;  %vm3642_vm8 = vcmask 1044484  }
   0x3   :  { %v6253_v8 = vpack.c.bf16 %v138_v5, %v136_v2  ;;  %v6255_v9 = vpack.c.bf16 %v4434_v7, %v4432_v6  ;;  %v135_v10 = vld [vmem:[%s9158_s1] sm:$0xff]  ;;  %v137_v11 = vld [vmem:[%s9158_s1 + $0x10] sm:$0xff]  ;;  %v4437_v12 = vld [vmem:[%s9158_s1 + $0x128] sm:$0xff]  ;;  %vm3645_vm9 = vcmask 1045509   ;;  %vm3648_vm10 = vcmask 1046534  }
   0x4   :  { %5121 = vmatprep.subr.bf16.mxu1 %v6242_v4  ;;  %v6267_v13 = vpack.c.bf16 %v137_v11, %v135_v10  ;;  %v4439_v14 = vld [vmem:[%s9158_s1 + $0x138] sm:$0xff]  ;;  %v140_v15 = vld [vmem:[%s9158_s1 + $0x28] sm:$0xff]  ;;  %v4436_v19 = vld [vmem:[%s9158_s1 + $0x120] sm:$0xff]  ;;  %vm3651_vm11 = vcmask 1047559  }
   0x5   :  { %v142_v16 = vld [vmem:[%s9158_s1 + $0x38] sm:$0xff]  ;;  %5153 = vmatprep.subr.bf16.mxu0 %v6253_v8  ;;  %5123 = vmatpush1.bf16.msra.mxu1 %v6255_v9  ;;  %v6280_v17 = vpack.c.bf16 %v4439_v14, %v4437_v12  ;;  %v4438_v20 = vld [vmem:[%s9158_s1 + $0x130] sm:$0xff]  ;;  %v139_v21 = vld [vmem:[%s9158_s1 + $0x20] sm:$0xff] }
   0x6   :  { %v6282_v18 = vpack.c.bf16 %v142_v16, %v140_v15  ;;  %5155 = vmatpush1.bf16.msra.mxu0 %v6267_v13  ;;  %v6294_v22 = vpack.c.bf16 %v4438_v20, %v4436_v19  ;;  %v141_v23 = vld [vmem:[%s9158_s1 + $0x30] sm:$0xff]  ;;  %v4441_v24 = vld [vmem:[%s9158_s1 + $0x148] sm:$0xff]  ;;  %v4443_v25 = vld [vmem:[%s9158_s1 + $0x158] sm:$0xff] }
   0x7   :  { %5125 = vmatprep.subr.bf16.mxu1 %v6280_v17  ;;  %v6307_v26 = vpack.c.bf16 %v141_v23, %v139_v21  ;;  %v6309_v27 = vpack.c.bf16 %v4443_v25, %v4441_v24  ;;  %v144_v28 = vld [vmem:[%s9158_s1 + $0x48] sm:$0xff]  ;;  %v146_v29 = vld [vmem:[%s9158_s1 + $0x58] sm:$0xff]  ;;  %v4440_v30 = vld [vmem:[%s9158_s1 + $0x140] sm:$0xff] }
   0x8   :  { %5157 = vmatprep.subr.bf16.mxu0 %v6282_v18  ;;  %v6320_v31 = vpack.c.bf16 %v146_v29, %v144_v28  ;;  %v4442_v32 = vld [vmem:[%s9158_s1 + $0x150] sm:$0xff]  ;;  %v143_v33 = vld [vmem:[%s9158_s1 + $0x40] sm:$0xff]  ;;  %v4445_v36 = vld [vmem:[%s9158_s1 + $0x168] sm:$0xff] }
   0x9   :  { %v145_v34 = vld [vmem:[%s9158_s1 + $0x50] sm:$0xff]  ;;  %5127 = vmatpush1.bf16.msra.mxu1 %v6294_v22  ;;  %v6332_v35 = vpack.c.bf16 %v4442_v32, %v4440_v30  ;;  %v4447_v37 = vld [vmem:[%s9158_s1 + $0x178] sm:$0xff]  ;;  %v148_v38 = vld [vmem:[%s9158_s1 + $0x68] sm:$0xff] }
   0xa   :  { %5159 = vmatpush1.bf16.msra.mxu0 %v6307_v26  ;;  %5129 = vmatprep.subr.bf16.mxu1 %v6309_v27  ;;  %v6345_v39 = vpack.c.bf16 %v145_v34, %v143_v33  ;;  %v6347_v40 = vpack.c.bf16 %v4447_v37, %v4445_v36  ;;  %v150_v41 = vld [vmem:[%s9158_s1 + $0x78] sm:$0xff]  ;;  %v4444_v42 = vld [vmem:[%s9158_s1 + $0x160] sm:$0xff]  ;;  %v4446_v43 = vld [vmem:[%s9158_s1 + $0x170] sm:$0xff] }
   0xb   :  { %5161 = vmatprep.subr.bf16.mxu0 %v6320_v31  ;;  %v6359_v44 = vpack.c.bf16 %v150_v41, %v148_v38  ;;  %v147_v45 = vld [vmem:[%s9158_s1 + $0x60] sm:$0xff]  ;;  %v149_v46 = vld [vmem:[%s9158_s1 + $0x70] sm:$0xff]  ;;  %v4449_v47 = vld [vmem:[%s9158_s1 + $0x188] sm:$0xff]  ;;  %v6380_v51 = vpack.c.bf16 %v4446_v43, %v4444_v42 }
   0xc   :  { %v4451_v48 = vld [vmem:[%s9158_s1 + $0x198] sm:$0xff]  ;;  %v152_v49 = vld [vmem:[%s9158_s1 + $0x88] sm:$0xff]  ;;  %v6384_v52 = vpack.c.bf16 %v149_v46, %v147_v45  ;;  %v4448_v54 = vld [vmem:[%s9158_s1 + $0x180] sm:$0xff] }
   0xd   :  { %v154_v50 = vld [vmem:[%s9158_s1 + $0x98] sm:$0xff]  ;;  %5131 = vmatpush1.bf16.msra.mxu1 %v6332_v35  ;;  %v6386_v53 = vpack.c.bf16 %v4451_v48, %v4449_v47  ;;  %v4450_v55 = vld [vmem:[%s9158_s1 + $0x190] sm:$0xff]  ;;  %v151_v56 = vld [vmem:[%s9158_s1 + $0x80] sm:$0xff] }
   0xe   :  { %5163 = vmatpush1.bf16.msra.mxu0 %v6345_v39  ;;  %5133 = vmatprep.subr.bf16.mxu1 %v6347_v40  ;;  %v6398_v57 = vpack.c.bf16 %v154_v50, %v152_v49  ;;  %v153_v58 = vld [vmem:[%s9158_s1 + $0x90] sm:$0xff]  ;;  %v4453_v59 = vld [vmem:[%s9158_s1 + $0x1a8] sm:$0xff]  ;;  %v4455_v60 = vld [vmem:[%s9158_s1 + $0x1b8] sm:$0xff]  ;;  %v6416_v63 = vpack.c.bf16 %v4450_v55, %v4448_v54 }
   0xf   :  { %5165 = vmatprep.subr.bf16.mxu0 %v6359_v44  ;;  %v156_v61 = vld [vmem:[%s9158_s1 + $0xa8] sm:$0xff]  ;;  %v158_v62 = vld [vmem:[%s9158_s1 + $0xb8] sm:$0xff]  ;;  %v6420_v0 = vpack.c.bf16 %v153_v58, %v151_v56  ;;  %v6422_v1 = vpack.c.bf16 %v4455_v60, %v4453_v59  ;;  %v4452_v2 = vld [vmem:[%s9158_s1 + $0x1a0] sm:$0xff] }
  0x10   :  { %v4454_v5 = vld [vmem:[%s9158_s1 + $0x1b0] sm:$0xff]  ;;  %v155_v6 = vld [vmem:[%s9158_s1 + $0xa0] sm:$0xff]  ;;  %v6434_v7 = vpack.c.bf16 %v158_v62, %v156_v61  ;;  %v4457_v11 = vld [vmem:[%s9158_s1 + $0x1c8] sm:$0xff] }
  0x11   :  { %5135 = vmatpush1.bf16.msra.mxu1 %v6380_v51  ;;  %v157_v10 = vld [vmem:[%s9158_s1 + $0xb0] sm:$0xff]  ;;  %v4459_v12 = vld [vmem:[%s9158_s1 + $0x1d8] sm:$0xff]  ;;  %v160_v14 = vld [vmem:[%s9158_s1 + $0xc8] sm:$0xff]  ;;  %v6452_v16 = vpack.c.bf16 %v4454_v5, %v4452_v2 }
  0x12   :  { %5167 = vmatpush1.bf16.msra.mxu0 %v6384_v52  ;;  %5137 = vmatprep.subr.bf16.mxu1 %v6386_v53  ;;  %v162_v15 = vld [vmem:[%s9158_s1 + $0xd8] sm:$0xff]  ;;  %v6456_v19 = vpack.c.bf16 %v157_v10, %v155_v6  ;;  %v6458_v20 = vpack.c.bf16 %v4459_v12, %v4457_v11  ;;  %v4456_v21 = vld [vmem:[%s9158_s1 + $0x1c0] sm:$0xff]  ;;  %v4458_v23 = vld [vmem:[%s9158_s1 + $0x1d0] sm:$0xff] }
  0x13   :  { %5169 = vmatprep.subr.bf16.mxu0 %v6398_v57  ;;  %v159_v24 = vld [vmem:[%s9158_s1 + $0xc0] sm:$0xff]  ;;  %v6470_v25 = vpack.c.bf16 %v162_v15, %v160_v14  ;;  %v161_v28 = vld [vmem:[%s9158_s1 + $0xd0] sm:$0xff]  ;;  %v4461_v29 = vld [vmem:[%s9158_s1 + $0x1e8] sm:$0xff]  ;;  %v6488_v34 = vpack.c.bf16 %v4458_v23, %v4456_v21 }
  0x14   :  { %v4463_v30 = vld [vmem:[%s9158_s1 + $0x1f8] sm:$0xff]  ;;  %v164_v32 = vld [vmem:[%s9158_s1 + $0xe8] sm:$0xff]  ;;  %v6492_v36 = vpack.c.bf16 %v161_v28, %v159_v24  ;;  %v4460_v38 = vld [vmem:[%s9158_s1 + $0x1e0] sm:$0xff] }
  0x15   :  { %5139 = vmatpush1.bf16.msra.mxu1 %v6416_v63  ;;  %v166_v33 = vld [vmem:[%s9158_s1 + $0xf8] sm:$0xff]  ;;  %v6494_v37 = vpack.c.bf16 %v4463_v30, %v4461_v29  ;;  %v4462_v41 = vld [vmem:[%s9158_s1 + $0x1f0] sm:$0xff]  ;;  %v163_v43 = vld [vmem:[%s9158_s1 + $0xe0] sm:$0xff] }
  0x16   :  { %5171 = vmatpush1.bf16.msra.mxu0 %v6420_v0  ;;  %5141 = vmatprep.subr.bf16.mxu1 %v6422_v1  ;;  %v6503_v42 = vpack.c.bf16 %v166_v33, %v164_v32  ;;  %v165_v45 = vld [vmem:[%s9158_s1 + $0xf0] sm:$0xff]  ;;  %v4465_v46 = vld [vmem:[%s9158_s1 + $0x208] sm:$0xff]  ;;  %v4467_v47 = vld [vmem:[%s9158_s1 + $0x218] sm:$0xff]  ;;  %v6518_v48 = vpack.c.bf16 %v4462_v41, %v4460_v38 }
  0x17   :  { %5173 = vmatprep.subr.bf16.mxu0 %v6434_v7  ;;  %v6522_v49 = vpack.c.bf16 %v165_v45, %v163_v43  ;;  %v6525_v50 = vpack.c.bf16 %v4467_v47, %v4465_v46  ;;  %v4464_v54 = vld [vmem:[%s9158_s1 + $0x200] sm:$0xff]  ;;  %v4466_v55 = vld [vmem:[%s9158_s1 + $0x210] sm:$0xff]  ;;  %v4469_v58 = vld [vmem:[%s9158_s1 + $0x228] sm:$0xff] }
  0x18   :  { %v6537_v56 = vld [vmem:[%s9159_s0 + $0x80] sm:$0xff]  ;;  %v4471_v59 = vld [vmem:[%s9158_s1 + $0x238] sm:$0xff]  ;;  %v6551_v61 = vpack.c.bf16 %v4466_v55, %v4464_v54  ;;  %v4470_v5 = vld [vmem:[%s9158_s1 + $0x230] sm:$0xff] }
  0x19   :  { %5143 = vmatpush1.bf16.msra.mxu1 %v6452_v16  ;;  %v38_v60 = vld [vmem:[%s9159_s0] sm:$0xff]  ;;  %v6554_v62 = vpack.c.bf16 %v4471_v59, %v4469_v58  ;;  %v4473_v6 = vld [vmem:[%s9158_s1 + $0x248] sm:$0xff]  ;;  %v4475_v10 = vld [vmem:[%s9158_s1 + $0x258] sm:$0xff] }
  0x1a   :  { %5175 = vmatpush1.bf16.msra.mxu0 %v6456_v19  ;;  %5145 = vmatprep.subr.bf16.mxu1 %v6458_v20  ;;  %v4468_v2 = vld [vmem:[%s9158_s1 + $0x220] sm:$0xff]  ;;  %v6585_v12 = vpack.c.bf16 %v4475_v10, %v4473_v6  ;;  %v4474_v15 = vld [vmem:[%s9158_s1 + $0x250] sm:$0xff]  ;;  %v4477_v21 = vld [vmem:[%s9158_s1 + $0x268] sm:$0xff] }
  0x1b   :  { %5177 = vmatprep.subr.bf16.mxu0 %v6470_v25  ;;  %v6581_v11 = vpack.c.bf16 %v4470_v5, %v4468_v2  ;;  %v4472_v14 = vld [vmem:[%s9158_s1 + $0x240] sm:$0xff]  ;;  %v4479_v23 = vld [vmem:[%s9158_s1 + $0x278] sm:$0xff]  ;;  %v40_v24 = vld [vmem:[%s9159_s0 + $0x10] sm:$0xff] }
  0x1c   :  { %v6612_v28 = vpack.c.bf16 %v4474_v15, %v4472_v14  ;;  %v6616_v29 = vpack.c.bf16 %v4479_v23, %v4477_v21  ;;  %v4476_v30 = vld [vmem:[%s9158_s1 + $0x260] sm:$0xff]  ;;  %v4481_v32 = vld [vmem:[%s9158_s1 + $0x288] sm:$0xff]  ;;  %v4483_v33 = vld [vmem:[%s9158_s1 + $0x298] sm:$0xff] }
  0x1d   :  { %5147 = vmatpush1.bf16.msra.mxu1 %v6488_v34  ;;  %v41_v38 = vld [vmem:[%s9159_s0 + $0x18] sm:$0xff]  ;;  %v6647_v43 = vpack.c.bf16 %v4483_v33, %v4481_v32  ;;  %v4480_v45 = vld [vmem:[%s9158_s1 + $0x280] sm:$0xff]  ;;  %v4485_v46 = vld [vmem:[%s9158_s1 + $0x2a8] sm:$0xff] }
  0x1e   :  { %5179 = vmatpush1.bf16.msra.mxu0 %v6492_v36  ;;  %5149 = vmatprep.subr.bf16.mxu1 %v6494_v37  ;;  %v4487_v47 = vld [vmem:[%s9158_s1 + $0x2b8] sm:$0xff]  ;;  %v42_v54 = vld [vmem:[%s9159_s0 + $0x20] sm:$0xff]  ;;  %v43_v5 = vld [vmem:[%s9159_s0 + $0x28] sm:$0xff] }
  0x1f   :  { %5181 = vmatprep.subr.bf16.mxu0 %v6503_v42  ;;  %v6678_v58 = vpack.c.bf16 %v4487_v47, %v4485_v46  ;;  %v4484_v59 = vld [vmem:[%s9158_s1 + $0x2a0] sm:$0xff]  ;;  %v4491_v2 = vld [vmem:[%s9158_s1 + $0x2d8] sm:$0xff]  ;;  %v4493_v14 = vld [vmem:[%s9158_s1 + $0x2e8] sm:$0xff] }
  0x20   :  { %v4495_v15 = vld [vmem:[%s9158_s1 + $0x2f8] sm:$0xff]  ;;  %v44_v21 = vld [vmem:[%s9159_s0 + $0x30] sm:$0xff] }
  0x21   :  { %5151 = vmatpush1.bf16.msra.mxu1 %v6518_v48  ;;  %v4499_v32 = vld [vmem:[%s9158_s1 + $0x318] sm:$0xff]  ;;  %v48_v46 = vld [vmem:[%s9159_s0 + $0x50] sm:$0xff] }
  0x22   :  { %5183 = vmatpush1.bf16.msra.mxu0 %v6522_v49  ;;  %5281 = vmatprep.subr.bf16.mxu1 %v6242_v4  ;;  %v6566_v4 = vld [vmem:[%s9159_s0 + $0x88] sm:$0xff]  ;;  %v45_v33 = vld [vmem:[%s9159_s0 + $0x38] sm:$0xff] }
  0x23   :  { %5185 = vmatprep.subr.bf16.mxu0 %v6525_v50  ;;  %v6814_v47 = vld [vmem:[%s9159_s0 + $0xd8] sm:$0xff] }
  0x24   :  { %265 = vmatmul.mubr.f32.vlgmr.msra.gmra.mrb[0].mxu1 %v6537_v56 }
  0x25   :  { %426 = vmatmul.mubr.f32.vlgmr.msra.gmra.mrb[0].mxu0 %v38_v60  ;;  %5283 = vmatpush1.bf16.msra.mxu1 %v6255_v9  ;;  %v39_v9 = vld [vmem:[%s9159_s0 + $0x8] sm:$0xff] }
  0x26   :  { %270 = vmatprep.mubr.f32.mxu1 %v6168_v3  ;;  %431 = vmatprep.mubr.f32.mxu0 %v6168_v3  ;;  %v4489_v60 = vld [vmem:[%s9158_s1 + $0x2c8] sm:$0xff] }
  0x27   :  { %5285 = vmatprep.subr.bf16.mxu1 %v6280_v17  ;;  %5187 = vmatpush1.bf16.msra.mxu0 %v6551_v61  ;;  %v6597_v17 = vld [vmem:[%s9159_s0 + $0x90] sm:$0xff]  ;;  %v6709_v10 = vpack.c.bf16 %v4491_v2, %v4489_v60  ;;  %v6836_v60 = vld [vmem:[%s9159_s0 + $0xe8] sm:$0xff] }
  0x28   :  { %271 = vmatmul.mubr.f32.gmra.mrb[2].mxu1 %v6566_v4  ;;  %5189 = vmatprep.subr.bf16.mxu0 %v6554_v62  ;;  %v51_v2 = vld [vmem:[%s9159_s0 + $0x68] sm:$0xff] }
  0x29   :  { %432 = vmatmul.mubr.f32.gmra.mrb[2].mxu0 %v39_v9  ;;  %276 = vmatprep.mubr.f32.mxu1 %v6168_v3  ;;  %v4488_v9 = vld [vmem:[%s9158_s1 + $0x2c0] sm:$0xff] }
  0x2a   :  { %437 = vmatprep.mubr.f32.mxu0 %v6168_v3  ;;  %5287 = vmatpush1.bf16.msra.mxu1 %v6294_v22  ;;  %v4478_v22 = vld [vmem:[%s9158_s1 + $0x270] sm:$0xff] }
  0x2b   :  { %5289 = vmatprep.subr.bf16.mxu1 %v6309_v27  ;;  %5191 = vmatpush1.bf16.msra.mxu0 %v6581_v11  ;;  %v6628_v27 = vld [vmem:[%s9159_s0 + $0x98] sm:$0xff]  ;;  %v6643_v41 = vpack.c.bf16 %v4478_v22, %v4476_v30  ;;  %v4492_v30 = vld [vmem:[%s9158_s1 + $0x2e0] sm:$0xff]  ;;  %v4497_v22 = vld [vmem:[%s9158_s1 + $0x308] sm:$0xff] }
  0x2c   :  { %277 = vmatmul.mubr.f32.gmra.mrb[4].mxu1 %v6597_v17  ;;  %5193 = vmatprep.subr.bf16.mxu0 %v6585_v12 }
  0x2d   :  { %438 = vmatmul.mubr.f32.gmra.mrb[4].mxu0 %v40_v24  ;;  %282 = vmatprep.mubr.f32.mxu1 %v6168_v3  ;;  %v6740_v24 = vpack.c.bf16 %v4495_v15, %v4493_v14  ;;  %v53_v14 = vld [vmem:[%s9159_s0 + $0x78] sm:$0x3f]  ;;  %v4496_v15 = vld [vmem:[%s9158_s1 + $0x300] sm:$0xff] }
  0x2e   :  { %443 = vmatprep.mubr.f32.mxu0 %v6168_v3  ;;  %5291 = vmatpush1.bf16.msra.mxu1 %v6332_v35  ;;  %v4482_v35 = vld [vmem:[%s9158_s1 + $0x290] sm:$0xff] }
  0x2f   :  { %5293 = vmatprep.subr.bf16.mxu1 %v6347_v40  ;;  %5195 = vmatpush1.bf16.msra.mxu0 %v6612_v28  ;;  %v6659_v40 = vld [vmem:[%s9159_s0 + $0xa0] sm:$0xff]  ;;  %v6674_v55 = vpack.c.bf16 %v4482_v35, %v4480_v45  ;;  %v6771_v45 = vpack.c.bf16 %v4499_v32, %v4497_v22  ;;  %v4503_v22 = vld [vmem:[%s9158_s1 + $0x338] sm:$0xff] }
  0x30   :  { %283 = vmatmul.mubr.f32.gmra.mrb[6].mxu1 %v6628_v27  ;;  %5197 = vmatprep.subr.bf16.mxu0 %v6616_v29  ;;  %v6777_v35 = vld [vmem:[%s9159_s0 + $0xc0] sm:$0xff] }
  0x31   :  { %444 = vmatmul.mubr.f32.gmra.mrb[6].mxu0 %v41_v38  ;;  %288 = vmatprep.mubr.f32.mxu1 %v6168_v3 }
  0x32   :  { %449 = vmatprep.mubr.f32.mxu0 %v6168_v3  ;;  %5295 = vmatpush1.bf16.msra.mxu1 %v6380_v51  ;;  %v4486_v51 = vld [vmem:[%s9158_s1 + $0x2b0] sm:$0xff] }
  0x33   :  { %5297 = vmatprep.subr.bf16.mxu1 %v6386_v53  ;;  %5199 = vmatpush1.bf16.msra.mxu0 %v6643_v41  ;;  %v6690_v53 = vld [vmem:[%s9159_s0 + $0xa8] sm:$0xff]  ;;  %v6705_v6 = vpack.c.bf16 %v4486_v51, %v4484_v59  ;;  %v6825_v59 = vld [vmem:[%s9159_s0 + $0xe0] sm:$0xff] }
  0x34   :  { %289 = vmatmul.mubr.f32.gmra.mrb[8].mxu1 %v6659_v40  ;;  %5201 = vmatprep.subr.bf16.mxu0 %v6647_v43  ;;  %v50_v51 = vld [vmem:[%s9159_s0 + $0x60] sm:$0xff] }
  0x35   :  { %450 = vmatmul.mubr.f32.gmra.mrb[8].mxu0 %v42_v54  ;;  %294 = vmatprep.mubr.f32.mxu1 %v6168_v3  ;;  %v49_v54 = vld [vmem:[%s9159_s0 + $0x58] sm:$0xff] }
  0x36   :  { %455 = vmatprep.mubr.f32.mxu0 %v6168_v3  ;;  %5299 = vmatpush1.bf16.msra.mxu1 %v6416_v63  ;;  %v4490_v63 = vld [vmem:[%s9158_s1 + $0x2d0] sm:$0xff] }
  0x37   :  { %5301 = vmatprep.subr.bf16.mxu1 %v6422_v1  ;;  %5203 = vmatpush1.bf16.msra.mxu0 %v6674_v55  ;;  %v6721_v1 = vld [vmem:[%s9159_s0 + $0xb0] sm:$0xff]  ;;  %v6736_v23 = vpack.c.bf16 %v4490_v63, %v4488_v9  ;;  %v6858_v63 = vld [vmem:[%s9159_s0 + $0xf8] sm:$0x3f] }
  0x38   :  { %295 = vmatmul.mubr.f32.gmra.mrb[10].mxu1 %v6690_v53  ;;  %5205 = vmatprep.subr.bf16.mxu0 %v6678_v58  ;;  %v52_v9 = vld [vmem:[%s9159_s0 + $0x70] sm:$0xff] }
  0x39   :  { %456 = vmatmul.mubr.f32.gmra.mrb[10].mxu0 %v43_v5  ;;  %300 = vmatprep.mubr.f32.mxu1 %v6168_v3  ;;  %v6847_v5 = vld [vmem:[%s9159_s0 + $0xf0] sm:$0xff] }
  0x3a   :  { %461 = vmatprep.mubr.f32.mxu0 %v6168_v3  ;;  %5303 = vmatpush1.bf16.msra.mxu1 %v6452_v16  ;;  %v4494_v16 = vld [vmem:[%s9158_s1 + $0x2f0] sm:$0xff] }
  0x3b   :  { %5305 = vmatprep.subr.bf16.mxu1 %v6458_v20  ;;  %5207 = vmatpush1.bf16.msra.mxu0 %v6705_v6  ;;  %v6752_v20 = vld [vmem:[%s9159_s0 + $0xb8] sm:$0xff]  ;;  %v6767_v38 = vpack.c.bf16 %v4494_v16, %v4492_v30  ;;  %v71_v30 = vld [vmem:[%s9159_s0 + $0x1] sm:$0xff] }
  0x3c   :  { %301 = vmatmul.mubr.f32.gmra.mrb[12].mxu1 %v6721_v1  ;;  %5209 = vmatprep.subr.bf16.mxu0 %v6709_v10  ;;  %v4501_v16 = vld [vmem:[%s9158_s1 + $0x328] sm:$0xff] }
  0x3d   :  { %462 = vmatmul.mubr.f32.gmra.mrb[12].mxu0 %v44_v21  ;;  %306 = vmatprep.mubr.f32.mxu1 %v6168_v3  ;;  %v4498_v21 = vld [vmem:[%s9158_s1 + $0x310] sm:$0xff] }
  0x3e   :  { %467 = vmatprep.mubr.f32.mxu0 %v6168_v3  ;;  %5307 = vmatpush1.bf16.msra.mxu1 %v6488_v34  ;;  %v46_v34 = vld [vmem:[%s9159_s0 + $0x40] sm:$0xff]  ;;  %v6882_v32 = vpack.c.bf16 %v4498_v21, %v4496_v15  ;;  %v4509_v15 = vld [vmem:[%s9158_s1 + $0x368] sm:$0xff]  ;;  %v4511_v21 = vld [vmem:[%s9158_s1 + $0x378] sm:$0xff] }
  0x3f   :  { %5309 = vmatprep.subr.bf16.mxu1 %v6494_v37  ;;  %5211 = vmatpush1.bf16.msra.mxu0 %v6736_v23  ;;  %v6792_v37 = vld [vmem:[%s9159_s0 + $0xc8] sm:$0xff] }
  0x40   :  { %307 = vmatmul.mubr.f32.gmra.mrb[14].mxu1 %v6752_v20  ;;  %5213 = vmatprep.subr.bf16.mxu0 %v6740_v24 }
  0x41   :  { %468 = vmatmul.mubr.f32.gmra.mrb[14].mxu0 %v45_v33  ;;  %312 = vmatprep.mubr.f32.mxu1 %v6168_v3  ;;  %v6884_v33 = vpack.c.bf16 %v4503_v22, %v4501_v16  ;;  %v6934_v16 = vpack.c.bf16 %v4511_v21, %v4509_v15  ;;  %v4508_v22 = vld [vmem:[%s9158_s1 + $0x360] sm:$0xff] }
  0x42   :  { %473 = vmatprep.mubr.f32.mxu0 %v6168_v3  ;;  %5311 = vmatpush1.bf16.msra.mxu1 %v6518_v48  ;;  %v47_v48 = vld [vmem:[%s9159_s0 + $0x48] sm:$0xff]  ;;  %v4516_v21 = vld [vmem:[%s9158_s1 + $0x3a0] sm:$0xff] }
  0x43   :  { %5215 = vmatpush1.bf16.msra.mxu0 %v6767_v38  ;;  %5313 = vmatprep.subr.bf16.mxu1 %v6253_v8  ;;  %v6803_v8 = vld [vmem:[%s9159_s0 + $0xd0] sm:$0xff] }
  0x44   :  { %313 = vmatmul.mubr.f32.gmra.mrb[16].mxu1 %v6777_v35  ;;  %5217 = vmatprep.subr.bf16.mxu0 %v6771_v45 }
  0x45   :  { %474 = vmatmul.mubr.f32.gmra.mrb[16].mxu0 %v46_v34  ;;  %318 = vmatprep.mubr.f32.mxu1 %v6168_v3  ;;  %v4500_v34 = vld [vmem:[%s9158_s1 + $0x320] sm:$0xff] }
  0x46   :  { %479 = vmatprep.mubr.f32.mxu0 %v6168_v3 }
  0x48   :  { %319 = vmatmul.mubr.f32.gmra.mrb[18].mxu1 %v6792_v37 }
  0x49   :  { %480 = vmatmul.mubr.f32.gmra.mrb[18].mxu0 %v47_v48  ;;  %324 = vmatprep.mubr.f32.mxu1 %v6168_v3  ;;  %v4502_v48 = vld [vmem:[%s9158_s1 + $0x330] sm:$0xff] }
  0x4a   :  { %485 = vmatprep.mubr.f32.mxu0 %v6168_v3 }
  0x4c   :  { %325 = vmatmul.mubr.f32.gmra.mrb[20].mxu1 %v6803_v8 }
  0x4d   :  { %486 = vmatmul.mubr.f32.gmra.mrb[20].mxu0 %v48_v46  ;;  %330 = vmatprep.mubr.f32.mxu1 %v6168_v3  ;;  %v72_v46 = vld [vmem:[%s9159_s0 + $0x9] sm:$0xff] }
  0x4e   :  { %491 = vmatprep.mubr.f32.mxu0 %v6168_v3 }
  0x50   :  { %331 = vmatmul.mubr.f32.gmra.mrb[22].mxu1 %v6814_v47 }
  0x51   :  { %492 = vmatmul.mubr.f32.gmra.mrb[22].mxu0 %v49_v54  ;;  %336 = vmatprep.mubr.f32.mxu1 %v6168_v3  ;;  %v4505_v54 = vld [vmem:[%s9158_s1 + $0x348] sm:$0xff] }
  0x52   :  { %497 = vmatprep.mubr.f32.mxu0 %v6168_v3 }
  0x54   :  { %337 = vmatmul.mubr.f32.gmra.mrb[24].mxu1 %v6825_v59 }
  0x55   :  { %498 = vmatmul.mubr.f32.gmra.mrb[24].mxu0 %v50_v51  ;;  %342 = vmatprep.mubr.f32.mxu1 %v6168_v3  ;;  %v4507_v51 = vld [vmem:[%s9158_s1 + $0x358] sm:$0xff] }
  0x56   :  { %503 = vmatprep.mubr.f32.mxu0 %v6168_v3 }
  0x58   :  { %343 = vmatmul.mubr.f32.gmra.mrb[26].mxu1 %v6836_v60 }
  0x59   :  { %504 = vmatmul.mubr.f32.gmra.mrb[26].mxu0 %v51_v2  ;;  %348 = vmatprep.mubr.f32.mxu1 %v6168_v3  ;;  %v6909_v2 = vpack.c.bf16 %v4507_v51, %v4505_v54  ;;  %v4512_v51 = vld [vmem:[%s9158_s1 + $0x380] sm:$0xff] }
  0x5a   :  { %509 = vmatprep.mubr.f32.mxu0 %v6168_v3 }
  0x5c   :  { %349 = vmatmul.mubr.f32.gmra.mrb[28].mxu1 %v6847_v5 }
  0x5d   :  { %510 = vmatmul.mubr.f32.gmra.mrb[28].mxu0 %v52_v9  ;;  %354 = vmatprep.mubr.f32.mxu1 %v6168_v3  ;;  %v4504_v9 = vld [vmem:[%s9158_s1 + $0x340] sm:$0xff] }
  0x5e   :  { %515 = vmatprep.mubr.f32.mxu0 %v6168_v3 }
  0x60   :  { %355 = vmatmul.mubr.f32.gmra.mrb[30].mxu1 %v6858_v63 }
  0x61   :  { %516 = vmatmul.mubr.f32.gmra.mrb[30].mxu0 %v53_v14  ;;  %1264 = vmatprep.mubr.f32.mxu1 %v6168_v3  ;;  %v4506_v14 = vld [vmem:[%s9158_s1 + $0x350] sm:$0xff] }
  0x62   :  { %619 = vmatprep.mubr.f32.mxu0 %v6168_v3 }
  0x64   :  { %1265 = vmatmul.mubr.f32.vlgmr.msra.gmra.mrb[32].mxu1 %v71_v30 }
  0x65   :  { %620 = vmatmul.mubr.f32.vlgmr.msra.gmra.mrb[0].mxu0 %v71_v30  ;;  %5315 = vmatpush1.bf16.msra.mxu1 %v6267_v13  ;;  %v6906_v13 = vpack.c.bf16 %v4502_v48, %v4500_v34  ;;  %v6931_v30 = vpack.c.bf16 %v4506_v14, %v4504_v9  ;;  %v4510_v34 = vld [vmem:[%s9158_s1 + $0x370] sm:$0xff]  ;;  %v4515_v48 = vld [vmem:[%s9158_s1 + $0x398] sm:$0xff] }
  0x66   :  { %625 = vmatprep.mubr.f32.mxu0 %v6168_v3  ;;  %1270 = vmatprep.mubr.f32.mxu1 %v6168_v3  ;;  %v4514_v9 = vld [vmem:[%s9158_s1 + $0x390] sm:$0xff]  ;;  %v4519_v14 = vld [vmem:[%s9158_s1 + $0x3b8] sm:$0xff] }
  0x67   :  { %5317 = vmatprep.subr.bf16.mxu1 %v6282_v18  ;;  %5219 = vmatpush1.bf16.msra.mxu0 %v6882_v32  ;;  %v73_v18 = vld [vmem:[%s9159_s0 + $0x11] sm:$0xff] }
  0x68   :  { %1271 = vmatmul.mubr.f32.gmra.mrb[34].mxu1 %v72_v46  ;;  %5221 = vmatprep.subr.bf16.mxu0 %v6884_v33 }
  0x69   :  { %626 = vmatmul.mubr.f32.gmra.mrb[2].mxu0 %v72_v46  ;;  %1276 = vmatprep.mubr.f32.mxu1 %v6168_v3  ;;  %v6956_v46 = vpack.c.bf16 %v4510_v34, %v4508_v22  ;;  %v4518_v22 = vld [vmem:[%s9158_s1 + $0x3b0] sm:$0xff]  ;;  %v4523_v34 = vld [vmem:[%s9158_s1 + $0x3d8] sm:$0xff] }
  0x6a   :  { %631 = vmatprep.mubr.f32.mxu0 %v6168_v3  ;;  %5319 = vmatpush1.bf16.msra.mxu1 %v6307_v26  ;;  %v74_v26 = vld [vmem:[%s9159_s0 + $0x19] sm:$0xff] }
  0x6b   :  { %5321 = vmatprep.subr.bf16.mxu1 %v6320_v31  ;;  %5223 = vmatpush1.bf16.msra.mxu0 %v6906_v13  ;;  %v4513_v31 = vld [vmem:[%s9158_s1 + $0x388] sm:$0xff] }
  0x6c   :  { %1277 = vmatmul.mubr.f32.gmra.mrb[36].mxu1 %v73_v18  ;;  %5225 = vmatprep.subr.bf16.mxu0 %v6909_v2  ;;  %v6959_v54 = vpack.c.bf16 %v4515_v48, %v4513_v31  ;;  %v4520_v48 = vld [vmem:[%s9158_s1 + $0x3c0] sm:$0xff] }
  0x6d   :  { %632 = vmatmul.mubr.f32.gmra.mrb[4].mxu0 %v73_v18  ;;  %1282 = vmatprep.mubr.f32.mxu1 %v6168_v3  ;;  %v6981_v18 = vpack.c.bf16 %v4514_v9, %v4512_v51  ;;  %v4522_v51 = vld [vmem:[%s9158_s1 + $0x3d0] sm:$0xff]  ;;  %v4527_v9 = vld [vmem:[%s9158_s1 + $0x3f8] sm:$0xff] }
  0x6e   :  { %637 = vmatprep.mubr.f32.mxu0 %v6168_v3  ;;  %5323 = vmatpush1.bf16.msra.mxu1 %v6345_v39  ;;  %v75_v39 = vld [vmem:[%s9159_s0 + $0x21] sm:$0xff] }
  0x6f   :  { %5325 = vmatprep.subr.bf16.mxu1 %v6359_v44  ;;  %5227 = vmatpush1.bf16.msra.mxu0 %v6931_v30  ;;  %v4517_v44 = vld [vmem:[%s9158_s1 + $0x3a8] sm:$0xff] }
  0x70   :  { %1283 = vmatmul.mubr.f32.gmra.mrb[38].mxu1 %v74_v26  ;;  %5229 = vmatprep.subr.bf16.mxu0 %v6934_v16  ;;  %v6984_v15 = vpack.c.bf16 %v4519_v14, %v4517_v44  ;;  %v4524_v14 = vld [vmem:[%s9158_s1 + $0x3e0] sm:$0xff] }
  0x71   :  { %638 = vmatmul.mubr.f32.gmra.mrb[6].mxu0 %v74_v26  ;;  %1288 = vmatprep.mubr.f32.mxu1 %v6168_v3  ;;  %v7006_v26 = vpack.c.bf16 %v4518_v22, %v4516_v21  ;;  %v4526_v21 = vld [vmem:[%s9158_s1 + $0x3f0] sm:$0xff]  ;;  %v4531_v22 = vld [vmem:[%s9158_s1 + $0x418] sm:$0xff] }
  0x72   :  { %643 = vmatprep.mubr.f32.mxu0 %v6168_v3  ;;  %5327 = vmatpush1.bf16.msra.mxu1 %v6384_v52  ;;  %v76_v52 = vld [vmem:[%s9159_s0 + $0x29] sm:$0xff] }
  0x73   :  { %5329 = vmatprep.subr.bf16.mxu1 %v6398_v57  ;;  %5231 = vmatpush1.bf16.msra.mxu0 %v6956_v46  ;;  %v4521_v57 = vld [vmem:[%s9158_s1 + $0x3c8] sm:$0xff] }
  0x74   :  { %1289 = vmatmul.mubr.f32.gmra.mrb[40].mxu1 %v75_v39  ;;  %5233 = vmatprep.subr.bf16.mxu0 %v6959_v54  ;;  %v7009_v31 = vpack.c.bf16 %v4523_v34, %v4521_v57  ;;  %v79_v34 = vld [vmem:[%s9159_s0 + $0x41] sm:$0xff] }
  0x75   :  { %644 = vmatmul.mubr.f32.gmra.mrb[8].mxu0 %v75_v39  ;;  %1294 = vmatprep.mubr.f32.mxu1 %v6168_v3  ;;  %v7031_v39 = vpack.c.bf16 %v4522_v51, %v4520_v48  ;;  %v84_v48 = vld [vmem:[%s9159_s0 + $0x69] sm:$0xff]  ;;  %v85_v51 = vld [vmem:[%s9159_s0 + $0x71] sm:$0xff] }
  0x76   :  { %649 = vmatprep.mubr.f32.mxu0 %v6168_v3  ;;  %5331 = vmatpush1.bf16.msra.mxu1 %v6420_v0  ;;  %v77_v0 = vld [vmem:[%s9159_s0 + $0x31] sm:$0xff] }
  0x77   :  { %5333 = vmatprep.subr.bf16.mxu1 %v6434_v7  ;;  %5235 = vmatpush1.bf16.msra.mxu0 %v6981_v18  ;;  %v4525_v7 = vld [vmem:[%s9158_s1 + $0x3e8] sm:$0xff] }
  0x78   :  { %1295 = vmatmul.mubr.f32.gmra.mrb[42].mxu1 %v76_v52  ;;  %5237 = vmatprep.subr.bf16.mxu0 %v6984_v15  ;;  %v7034_v44 = vpack.c.bf16 %v4527_v9, %v4525_v7  ;;  %v4528_v7 = vld [vmem:[%s9158_s1 + $0x400] sm:$0xff]  ;;  %v4530_v9 = vld [vmem:[%s9158_s1 + $0x410] sm:$0xff] }
  0x79   :  { %650 = vmatmul.mubr.f32.gmra.mrb[10].mxu0 %v76_v52  ;;  %1300 = vmatprep.mubr.f32.mxu1 %v6168_v3  ;;  %v7056_v52 = vpack.c.bf16 %v4526_v21, %v4524_v14  ;;  %v4533_v14 = vld [vmem:[%s9158_s1 + $0x428] sm:$0xff]  ;;  %v4535_v21 = vld [vmem:[%s9158_s1 + $0x438] sm:$0xff] }
  0x7a   :  { %655 = vmatprep.mubr.f32.mxu0 %v6168_v3  ;;  %5335 = vmatpush1.bf16.msra.mxu1 %v6456_v19  ;;  %v78_v19 = vld [vmem:[%s9159_s0 + $0x39] sm:$0xff] }
  0x7b   :  { %5337 = vmatprep.subr.bf16.mxu1 %v6470_v25  ;;  %5239 = vmatpush1.bf16.msra.mxu0 %v7006_v26  ;;  %v4529_v25 = vld [vmem:[%s9158_s1 + $0x408] sm:$0xff] }
  0x7c   :  { %1301 = vmatmul.mubr.f32.gmra.mrb[44].mxu1 %v77_v0  ;;  %5241 = vmatprep.subr.bf16.mxu0 %v7009_v31  ;;  %v7059_v57 = vpack.c.bf16 %v4531_v22, %v4529_v25  ;;  %v7124_v25 = vpack.c.bf16 %v4530_v9, %v4528_v7  ;;  %v7127_v22 = vpack.c.bf16 %v4535_v21, %v4533_v14  ;;  %v4540_v14 = vld [vmem:[%s9158_s1 + $0x460] sm:$0xff] }
  0x7d   :  { %656 = vmatmul.mubr.f32.gmra.mrb[12].mxu0 %v77_v0  ;;  %1306 = vmatprep.mubr.f32.mxu1 %v6168_v3  ;;  %v86_v0 = vld [vmem:[%s9159_s0 + $0x79] sm:$0x3f] }
  0x7e   :  { %661 = vmatprep.mubr.f32.mxu0 %v6168_v3  ;;  %5339 = vmatpush1.bf16.msra.mxu1 %v6492_v36  ;;  %v80_v36 = vld [vmem:[%s9159_s0 + $0x49] sm:$0xff]  ;;  %v7205_v21 = vld [vmem:[%s9159_s0 + $0x99] sm:$0xff] }
  0x7f   :  { %5341 = vmatprep.subr.bf16.mxu1 %v6503_v42  ;;  %5243 = vmatpush1.bf16.msra.mxu0 %v7031_v39  ;;  %v81_v42 = vld [vmem:[%s9159_s0 + $0x51] sm:$0xff] }
  0x80   :  { %1307 = vmatmul.mubr.f32.gmra.mrb[46].mxu1 %v78_v19  ;;  %5245 = vmatprep.subr.bf16.mxu0 %v7034_v44 }
  0x81   :  { %662 = vmatmul.mubr.f32.gmra.mrb[14].mxu0 %v78_v19  ;;  %1312 = vmatprep.mubr.f32.mxu1 %v6168_v3  ;;  %v7122_v19 = vld [vmem:[%s9159_s0 + $0x81] sm:$0xff] }
  0x82   :  { %667 = vmatprep.mubr.f32.mxu0 %v6168_v3  ;;  %5343 = vmatpush1.bf16.msra.mxu1 %v6522_v49  ;;  %v82_v49 = vld [vmem:[%s9159_s0 + $0x59] sm:$0xff] }
  0x83   :  { %5247 = vmatpush1.bf16.msra.mxu0 %v7056_v52  ;;  %5345 = vmatprep.subr.bf16.mxu1 %v6525_v50  ;;  %v83_v50 = vld [vmem:[%s9159_s0 + $0x61] sm:$0xff] }
  0x84   :  { %1313 = vmatmul.mubr.f32.gmra.mrb[48].mxu1 %v79_v34  ;;  %5249 = vmatprep.subr.bf16.mxu0 %v7059_v57 }
  0x85   :  { %668 = vmatmul.mubr.f32.gmra.mrb[16].mxu0 %v79_v34  ;;  %1318 = vmatprep.mubr.f32.mxu1 %v6168_v3  ;;  %v4532_v34 = vld [vmem:[%s9158_s1 + $0x420] sm:$0xff] }
  0x86   :  { %673 = vmatprep.mubr.f32.mxu0 %v6168_v3 }
  0x88   :  { %1319 = vmatmul.mubr.f32.gmra.mrb[50].mxu1 %v80_v36 }
  0x89   :  { %674 = vmatmul.mubr.f32.gmra.mrb[18].mxu0 %v80_v36  ;;  %1324 = vmatprep.mubr.f32.mxu1 %v6168_v3  ;;  %v4534_v36 = vld [vmem:[%s9158_s1 + $0x430] sm:$0xff] }
  0x8a   :  { %679 = vmatprep.mubr.f32.mxu0 %v6168_v3 }
  0x8c   :  { %1325 = vmatmul.mubr.f32.gmra.mrb[52].mxu1 %v81_v42 }
  0x8d   :  { %680 = vmatmul.mubr.f32.gmra.mrb[20].mxu0 %v81_v42  ;;  %1330 = vmatprep.mubr.f32.mxu1 %v6168_v3  ;;  %v4537_v42 = vld [vmem:[%s9158_s1 + $0x448] sm:$0xff] }
  0x8e   :  { %685 = vmatprep.mubr.f32.mxu0 %v6168_v3 }
  0x90   :  { %1331 = vmatmul.mubr.f32.gmra.mrb[54].mxu1 %v82_v49 }
  0x91   :  { %686 = vmatmul.mubr.f32.gmra.mrb[22].mxu0 %v82_v49  ;;  %1336 = vmatprep.mubr.f32.mxu1 %v6168_v3  ;;  %v7148_v49 = vld [vmem:[%s9159_s0 + $0x89] sm:$0xff] }
  0x92   :  { %691 = vmatprep.mubr.f32.mxu0 %v6168_v3 }
  0x94   :  { %1337 = vmatmul.mubr.f32.gmra.mrb[56].mxu1 %v83_v50 }
  0x95   :  { %692 = vmatmul.mubr.f32.gmra.mrb[24].mxu0 %v83_v50  ;;  %1342 = vmatprep.mubr.f32.mxu1 %v6168_v3 }
  0x96   :  { %697 = vmatprep.mubr.f32.mxu0 %v6168_v3 }
  0x98   :  { %1343 = vmatmul.mubr.f32.gmra.mrb[58].mxu1 %v84_v48 }
  0x99   :  { %698 = vmatmul.mubr.f32.gmra.mrb[26].mxu0 %v84_v48  ;;  %1348 = vmatprep.mubr.f32.mxu1 %v6168_v3  ;;  %v4536_v48 = vld [vmem:[%s9158_s1 + $0x440] sm:$0xff] }
  0x9a   :  { %703 = vmatprep.mubr.f32.mxu0 %v6168_v3 }
  0x9c   :  { %1349 = vmatmul.mubr.f32.gmra.mrb[60].mxu1 %v85_v51 }
  0x9d   :  { %704 = vmatmul.mubr.f32.gmra.mrb[28].mxu0 %v85_v51  ;;  %1354 = vmatprep.mubr.f32.mxu1 %v6168_v3  ;;  %v4538_v51 = vld [vmem:[%s9158_s1 + $0x450] sm:$0xff] }
  0x9e   :  { %709 = vmatprep.mubr.f32.mxu0 %v6168_v3  ;;  %v7181_v7 = vpack.c.bf16 %v4538_v51, %v4536_v48 }
  0xa0   :  { %1355 = vmatmul.mubr.f32.gmra.mrb[62].mxu1 %v86_v0 }
  0xa1   :  { %710 = vmatmul.mubr.f32.gmra.mrb[30].mxu0 %v86_v0  ;;  %1425 = vmatprep.mubr.f32.mxu1 %v6168_v3  ;;  %v7176_v0 = vld [vmem:[%s9159_s0 + $0x91] sm:$0xff] }
  0xa2   :  { %845 = vmatprep.mubr.f32.mxu0 %v6168_v3 }
  0xa4   :  { %1426 = vmatmul.mubr.f32.vlgmr.msra.gmra.mrb[32].mxu1 %v6537_v56  ;;  %v4539_v56 = vld [vmem:[%s9158_s1 + $0x458] sm:$0xff] }
  0xa5   :  { %846 = vmatmul.mubr.f32.vlgmr.msra.gmra.mrb[0].mxu0 %v7122_v19  ;;  %5347 = vmatpush1.bf16.msra.mxu1 %v6551_v61  ;;  %v7152_v61 = vpack.c.bf16 %v4534_v36, %v4532_v34  ;;  %v7156_v50 = vpack.c.bf16 %v4539_v56, %v4537_v42  ;;  %v4544_v42 = vld [vmem:[%s9158_s1 + $0x480] sm:$0xff] }
  0xa6   :  { %851 = vmatprep.mubr.f32.mxu0 %v6168_v3  ;;  %1431 = vmatprep.mubr.f32.mxu1 %v6168_v3  ;;  %v7234_v56 = vld [vmem:[%s9159_s0 + $0xa1] sm:$0xff] }
  0xa7   :  { %5349 = vmatprep.subr.bf16.mxu1 %v6554_v62  ;;  %5251 = vmatpush1.bf16.msra.mxu0 %v7124_v25  ;;  %v4541_v62 = vld [vmem:[%s9158_s1 + $0x468] sm:$0xff] }
  0xa8   :  { %1432 = vmatmul.mubr.f32.gmra.mrb[34].mxu1 %v6566_v4  ;;  %5253 = vmatprep.subr.bf16.mxu0 %v7127_v22  ;;  %v4543_v4 = vld [vmem:[%s9158_s1 + $0x478] sm:$0xff] }
  0xa9   :  { %852 = vmatmul.mubr.f32.gmra.mrb[2].mxu0 %v7148_v49  ;;  %1437 = vmatprep.mubr.f32.mxu1 %v6168_v3  ;;  %v7185_v9 = vpack.c.bf16 %v4543_v4, %v4541_v62  ;;  %v4548_v62 = vld [vmem:[%s9158_s1 + $0x4a0] sm:$0xff]  ;;  %v7263_v4 = vld [vmem:[%s9159_s0 + $0xa9] sm:$0xff] }
  0xaa   :  { %857 = vmatprep.mubr.f32.mxu0 %v6168_v3  ;;  %5351 = vmatpush1.bf16.msra.mxu1 %v6581_v11  ;;  %v4542_v11 = vld [vmem:[%s9158_s1 + $0x470] sm:$0xff] }
  0xab   :  { %5353 = vmatprep.subr.bf16.mxu1 %v6585_v12  ;;  %5255 = vmatpush1.bf16.msra.mxu0 %v7152_v61  ;;  %v4545_v12 = vld [vmem:[%s9158_s1 + $0x488] sm:$0xff]  ;;  %v7210_v34 = vpack.c.bf16 %v4542_v11, %v4540_v14 }
  0xac   :  { %1438 = vmatmul.mubr.f32.gmra.mrb[36].mxu1 %v6597_v17  ;;  %5257 = vmatprep.subr.bf16.mxu0 %v7156_v50  ;;  %v4547_v17 = vld [vmem:[%s9158_s1 + $0x498] sm:$0xff] }
  0xad   :  { %858 = vmatmul.mubr.f32.gmra.mrb[4].mxu0 %v7176_v0  ;;  %1443 = vmatprep.mubr.f32.mxu1 %v6168_v3  ;;  %v7214_v36 = vpack.c.bf16 %v4547_v17, %v4545_v12  ;;  %v4552_v12 = vld [vmem:[%s9158_s1 + $0x4c0] sm:$0xff]  ;;  %v7292_v17 = vld [vmem:[%s9159_s0 + $0xb1] sm:$0xff] }
  0xae   :  { %863 = vmatprep.mubr.f32.mxu0 %v6168_v3  ;;  %5355 = vmatpush1.bf16.msra.mxu1 %v6612_v28  ;;  %v4546_v28 = vld [vmem:[%s9158_s1 + $0x490] sm:$0xff] }
  0xaf   :  { %5357 = vmatprep.subr.bf16.mxu1 %v6616_v29  ;;  %5259 = vmatpush1.bf16.msra.mxu0 %v7181_v7  ;;  %v4549_v29 = vld [vmem:[%s9158_s1 + $0x4a8] sm:$0xff]  ;;  %v7239_v48 = vpack.c.bf16 %v4546_v28, %v4544_v42 }
  0xb0   :  { %1444 = vmatmul.mubr.f32.gmra.mrb[38].mxu1 %v6628_v27  ;;  %5261 = vmatprep.subr.bf16.mxu0 %v7185_v9  ;;  %v4551_v27 = vld [vmem:[%s9158_s1 + $0x4b8] sm:$0xff] }
  0xb1   :  { %864 = vmatmul.mubr.f32.gmra.mrb[6].mxu0 %v7205_v21  ;;  %1449 = vmatprep.mubr.f32.mxu1 %v6168_v3  ;;  %v7243_v51 = vpack.c.bf16 %v4551_v27, %v4549_v29  ;;  %v4556_v29 = vld [vmem:[%s9158_s1 + $0x4e0] sm:$0xff] }
  0xb2   :  { %869 = vmatprep.mubr.f32.mxu0 %v6168_v3  ;;  %5359 = vmatpush1.bf16.msra.mxu1 %v6643_v41  ;;  %v4550_v41 = vld [vmem:[%s9158_s1 + $0x4b0] sm:$0xff] }
  0xb3   :  { %5361 = vmatprep.subr.bf16.mxu1 %v6647_v43  ;;  %5263 = vmatpush1.bf16.msra.mxu0 %v7210_v34  ;;  %v4553_v43 = vld [vmem:[%s9158_s1 + $0x4c8] sm:$0xff]  ;;  %v7268_v14 = vpack.c.bf16 %v4550_v41, %v4548_v62 }
  0xb4   :  { %1450 = vmatmul.mubr.f32.gmra.mrb[40].mxu1 %v6659_v40  ;;  %5265 = vmatprep.subr.bf16.mxu0 %v7214_v36  ;;  %v4555_v40 = vld [vmem:[%s9158_s1 + $0x4d8] sm:$0xff] }
  0xb5   :  { %870 = vmatmul.mubr.f32.gmra.mrb[8].mxu0 %v7234_v56  ;;  %1455 = vmatprep.mubr.f32.mxu1 %v6168_v3  ;;  %v7272_v11 = vpack.c.bf16 %v4555_v40, %v4553_v43  ;;  %v7570_v43 = vld [vmem:[%s9159_s0 + $0x6a] sm:$0xff] }
  0xb6   :  { %875 = vmatprep.mubr.f32.mxu0 %v6168_v3  ;;  %5363 = vmatpush1.bf16.msra.mxu1 %v6674_v55  ;;  %v4554_v55 = vld [vmem:[%s9158_s1 + $0x4d0] sm:$0xff] }
  0xb7   :  { %5365 = vmatprep.subr.bf16.mxu1 %v6678_v58  ;;  %5267 = vmatpush1.bf16.msra.mxu0 %v7239_v48  ;;  %v4557_v58 = vld [vmem:[%s9158_s1 + $0x4e8] sm:$0xff]  ;;  %v7297_v42 = vpack.c.bf16 %v4554_v55, %v4552_v12  ;;  %v7583_v12 = vld [vmem:[%s9159_s0 + $0x72] sm:$0xff] }
  0xb8   :  { %1456 = vmatmul.mubr.f32.gmra.mrb[42].mxu1 %v6690_v53  ;;  %5269 = vmatprep.subr.bf16.mxu0 %v7243_v51  ;;  %v4559_v53 = vld [vmem:[%s9158_s1 + $0x4f8] sm:$0xff] }
  0xb9   :  { %876 = vmatmul.mubr.f32.gmra.mrb[10].mxu0 %v7263_v4  ;;  %1461 = vmatprep.mubr.f32.mxu1 %v6168_v3  ;;  %v7301_v28 = vpack.c.bf16 %v4559_v53, %v4557_v58  ;;  %v118_v53 = vld [vmem:[%s9159_s0 + $0x7a] sm:$0x3f] }
  0xba   :  { %881 = vmatprep.mubr.f32.mxu0 %v6168_v3  ;;  %5367 = vmatpush1.bf16.msra.mxu1 %v6705_v6  ;;  %v4558_v6 = vld [vmem:[%s9158_s1 + $0x4f0] sm:$0xff] }
  0xbb   :  { %5369 = vmatprep.subr.bf16.mxu1 %v6709_v10  ;;  %5271 = vmatpush1.bf16.msra.mxu0 %v7268_v14  ;;  %v7315_v10 = vld [vmem:[%s9159_s0 + $0xb9] sm:$0xff] }
  0xbc   :  { %1462 = vmatmul.mubr.f32.gmra.mrb[44].mxu1 %v6721_v1  ;;  %5273 = vmatprep.subr.bf16.mxu0 %v7272_v11  ;;  %v7320_v1 = vpack.c.bf16 %v4558_v6, %v4556_v29 }
  0xbd   :  { %882 = vmatmul.mubr.f32.gmra.mrb[12].mxu0 %v7292_v17  ;;  %1467 = vmatprep.mubr.f32.mxu1 %v6168_v3 }
  0xbe   :  { %887 = vmatprep.mubr.f32.mxu0 %v6168_v3  ;;  %5371 = vmatpush1.bf16.msra.mxu1 %v6736_v23  ;;  %v7330_v23 = vld [vmem:[%s9159_s0 + $0xc1] sm:$0xff] }
  0xbf   :  { %5373 = vmatprep.subr.bf16.mxu1 %v6740_v24  ;;  %5275 = vmatpush1.bf16.msra.mxu0 %v7297_v42  ;;  %v7342_v24 = vld [vmem:[%s9159_s0 + $0xc9] sm:$0xff] }
  0xc0   :  { %1468 = vmatmul.mubr.f32.gmra.mrb[46].mxu1 %v6752_v20  ;;  %5277 = vmatprep.subr.bf16.mxu0 %v7301_v28  ;;  %v7351_v20 = vld [vmem:[%s9159_s0 + $0xd1] sm:$0xff] }
  0xc1   :  { %888 = vmatmul.mubr.f32.gmra.mrb[14].mxu0 %v7315_v10  ;;  %1473 = vmatprep.mubr.f32.mxu1 %v6168_v3 }
  0xc2   :  { %893 = vmatprep.mubr.f32.mxu0 %v6168_v3  ;;  %5375 = vmatpush1.bf16.msra.mxu1 %v6767_v38  ;;  %v7360_v38 = vld [vmem:[%s9159_s0 + $0xd9] sm:$0xff] }
  0xc3   :  { %5279 = vmatpush1.bf16.msra.mxu0 %v7320_v1  ;;  %5377 = vmatprep.subr.bf16.mxu1 %v6771_v45  ;;  %v7369_v45 = vld [vmem:[%s9159_s0 + $0xe1] sm:$0xff] }
  0xc4   :  { %1474 = vmatmul.mubr.f32.gmra.mrb[48].mxu1 %v6777_v35  ;;  %v7378_v35 = vld [vmem:[%s9159_s0 + $0xe9] sm:$0xff] }
  0xc5   :  { %894 = vmatmul.mubr.f32.gmra.mrb[16].mxu0 %v7330_v23  ;;  %1479 = vmatprep.mubr.f32.mxu1 %v6168_v3 }
  0xc6   :  { %899 = vmatprep.mubr.f32.mxu0 %v6168_v3 }
  0xc8   :  { %1480 = vmatmul.mubr.f32.gmra.mrb[50].mxu1 %v6792_v37  ;;  %v7387_v37 = vld [vmem:[%s9159_s0 + $0xf1] sm:$0xff] }
  0xc9   :  { %900 = vmatmul.mubr.f32.gmra.mrb[18].mxu0 %v7342_v24  ;;  %1485 = vmatprep.mubr.f32.mxu1 %v6168_v3 }
  0xca   :  { %905 = vmatprep.mubr.f32.mxu0 %v6168_v3 }
  0xcc   :  { %1486 = vmatmul.mubr.f32.gmra.mrb[52].mxu1 %v6803_v8  ;;  %v7396_v8 = vld [vmem:[%s9159_s0 + $0xf9] sm:$0x3f] }
  0xcd   :  { %906 = vmatmul.mubr.f32.gmra.mrb[20].mxu0 %v7351_v20  ;;  %1491 = vmatprep.mubr.f32.mxu1 %v6168_v3 }
  0xce   :  { %911 = vmatprep.mubr.f32.mxu0 %v6168_v3 }
  0xd0   :  { %1492 = vmatmul.mubr.f32.gmra.mrb[54].mxu1 %v6814_v47  ;;  %v7405_v47 = vld [vmem:[%s9159_s0 + $0x2] sm:$0xff] }
  0xd1   :  { %912 = vmatmul.mubr.f32.gmra.mrb[22].mxu0 %v7360_v38  ;;  %1497 = vmatprep.mubr.f32.mxu1 %v6168_v3 }
  0xd2   :  { %917 = vmatprep.mubr.f32.mxu0 %v6168_v3 }
  0xd4   :  { %1498 = vmatmul.mubr.f32.gmra.mrb[56].mxu1 %v6825_v59  ;;  %v7415_v59 = vld [vmem:[%s9159_s0 + $0xa] sm:$0xff] }
  0xd5   :  { %918 = vmatmul.mubr.f32.gmra.mrb[24].mxu0 %v7369_v45  ;;  %1503 = vmatprep.mubr.f32.mxu1 %v6168_v3 }
  0xd6   :  { %923 = vmatprep.mubr.f32.mxu0 %v6168_v3 }
  0xd8   :  { %1504 = vmatmul.mubr.f32.gmra.mrb[58].mxu1 %v6836_v60  ;;  %v7425_v60 = vld [vmem:[%s9159_s0 + $0x12] sm:$0xff] }
  0xd9   :  { %924 = vmatmul.mubr.f32.gmra.mrb[26].mxu0 %v7378_v35  ;;  %1509 = vmatprep.mubr.f32.mxu1 %v6168_v3 }
  0xda   :  { %929 = vmatprep.mubr.f32.mxu0 %v6168_v3 }
  0xdc   :  { %1510 = vmatmul.mubr.f32.gmra.mrb[60].mxu1 %v6847_v5  ;;  %v7436_v5 = vld [vmem:[%s9159_s0 + $0x1a] sm:$0xff] }
  0xdd   :  { %930 = vmatmul.mubr.f32.gmra.mrb[28].mxu0 %v7387_v37  ;;  %1515 = vmatprep.mubr.f32.mxu1 %v6168_v3 }
  0xde   :  { %935 = vmatprep.mubr.f32.mxu0 %v6168_v3 }
  0xe0   :  { %1516 = vmatmul.mubr.f32.gmra.mrb[62].mxu1 %v6858_v63  ;;  %v7447_v63 = vld [vmem:[%s9159_s0 + $0x22] sm:$0xff] }
  0xe1   :  { %936 = vmatmul.mubr.f32.gmra.mrb[30].mxu0 %v7396_v8  ;;  %1586 = vmatprep.mubr.f32.mxu1 %v6168_v3 }
  0xe2   :  { %1071 = vmatprep.mubr.f32.mxu0 %v6168_v3 }
  0xe4   :  { %1587 = vmatmul.mubr.f32.vlgmr.msra.gmra.mrb[32].mxu1 %v7122_v19 }
  0xe5   :  { %1072 = vmatmul.mubr.f32.vlgmr.msra.gmra.mrb[0].mxu0 %v7405_v47  ;;  %5379 = vmatpush1.bf16.msra.mxu1 %v6882_v32  ;;  %v7458_v32 = vld [vmem:[%s9159_s0 + $0x2a] sm:$0xff] }
  0xe6   :  { %1077 = vmatprep.mubr.f32.mxu0 %v6168_v3  ;;  %1592 = vmatprep.mubr.f32.mxu1 %v6168_v3 }
  0xe7   :  { %5381 = vmatprep.subr.bf16.mxu1 %v6884_v33 }
  0xe8   :  { %1593 = vmatmul.mubr.f32.gmra.mrb[34].mxu1 %v7148_v49 }
  0xe9   :  { %1078 = vmatmul.mubr.f32.gmra.mrb[2].mxu0 %v7415_v59  ;;  %1598 = vmatprep.mubr.f32.mxu1 %v6168_v3 }
  0xea   :  { %1083 = vmatprep.mubr.f32.mxu0 %v6168_v3  ;;  %5383 = vmatpush1.bf16.msra.mxu1 %v6906_v13 }
  0xeb   :  { %5385 = vmatprep.subr.bf16.mxu1 %v6909_v2  ;;  %v7473_v2 = vld [vmem:[%s9159_s0 + $0x32] sm:$0xff] }
  0xec   :  { %1599 = vmatmul.mubr.f32.gmra.mrb[36].mxu1 %v7176_v0  ;;  %v7544_v0 = vld [vmem:[%s9159_s0 + $0x5a] sm:$0xff] }
  0xed   :  { %1084 = vmatmul.mubr.f32.gmra.mrb[4].mxu0 %v7425_v60  ;;  %1604 = vmatprep.mubr.f32.mxu1 %v6168_v3 }
  0xee   :  { %1089 = vmatprep.mubr.f32.mxu0 %v6168_v3  ;;  %5387 = vmatpush1.bf16.msra.mxu1 %v6931_v30 }
  0xef   :  { %5389 = vmatprep.subr.bf16.mxu1 %v6934_v16 }
  0xf0   :  { %1605 = vmatmul.mubr.f32.gmra.mrb[38].mxu1 %v7205_v21 }
  0xf1   :  { %1090 = vmatmul.mubr.f32.gmra.mrb[6].mxu0 %v7436_v5  ;;  %1610 = vmatprep.mubr.f32.mxu1 %v6168_v3 }
  0xf2   :  { %1095 = vmatprep.mubr.f32.mxu0 %v6168_v3  ;;  %5391 = vmatpush1.bf16.msra.mxu1 %v6956_v46  ;;  %v7488_v46 = vld [vmem:[%s9159_s0 + $0x3a] sm:$0xff] }
  0xf3   :  { %5393 = vmatprep.subr.bf16.mxu1 %v6959_v54 }
  0xf4   :  { %1611 = vmatmul.mubr.f32.gmra.mrb[40].mxu1 %v7234_v56  ;;  %v7557_v56 = vld [vmem:[%s9159_s0 + $0x62] sm:$0xff] }
  0xf5   :  { %1096 = vmatmul.mubr.f32.gmra.mrb[8].mxu0 %v7447_v63  ;;  %1616 = vmatprep.mubr.f32.mxu1 %v6168_v3 }
  0xf6   :  { %1101 = vmatprep.mubr.f32.mxu0 %v6168_v3  ;;  %5395 = vmatpush1.bf16.msra.mxu1 %v6981_v18 }
  0xf7   :  { %v7461_v33 = vpop.f32.mrb[0].mxu1  ;;  %5397 = vmatprep.subr.bf16.mxu1 %v6984_v15  ;;  %v7503_v15 = vld [vmem:[%s9159_s0 + $0x42] sm:$0xff] }
  0xf8   :  { %v7464_v13 = vpop.f32.mrb[1].mxu1  ;;  %1617 = vmatmul.mubr.f32.gmra.mrb[42].mxu1 %v7263_v4 }
  0xf9   :  { %1102 = vmatmul.mubr.f32.gmra.mrb[10].mxu0 %v7458_v32  ;;  %1622 = vmatprep.mubr.f32.mxu1 %v6168_v3 }
  0xfa   :  { %1107 = vmatprep.mubr.f32.mxu0 %v6168_v3  ;;  %5399 = vmatpush1.bf16.msra.mxu1 %v7006_v26 }
  0xfb   :  { %v7476_v30 = vpop.f32.mrb[2].mxu1  ;;  %5401 = vmatprep.subr.bf16.mxu1 %v7009_v31 }
  0xfc   :  { %v7479_v16 = vpop.f32.mrb[3].mxu1  ;;  %1623 = vmatmul.mubr.f32.gmra.mrb[44].mxu1 %v7292_v17 }
  0xfd   :  { %1108 = vmatmul.mubr.f32.gmra.mrb[12].mxu0 %v7473_v2  ;;  %1628 = vmatprep.mubr.f32.mxu1 %v6168_v3 }
  0xfe   :  { %1113 = vmatprep.mubr.f32.mxu0 %v6168_v3  ;;  %5403 = vmatpush1.bf16.msra.mxu1 %v7031_v39  ;;  %v7518_v39 = vld [vmem:[%s9159_s0 + $0x4a] sm:$0xff] }
  0xff   :  { %v7491_v54 = vpop.f32.mrb[4].mxu1  ;;  %5405 = vmatprep.subr.bf16.mxu1 %v7034_v44 }
 0x100   :  { %v7494_v18 = vpop.f32.mrb[5].mxu1  ;;  %1629 = vmatmul.mubr.f32.gmra.mrb[46].mxu1 %v7315_v10 }
 0x101   :  { %1114 = vmatmul.mubr.f32.gmra.mrb[14].mxu0 %v7488_v46  ;;  %1634 = vmatprep.mubr.f32.mxu1 %v6168_v3 }
 0x102   :  { %1119 = vmatprep.mubr.f32.mxu0 %v6168_v3  ;;  %5407 = vmatpush1.bf16.msra.mxu1 %v7056_v52 }
 0x103   :  { %v7506_v26 = vpop.f32.mrb[6].mxu1  ;;  %5409 = vmatprep.subr.bf16.mxu1 %v7059_v57  ;;  %v7531_v57 = vld [vmem:[%s9159_s0 + $0x52] sm:$0xff] }
 0x104   :  { %v7509_v31 = vpop.f32.mrb[7].mxu1  ;;  %1635 = vmatmul.mubr.f32.gmra.mrb[48].mxu1 %v7330_v23 }
 0x105   :  { %1120 = vmatmul.mubr.f32.gmra.mrb[16].mxu0 %v7503_v15  ;;  %1640 = vmatprep.mubr.f32.mxu1 %v6168_v3 }
 0x106   :  { %1125 = vmatprep.mubr.f32.mxu0 %v6168_v3 }
 0x107   :  { %v7520_v44 = vpop.f32.mrb[8].mxu1 }
 0x108   :  { %v7522_v52 = vpop.f32.mrb[9].mxu1  ;;  %1641 = vmatmul.mubr.f32.gmra.mrb[50].mxu1 %v7342_v24 }
 0x109   :  { %1126 = vmatmul.mubr.f32.gmra.mrb[18].mxu0 %v7518_v39  ;;  %1646 = vmatprep.mubr.f32.mxu1 %v6168_v3 }
 0x10a   :  { %1131 = vmatprep.mubr.f32.mxu0 %v6168_v3 }
 0x10b   :  { %v7533_v19 = vpop.f32.mrb[10].mxu1 }
 0x10c   :  { %v7535_v49 = vpop.f32.mrb[11].mxu1  ;;  %1647 = vmatmul.mubr.f32.gmra.mrb[52].mxu1 %v7351_v20 }
 0x10d   :  { %1132 = vmatmul.mubr.f32.gmra.mrb[20].mxu0 %v7531_v57  ;;  %1652 = vmatprep.mubr.f32.mxu1 %v6168_v3 }
 0x10e   :  { %1137 = vmatprep.mubr.f32.mxu0 %v6168_v3 }
 0x10f   :  { %v7546_v21 = vpop.f32.mrb[12].mxu1 }
 0x110   :  { %v7548_v27 = vpop.f32.mrb[13].mxu1  ;;  %1653 = vmatmul.mubr.f32.gmra.mrb[54].mxu1 %v7360_v38 }
 0x111   :  { %1138 = vmatmul.mubr.f32.gmra.mrb[22].mxu0 %v7544_v0  ;;  %1658 = vmatprep.mubr.f32.mxu1 %v6168_v3 }
 0x112   :  { %1143 = vmatprep.mubr.f32.mxu0 %v6168_v3 }
 0x113   :  { %v7559_v62 = vpop.f32.mrb[14].mxu1 }
 0x114   :  { %v7561_v41 = vpop.f32.mrb[15].mxu1  ;;  %1659 = vmatmul.mubr.f32.gmra.mrb[56].mxu1 %v7369_v45  ;;  %v4562_v45 = vld [vmem:[%s9160_s3 + $0x110] sm:$0xff] }
 0x115   :  { %1144 = vmatmul.mubr.f32.gmra.mrb[24].mxu0 %v7557_v56  ;;  %1664 = vmatprep.mubr.f32.mxu1 %v6168_v3 }
 0x116   :  { %1149 = vmatprep.mubr.f32.mxu0 %v6168_v3 }
 0x117   :  { %v7572_v40 = vpop.f32.mrb[16].mxu1 }
 0x118   :  { %v7574_v4 = vpop.f32.mrb[17].mxu1  ;;  %1665 = vmatmul.mubr.f32.gmra.mrb[58].mxu1 %v7378_v35  ;;  %v4565_v35 = vld [vmem:[%s9160_s3 + $0x128] sm:$0xff] }
 0x119   :  { %1150 = vmatmul.mubr.f32.gmra.mrb[26].mxu0 %v7570_v43  ;;  %1670 = vmatprep.mubr.f32.mxu1 %v6168_v3 }
 0x11a   :  { %1155 = vmatprep.mubr.f32.mxu0 %v6168_v3 }
 0x11b   :  { %v7585_v55 = vpop.f32.mrb[18].mxu1 }
 0x11c   :  { %v7587_v58 = vpop.f32.mrb[19].mxu1  ;;  %1671 = vmatmul.mubr.f32.gmra.mrb[60].mxu1 %v7387_v37  ;;  %v4567_v37 = vld [vmem:[%s9160_s3 + $0x138] sm:$0xff] }
 0x11d   :  { %1156 = vmatmul.mubr.f32.gmra.mrb[28].mxu0 %v7583_v12  ;;  %1676 = vmatprep.mubr.f32.mxu1 %v6168_v3 }
 0x11e   :  { %1161 = vmatprep.mubr.f32.mxu0 %v6168_v3 }
 0x11f   :  { %v7596_v17 = vpop.f32.mrb[20].mxu1 }
 0x120   :  { %v7598_v29 = vpop.f32.mrb[21].mxu1  ;;  %1677 = vmatmul.mubr.f32.gmra.mrb[62].mxu1 %v7396_v8 }
 0x121   :  { %1162 = vmatmul.mubr.f32.gmra.mrb[30].mxu0 %v118_v53  ;;  %1779 = vmatprep.mubr.f32.mxu1 %v6168_v3 }
 0x122   :  { %2407 = vmatprep.mubr.f32.mxu0 %v6168_v3 }
 0x123   :  { %v7603_v6 = vpop.f32.mrb[22].mxu1 }
 0x124   :  { %v7605_v10 = vpop.f32.mrb[23].mxu1  ;;  %1780 = vmatmul.mubr.f32.vlgmr.msra.gmra.mrb[32].mxu1 %v7405_v47  ;;  %v5444_v47 = vpack.c.bf16 %v4567_v37, %v4565_v35  ;;  %v4580_v35 = vld [vmem:[%s9160_s3 + $0x1a0] sm:$0xff]  ;;  %v4582_v37 = vld [vmem:[%s9160_s3 + $0x1b0] sm:$0xff] }
 0x125   :  { %5411 = vmatpush1.bf16.msra.mxu1 %v7124_v25  ;;  %1785 = vmatprep.mubr.f32.mxu1 %v6168_v3 }
 0x126   :  { %5413 = vmatprep.subr.bf16.mxu1 %v7127_v22 }
 0x127   :  { %v7611_v23 = vpop.f32.mrb[24].mxu1 }
 0x128   :  { %v7613_v24 = vpop.f32.mrb[25].mxu1  ;;  %1786 = vmatmul.mubr.f32.gmra.mrb[34].mxu1 %v7415_v59  ;;  %v4564_v59 = vld [vmem:[%s9160_s3 + $0x120] sm:$0xff] }
 0x129   :  { %1791 = vmatprep.mubr.f32.mxu1 %v6168_v3  ;;  %5415 = vmatpush1.bf16.msra.mxu1 %v7152_v61 }
 0x12a   :  { %5417 = vmatprep.subr.bf16.mxu1 %v7156_v50 }
 0x12b   :  { %v7619_v20 = vpop.f32.mrb[26].mxu1 }
 0x12c   :  { %v7621_v38 = vpop.f32.mrb[27].mxu1  ;;  %1792 = vmatmul.mubr.f32.gmra.mrb[36].mxu1 %v7425_v60  ;;  %v4566_v60 = vld [vmem:[%s9160_s3 + $0x130] sm:$0xff] }
 0x12d   :  { %1797 = vmatprep.mubr.f32.mxu1 %v6168_v3  ;;  %5419 = vmatpush1.bf16.msra.mxu1 %v7181_v7  ;;  %v4416_v7 = vld [vmem:[%s9159_s0 + $0x82] sm:$0xff] }
 0x12e   :  { %5421 = vmatprep.subr.bf16.mxu1 %v7185_v9  ;;  %v4417_v9 = vld [vmem:[%s9159_s0 + $0x8a] sm:$0xff] }
 0x12f   :  { %v7627_v25 = vpop.f32.mrb[28].mxu1 }
 0x130   :  { %v7629_v22 = vpop.f32.mrb[29].mxu1  ;;  %1798 = vmatmul.mubr.f32.gmra.mrb[38].mxu1 %v7436_v5  ;;  %v4569_v5 = vld [vmem:[%s9160_s3 + $0x148] sm:$0xff] }
 0x131   :  { %1803 = vmatprep.mubr.f32.mxu1 %v6168_v3  ;;  %5423 = vmatpush1.bf16.msra.mxu1 %v7210_v34  ;;  %v4418_v34 = vld [vmem:[%s9159_s0 + $0x92] sm:$0xff] }
 0x132   :  { %5425 = vmatprep.subr.bf16.mxu1 %v7214_v36  ;;  %v4419_v36 = vld [vmem:[%s9159_s0 + $0x9a] sm:$0xff] }
 0x133   :  { %v7635_v61 = vpop.f32.mrb[30].mxu1 }
 0x134   :  { %v7637_v50 = vpop.f32.mrb[31].mxu1  ;;  %1804 = vmatmul.mubr.f32.gmra.mrb[40].mxu1 %v7447_v63  ;;  %v4571_v63 = vld [vmem:[%s9160_s3 + $0x158] sm:$0xff] }
 0x135   :  { %1809 = vmatprep.mubr.f32.mxu1 %v6168_v3  ;;  %5427 = vmatpush1.bf16.msra.mxu1 %v7239_v48  ;;  %v4420_v48 = vld [vmem:[%s9159_s0 + $0xa2] sm:$0xff] }
 0x136   :  { %5429 = vmatprep.subr.bf16.mxu1 %v7243_v51  ;;  %v4421_v51 = vld [vmem:[%s9159_s0 + $0xaa] sm:$0xff] }
 0x138   :  { %1810 = vmatmul.mubr.f32.gmra.mrb[42].mxu1 %v7458_v32  ;;  %v5446_v32 = vpack.c.bf16 %v4566_v60, %v4564_v59  ;;  %v4427_v59 = vld [vmem:[%s9159_s0 + $0xda] sm:$0xff]  ;;  %v4428_v60 = vld [vmem:[%s9159_s0 + $0xe2] sm:$0xff] }
 0x139   :  { %1815 = vmatprep.mubr.f32.mxu1 %v6168_v3  ;;  %5431 = vmatpush1.bf16.msra.mxu1 %v7268_v14  ;;  %v4422_v14 = vld [vmem:[%s9159_s0 + $0xb2] sm:$0xff] }
 0x13a   :  { %5433 = vmatprep.subr.bf16.mxu1 %v7272_v11  ;;  %v4561_v11 = vld [vmem:[%s9160_s3 + $0x108] sm:$0xff] }
 0x13c   :  { %1816 = vmatmul.mubr.f32.gmra.mrb[44].mxu1 %v7473_v2  ;;  %v5448_v2 = vpack.c.bf16 %v4571_v63, %v4569_v5  ;;  %v4429_v5 = vld [vmem:[%s9159_s0 + $0xea] sm:$0xff]  ;;  %v4430_v63 = vld [vmem:[%s9159_s0 + $0xf2] sm:$0xff] }
 0x13d   :  { %1821 = vmatprep.mubr.f32.mxu1 %v6168_v3  ;;  %5435 = vmatpush1.bf16.msra.mxu1 %v7297_v42  ;;  %v4563_v42 = vld [vmem:[%s9160_s3 + $0x118] sm:$0xff] }
 0x13e   :  { %5437 = vmatprep.subr.bf16.mxu1 %v7301_v28  ;;  %v4560_v28 = vld [vmem:[%s9160_s3 + $0x100] sm:$0xff] }
 0x13f   :  { %v5442_v8 = vpack.c.bf16 %v4562_v45, %v4560_v28  ;;  %v4583_v28 = vld [vmem:[%s9160_s3 + $0x1b8] sm:$0xff] }
 0x140   :  { %1822 = vmatmul.mubr.f32.gmra.mrb[46].mxu1 %v7488_v46  ;;  %v4568_v46 = vld [vmem:[%s9160_s3 + $0x140] sm:$0xff] }
 0x141   :  { %1827 = vmatprep.mubr.f32.mxu1 %v6168_v3  ;;  %5439 = vmatpush1.bf16.msra.mxu1 %v7320_v1  ;;  %v5440_v1 = vpack.c.bf16 %v4563_v42, %v4561_v11  ;;  %v4425_v11 = vld [vmem:[%s9159_s0 + $0xca] sm:$0xff] }
 0x142   :  { %v4581_v42 = vld [vmem:[%s9160_s3 + $0x1a8] sm:$0xff] }
 0x143   :  { %5441 = vmatprep.subr.bf16.mxu0 %v5440_v1  ;;  %v5460_v45 = vpack.c.bf16 %v4583_v28, %v4581_v42 }
 0x144   :  { %1828 = vmatmul.mubr.f32.gmra.mrb[48].mxu1 %v7503_v15  ;;  %5443 = vmatpush1.bf16.msra.mxu0 %v5442_v8  ;;  %v4570_v15 = vld [vmem:[%s9160_s3 + $0x150] sm:$0xff] }
 0x145   :  { %1833 = vmatprep.mubr.f32.mxu1 %v6168_v3  ;;  %5445 = vmatprep.subr.bf16.mxu0 %v5444_v47  ;;  %v4426_v8 = vld [vmem:[%s9159_s0 + $0xd2] sm:$0xff]  ;;  %v5462_v47 = vpack.c.bf16 %v4582_v37, %v4580_v35 }
 0x148   :  { %1834 = vmatmul.mubr.f32.gmra.mrb[50].mxu1 %v7518_v39  ;;  %v4423_v39 = vld [vmem:[%s9159_s0 + $0xba] sm:$0xff]  ;;  %5447 = vmatpush1.bf16.msra.mxu0 %v5446_v32 }
 0x149   :  { %1839 = vmatprep.mubr.f32.mxu1 %v6168_v3  ;;  %5449 = vmatprep.subr.bf16.mxu0 %v5448_v2  ;;  %v4431_v32 = vld [vmem:[%s9159_s0 + $0xfa] sm:$0x3f] }
 0x14c   :  { %1840 = vmatmul.mubr.f32.gmra.mrb[52].mxu1 %v7531_v57  ;;  %v4573_v57 = vld [vmem:[%s9160_s3 + $0x168] sm:$0xff] }
 0x14d   :  { %1845 = vmatprep.mubr.f32.mxu1 %v6168_v3 }
 0x150   :  { %1846 = vmatmul.mubr.f32.gmra.mrb[54].mxu1 %v7544_v0  ;;  %v4575_v0 = vld [vmem:[%s9160_s3 + $0x178] sm:$0xff] }
 0x151   :  { %1851 = vmatprep.mubr.f32.mxu1 %v6168_v3 }
 0x154   :  { %1852 = vmatmul.mubr.f32.gmra.mrb[56].mxu1 %v7557_v56  ;;  %v5450_v56 = vpack.c.bf16 %v4570_v15, %v4568_v46 }
 0x155   :  { %1857 = vmatprep.mubr.f32.mxu1 %v6168_v3 }
 0x156   :  { %5451 = vmatpush1.bf16.msra.mxu0 %v5450_v56 }
 0x158   :  { %1858 = vmatmul.mubr.f32.gmra.mrb[58].mxu1 %v7570_v43  ;;  %v5452_v43 = vpack.c.bf16 %v4575_v0, %v4573_v57 }
 0x159   :  { %1863 = vmatprep.mubr.f32.mxu1 %v6168_v3 }
 0x15a   :  { %5453 = vmatprep.subr.bf16.mxu0 %v5452_v43 }
 0x15c   :  { %1864 = vmatmul.mubr.f32.gmra.mrb[60].mxu1 %v7583_v12  ;;  %v4572_v12 = vld [vmem:[%s9160_s3 + $0x160] sm:$0xff] }
 0x15d   :  { %1869 = vmatprep.mubr.f32.mxu1 %v6168_v3 }
 0x160   :  { %1870 = vmatmul.mubr.f32.gmra.mrb[62].mxu1 %v118_v53  ;;  %v4574_v53 = vld [vmem:[%s9160_s3 + $0x170] sm:$0xff] }
 0x161   :  { %1972 = vmatprep.mubr.f32.mxu1 %v6168_v3 }
 0x164   :  { %1973 = vmatmul.mubr.f32.vlgmr.msra.gmra.mrb[32].mxu1 %v4416_v7  ;;  %v4424_v7 = vld [vmem:[%s9159_s0 + $0xc2] sm:$0xff] }
 0x165   :  { %1978 = vmatprep.mubr.f32.mxu1 %v6168_v3 }
 0x168   :  { %1979 = vmatmul.mubr.f32.gmra.mrb[34].mxu1 %v4417_v9  ;;  %v4577_v9 = vld [vmem:[%s9160_s3 + $0x188] sm:$0xff] }
 0x169   :  { %1984 = vmatprep.mubr.f32.mxu1 %v6168_v3 }
 0x16c   :  { %1985 = vmatmul.mubr.f32.gmra.mrb[36].mxu1 %v4418_v34  ;;  %v4579_v34 = vld [vmem:[%s9160_s3 + $0x198] sm:$0xff] }
 0x16d   :  { %1990 = vmatprep.mubr.f32.mxu1 %v6168_v3 }
 0x170   :  { %1991 = vmatmul.mubr.f32.gmra.mrb[38].mxu1 %v4419_v36  ;;  %v5454_v36 = vpack.c.bf16 %v4574_v53, %v4572_v12  ;;  %v4585_v12 = vld [vmem:[%s9160_s3 + $0x1c8] sm:$0xff] }
 0x171   :  { %1996 = vmatprep.mubr.f32.mxu1 %v6168_v3 }
 0x172   :  { %5455 = vmatpush1.bf16.msra.mxu0 %v5454_v36 }
 0x174   :  { %1997 = vmatmul.mubr.f32.gmra.mrb[40].mxu1 %v4420_v48  ;;  %v5456_v48 = vpack.c.bf16 %v4579_v34, %v4577_v9 }
 0x175   :  { %2002 = vmatprep.mubr.f32.mxu1 %v6168_v3 }
 0x176   :  { %5457 = vmatprep.subr.bf16.mxu0 %v5456_v48  ;;  %v4589_v48 = vld [vmem:[%s9160_s3 + $0x1e8] sm:$0xff] }
 0x178   :  { %2003 = vmatmul.mubr.f32.gmra.mrb[42].mxu1 %v4421_v51  ;;  %v4576_v51 = vld [vmem:[%s9160_s3 + $0x180] sm:$0xff] }
 0x179   :  { %2008 = vmatprep.mubr.f32.mxu1 %v6168_v3 }
 0x17c   :  { %2009 = vmatmul.mubr.f32.gmra.mrb[44].mxu1 %v4422_v14  ;;  %v4578_v14 = vld [vmem:[%s9160_s3 + $0x190] sm:$0xff] }
 0x17d   :  { %2014 = vmatprep.mubr.f32.mxu1 %v6168_v3  ;;  %v5458_v1 = vpack.c.bf16 %v4578_v14, %v4576_v51  ;;  %v4591_v51 = vld [vmem:[%s9160_s3 + $0x1f8] sm:$0xff] }
 0x17e   :  { %v5468_v14 = vpack.c.bf16 %v4591_v51, %v4589_v48 }
 0x17f   :  { %5459 = vmatpush1.bf16.msra.mxu0 %v5458_v1 }
 0x180   :  { %2015 = vmatmul.mubr.f32.gmra.mrb[46].mxu1 %v4423_v39  ;;  %5461 = vmatprep.subr.bf16.mxu0 %v5460_v45 }
 0x181   :  { %2020 = vmatprep.mubr.f32.mxu1 %v6168_v3 }
 0x183   :  { %5463 = vmatpush1.bf16.msra.mxu0 %v5462_v47 }
 0x184   :  { %2021 = vmatmul.mubr.f32.gmra.mrb[48].mxu1 %v4424_v7 }
 0x185   :  { %2026 = vmatprep.mubr.f32.mxu1 %v6168_v3 }
 0x188   :  { %2027 = vmatmul.mubr.f32.gmra.mrb[50].mxu1 %v4425_v11  ;;  %v4590_v11 = vld [vmem:[%s9160_s3 + $0x1f0] sm:$0xff] }
 0x189   :  { %2032 = vmatprep.mubr.f32.mxu1 %v6168_v3 }
 0x18c   :  { %2033 = vmatmul.mubr.f32.gmra.mrb[52].mxu1 %v4426_v8 }
 0x18d   :  { %2038 = vmatprep.mubr.f32.mxu1 %v6168_v3 }
 0x190   :  { %2039 = vmatmul.mubr.f32.gmra.mrb[54].mxu1 %v4427_v59 }
 0x191   :  { %2044 = vmatprep.mubr.f32.mxu1 %v6168_v3 }
 0x194   :  { %2045 = vmatmul.mubr.f32.gmra.mrb[56].mxu1 %v4428_v60 }
 0x195   :  { %2050 = vmatprep.mubr.f32.mxu1 %v6168_v3 }
 0x198   :  { %2051 = vmatmul.mubr.f32.gmra.mrb[58].mxu1 %v4429_v5 }
 0x199   :  { %2056 = vmatprep.mubr.f32.mxu1 %v6168_v3 }
 0x19c   :  { %2057 = vmatmul.mubr.f32.gmra.mrb[60].mxu1 %v4430_v63 }
 0x19d   :  { %2062 = vmatprep.mubr.f32.mxu1 %v6168_v3 }
 0x1a0   :  { %2063 = vmatmul.mubr.f32.gmra.mrb[62].mxu1 %v4431_v32 }
 0x1a1   :  { %4907 = vmatprep.mubr.msk.f32.mxu1 %vm6170_vm4, %v6168_v3 }
 0x1b8   :  { %v1073_v2 = vpop.f32.mrb[0].mxu0 }
 0x1b9   :  { %v7805_v46 = vadd.f32 %v1073_v2, %v7461_v33  ;;  %v1075_v15 = vpop.f32.mrb[1].mxu0  ;;  %v4587_v33 = vld [vmem:[%s9160_s3 + $0x1d8] sm:$0xff] }
 0x1ba   :  { %v7808_v39 = vadd.f32 %v1075_v15, %v7464_v13  ;;  %v5464_v53 = vpack.c.bf16 %v4587_v33, %v4585_v12  ;;  %v4584_v13 = vld [vmem:[%s9160_s3 + $0x1c0] sm:$0xff] }
 0x1bc   :  { %v1079_v57 = vpop.f32.mrb[2].mxu0  ;;  %5465 = vmatprep.subr.bf16.mxu0 %v5464_v53 }
 0x1bd   :  { %v7811_v0 = vadd.f32 %v1079_v57, %v7476_v30  ;;  %v1081_v56 = vpop.f32.mrb[3].mxu0  ;;  %v4586_v30 = vld [vmem:[%s9160_s3 + $0x1d0] sm:$0xff] }
 0x1be   :  { %v7814_v43 = vadd.f32 %v1081_v56, %v7479_v16  ;;  %v5466_v16 = vpack.c.bf16 %v4586_v30, %v4584_v13 }
 0x1c0   :  { %v1085_v7 = vpop.f32.mrb[4].mxu0  ;;  %5467 = vmatpush1.bf16.msra.mxu0 %v5466_v16 }
 0x1c1   :  { %v7829_v9 = vadd.f32 %v1085_v7, %v7491_v54  ;;  %v1087_v34 = vpop.f32.mrb[5].mxu0  ;;  %v4588_v54 = vld [vmem:[%s9160_s3 + $0x1e0] sm:$0xff]  ;;  %5469 = vmatprep.subr.bf16.mxu0 %v5468_v14 }
 0x1c2   :  { %v7832_v36 = vadd.f32 %v1087_v34, %v7494_v18  ;;  %v5470_v42 = vpack.c.bf16 %v4590_v11, %v4588_v54 }
 0x1c4   :  { %v1091_v18 = vpop.f32.mrb[6].mxu0  ;;  %5471 = vmatpush1.bf16.msra.mxu0 %v5470_v42 }
 0x1c5   :  { %v7847_v28 = vadd.f32 %v1091_v18, %v7506_v26  ;;  %v1093_v1 = vpop.f32.mrb[7].mxu0 }
 0x1c6   :  { %v7850_v45 = vadd.f32 %v1093_v1, %v7509_v31  ;;  %v2212_v31 = vld [vmem:[%s9160_s3 + $0x8] sm:$0xff] }
 0x1c8   :  { %v1097_v35 = vpop.f32.mrb[8].mxu0 }
 0x1c9   :  { %v7853_v37 = vadd.f32 %v1097_v35, %v7520_v44  ;;  %v1099_v8 = vpop.f32.mrb[9].mxu0  ;;  %v2214_v44 = vld [vmem:[%s9160_s3 + $0x18] sm:$0xff] }
 0x1ca   :  { %v7856_v47 = vadd.f32 %v1099_v8, %v7522_v52  ;;  %v5472_v32 = vpack.c.bf16 %v2214_v44, %v2212_v31  ;;  %v2135_v8 = vlaneseq }
 0x1cc   :  { %v1103_v59 = vpop.f32.mrb[10].mxu0  ;;  %5473 = vmatprep.subr.bf16.mxu0 %v5472_v32 }
 0x1cd   :  { %v7859_v60 = vadd.f32 %v1103_v59, %v7533_v19  ;;  %v1105_v26 = vpop.f32.mrb[11].mxu0 }
 0x1ce   :  { %v7862_v5 = vadd.f32 %v1105_v26, %v7535_v49 }
 0x1d0   :  { %v1109_v63 = vpop.f32.mrb[12].mxu0 }
 0x1d1   :  { %v7871_v52 = vadd.f32 %v1109_v63, %v7546_v21  ;;  %v1111_v2 = vpop.f32.mrb[13].mxu0 }
 0x1d2   :  { %v7874_v19 = vadd.f32 %v1111_v2, %v7548_v27 }
 0x1d4   :  { %v1115_v49 = vpop.f32.mrb[14].mxu0 }
 0x1d5   :  { %v7877_v15 = vadd.f32 %v1115_v49, %v7559_v62  ;;  %v1117_v57 = vpop.f32.mrb[15].mxu0 }
 0x1d6   :  { %v7880_v56 = vadd.f32 %v1117_v57, %v7561_v41 }
 0x1d8   :  { %v1121_v12 = vpop.f32.mrb[16].mxu0 }
 0x1d9   :  { %v7883_v33 = vadd.f32 %v1121_v12, %v7572_v40  ;;  %v1123_v53 = vpop.f32.mrb[17].mxu0 }
 0x1da   :  { %v7886_v21 = vadd.f32 %v1123_v53, %v7574_v4 }
 0x1dc   :  { %v1127_v13 = vpop.f32.mrb[18].mxu0 }
 0x1dd   :  { %v7889_v27 = vadd.f32 %v1127_v13, %v7585_v55  ;;  %v1129_v30 = vpop.f32.mrb[19].mxu0 }
 0x1de   :  { %v7892_v62 = vadd.f32 %v1129_v30, %v7587_v58 }
 0x1e0   :  { %v1133_v7 = vpop.f32.mrb[20].mxu0 }
 0x1e1   :  { %v7895_v41 = vadd.f32 %v1133_v7, %v7596_v17  ;;  %v1135_v16 = vpop.f32.mrb[21].mxu0 }
 0x1e2   :  { %v7898_v40 = vadd.f32 %v1135_v16, %v7598_v29 }
 0x1e4   :  { %v1139_v34 = vpop.f32.mrb[22].mxu0 }
 0x1e5   :  { %v7901_v4 = vadd.f32 %v1139_v34, %v7603_v6  ;;  %v1141_v48 = vpop.f32.mrb[23].mxu0 }
 0x1e6   :  { %v7904_v55 = vadd.f32 %v1141_v48, %v7605_v10 }
 0x1e8   :  { %v1145_v51 = vpop.f32.mrb[24].mxu0 }
 0x1e9   :  { %v7907_v58 = vadd.f32 %v1145_v51, %v7611_v23  ;;  %v1147_v14 = vpop.f32.mrb[25].mxu0 }
 0x1ea   :  { %v7910_v17 = vadd.f32 %v1147_v14, %v7613_v24 }
 0x1ec   :  { %v1151_v54 = vpop.f32.mrb[26].mxu0 }
 0x1ed   :  { %v7913_v29 = vadd.f32 %v1151_v54, %v7619_v20  ;;  %v1153_v11 = vpop.f32.mrb[27].mxu0 }
 0x1ee   :  { %v7916_v6 = vadd.f32 %v1153_v11, %v7621_v38  ;;  %v7931_v38 = vshrl.u32 %v2135_v8, 7 }
 0x1f0   :  { %v1157_v18 = vpop.f32.mrb[28].mxu0  ;;  %v2137_v59 = vsub.s32 0, %v7931_v38 }
 0x1f1   :  { %v7919_v10 = vadd.f32 %v1157_v18, %v7627_v25  ;;  %v1159_v42 = vpop.f32.mrb[29].mxu0  ;;  %v2133_v25 = vld [vmem:[%s9161_s2] sm:$0x3]  ;;  %v2216_v18 = vld [vmem:[%s9160_s3 + $0x28] sm:$0xff] }
 0x1f2   :  { %v7922_v23 = vadd.f32 %v1159_v42, %v7629_v22  ;;  %v2141_v22 = vsub.s32 1, %v7931_v38 }
 0x1f4   :  { %v1163_v1 = vpop.f32.mrb[30].mxu0 }
 0x1f5   :  { %v7925_v24 = vadd.f32 %v1163_v1, %v7635_v61  ;;  %v1165_v35 = vpop.f32.mrb[31].mxu0  ;;  %v7940_v61 = vrot.slane %v2133_v25, %v2137_v59 }
 0x1f6   :  { %v7928_v20 = vadd.f32 %v1165_v35, %v7637_v50  ;;  %v7944_v50 = vrot.slane %v2133_v25, %v2141_v22 }
 0x237   :  { %v1974_v26 = vpop.f32.mrb[32].mxu1 }
 0x238   :  { %v2101_v31 = vmax.f32 %v7805_v46, %v1974_v26  ;;  %v1976_v44 = vpop.f32.mrb[33].mxu1 }
 0x239   :  { %v2102_v63 = vmax.f32 %v7808_v39, %v1976_v44 }
 0x23a   :  { %v2145_v32 = vadd.f32 %v7940_v61, %v2101_v31 }
 0x23b   :  { %v2146_v2 = vadd.f32 %v7944_v50, %v2102_v63  ;;  %v1980_v49 = vpop.f32.mrb[34].mxu1 }
 0x23c   :  { %v2103_v57 = vmax.f32 %v7811_v0, %v1980_v49  ;;  %v1982_v12 = vpop.f32.mrb[35].mxu1  ;;  %v2211_v0 = vld [vmem:[%s9160_s3] sm:$0xff] }
 0x23d   :  { %v2177_v53 = vmax.f32 %v2145_v32, %v2146_v2  ;;  %v2104_v13 = vmax.f32 %v7814_v43, %v1982_v12  ;;  %v2213_v43 = vld [vmem:[%s9160_s3 + $0x10] sm:$0xff]  ;;  %v2215_v2 = vld [vmem:[%s9160_s3 + $0x20] sm:$0xff] }
 0x23e   :  { %v2147_v30 = vadd.f32 %v7940_v61, %v2103_v57  ;;  %v5474_v35 = vpack.c.bf16 %v2213_v43, %v2211_v0  ;;  %v2219_v43 = vld [vmem:[%s9160_s3 + $0x40] sm:$0xff] }
 0x23f   :  { %v2148_v7 = vadd.f32 %v7944_v50, %v2104_v13  ;;  %v1986_v16 = vpop.f32.mrb[36].mxu1  ;;  %v7955_v39 = vmax.f32 %v2177_v53, 0.0  ;;  %v2220_v53 = vld [vmem:[%s9160_s3 + $0x48] sm:$0xff]  ;;  %v2222_v13 = vld [vmem:[%s9160_s3 + $0x58] sm:$0xff] }
 0x240   :  { %v2105_v46 = vmax.f32 %v7829_v9, %v1986_v16  ;;  %v1988_v34 = vpop.f32.mrb[37].mxu1  ;;  %v5480_v0 = vpack.c.bf16 %v2222_v13, %v2220_v53 }
 0x241   :  { %v2178_v48 = vmax.f32 %v2147_v30, %v2148_v7  ;;  %v2106_v51 = vmax.f32 %v7832_v36, %v1988_v34  ;;  %v2218_v36 = vld [vmem:[%s9160_s3 + $0x38] sm:$0xff]  ;;  %v2294_v31 = vrot.slane %v7955_v39, 1 }
 0x242   :  { %v2149_v14 = vadd.f32 %v7940_v61, %v2105_v46  ;;  %v5476_v32 = vpack.c.bf16 %v2218_v36, %v2216_v18  ;;  %v2224_v18 = vld [vmem:[%s9160_s3 + $0x68] sm:$0xff]  ;;  %v2226_v36 = vld [vmem:[%s9160_s3 + $0x78] sm:$0xff] }
 0x243   :  { %v7965_v54 = vmax.f32 %v2178_v48, 0.0  ;;  %v2150_v9 = vadd.f32 %v7944_v50, %v2106_v51  ;;  %v1992_v11 = vpop.f32.mrb[38].mxu1 }
 0x244   :  { %v2107_v42 = vmax.f32 %v7847_v28, %v1992_v11  ;;  %v1994_v1 = vpop.f32.mrb[39].mxu1  ;;  %v2217_v28 = vld [vmem:[%s9160_s3 + $0x30] sm:$0xff] }
 0x245   :  { %v2179_v25 = vmax.f32 %v2149_v14, %v2150_v9  ;;  %v2108_v26 = vmax.f32 %v7850_v45, %v1994_v1  ;;  %v2295_v44 = vrot.slane %v7965_v54, 1  ;;  %v5478_v48 = vpack.c.bf16 %v2217_v28, %v2215_v2 }
 0x246   :  { %v2151_v63 = vadd.f32 %v7940_v61, %v2107_v42 }
 0x247   :  { %v7985_v49 = vmax.f32 %v2179_v25, 0.0  ;;  %v2152_v57 = vadd.f32 %v7944_v50, %v2108_v26  ;;  %v1998_v45 = vpop.f32.mrb[40].mxu1  ;;  %v2296_v12 = vsel %vm2293_vm0, %v2294_v31, %v2295_v44 }
 0x248   :  { %v2109_v30 = vmax.f32 %v7853_v37, %v1998_v45  ;;  %v2000_v7 = vpop.f32.mrb[41].mxu1  ;;  %2408 = vmatmul.mubr.f32.vlgmr.msra.gmra.mrb[32].mxu0 %v2296_v12  ;;  %v2221_v37 = vld [vmem:[%s9160_s3 + $0x50] sm:$0xff]  ;;  %v2228_v45 = vld [vmem:[%s9160_s3 + $0x88] sm:$0xff]  ;;  %v2230_v12 = vld [vmem:[%s9160_s3 + $0x98] sm:$0xff] }
 0x249   :  { %v2180_v16 = vmax.f32 %v2151_v63, %v2152_v57  ;;  %v2110_v46 = vmax.f32 %v7856_v47, %v2000_v7  ;;  %5475 = vmatpush1.bf16.msra.mxu0 %v5474_v35  ;;  %2413 = vmatprep.mubr.f32.mxu0 %v6168_v3  ;;  %v2297_v34 = vrot.slane %v7985_v49, 1  ;;  %v5482_v31 = vpack.c.bf16 %v2221_v37, %v2219_v43 }
 0x24a   :  { %v2153_v51 = vadd.f32 %v7940_v61, %v2109_v30  ;;  %5477 = vmatprep.subr.bf16.mxu0 %v5476_v32  ;;  %v5484_v63 = vpack.c.bf16 %v2226_v36, %v2224_v18  ;;  %v2223_v32 = vld [vmem:[%s9160_s3 + $0x60] sm:$0xff] }
 0x24b   :  { %v8006_v14 = vmax.f32 %v2180_v16, 0.0  ;;  %v2154_v47 = vadd.f32 %v7944_v50, %v2110_v46  ;;  %v2004_v9 = vpop.f32.mrb[42].mxu1  ;;  %v2298_v11 = vsel %vm2293_vm0, %v2295_v44, %v2297_v34 }
 0x24c   :  { %v2111_v42 = vmax.f32 %v7859_v60, %v2004_v9  ;;  %v2006_v1 = vpop.f32.mrb[43].mxu1  ;;  %2414 = vmatmul.mubr.f32.gmra.mrb[34].mxu0 %v2298_v11  ;;  %v2225_v60 = vld [vmem:[%s9160_s3 + $0x70] sm:$0xff]  ;;  %v2234_v9 = vld [vmem:[%s9160_s3 + $0xb8] sm:$0xff] }
 0x24d   :  { %v2181_v35 = vmax.f32 %v2153_v51, %v2154_v47  ;;  %v2112_v25 = vmax.f32 %v7862_v5, %v2006_v1  ;;  %2419 = vmatprep.mubr.f32.mxu0 %v6168_v3  ;;  %v2299_v26 = vrot.slane %v8006_v14, 1  ;;  %5479 = vmatpush1.bf16.msra.mxu0 %v5478_v48  ;;  %v5486_v46 = vpack.c.bf16 %v2225_v60, %v2223_v32  ;;  %v2227_v51 = vld [vmem:[%s9160_s3 + $0x80] sm:$0xff]  ;;  %v2232_v47 = vld [vmem:[%s9160_s3 + $0xa8] sm:$0xff] }
 0x24e   :  { %v2155_v44 = vadd.f32 %v7940_v61, %v2111_v42  ;;  %5481 = vmatprep.subr.bf16.mxu0 %v5480_v0  ;;  %v5488_v48 = vpack.c.bf16 %v2230_v12, %v2228_v45  ;;  %v2236_v60 = vld [vmem:[%s9160_s3 + $0xc8] sm:$0xff] }
 0x24f   :  { %v8027_v2 = vmax.f32 %v2181_v35, 0.0  ;;  %v2156_v5 = vadd.f32 %v7944_v50, %v2112_v25  ;;  %v2010_v28 = vpop.f32.mrb[44].mxu1  ;;  %v2300_v57 = vsel %vm2293_vm0, %v2297_v34, %v2299_v26 }
 0x250   :  { %v2113_v53 = vmax.f32 %v7871_v52, %v2010_v28  ;;  %v2012_v13 = vpop.f32.mrb[45].mxu1  ;;  %2420 = vmatmul.mubr.f32.gmra.mrb[36].mxu0 %v2300_v57  ;;  %v2229_v52 = vld [vmem:[%s9160_s3 + $0x90] sm:$0xff] }
 0x251   :  { %v2182_v30 = vmax.f32 %v2155_v44, %v2156_v5  ;;  %v2114_v7 = vmax.f32 %v7874_v19, %v2012_v13  ;;  %2425 = vmatprep.mubr.f32.mxu0 %v6168_v3  ;;  %v2301_v16 = vrot.slane %v8027_v2, 1  ;;  %5483 = vmatpush1.bf16.msra.mxu0 %v5482_v31  ;;  %v5490_v35 = vpack.c.bf16 %v2229_v52, %v2227_v51  ;;  %v2231_v31 = vld [vmem:[%s9160_s3 + $0xa0] sm:$0xff]  ;;  %v2238_v5 = vld [vmem:[%s9160_s3 + $0xd8] sm:$0xff]  ;;  %v2240_v51 = vld [vmem:[%s9160_s3 + $0xe8] sm:$0xff] }
 0x252   :  { %v2157_v34 = vadd.f32 %v7940_v61, %v2113_v53  ;;  %5485 = vmatprep.subr.bf16.mxu0 %v5484_v63  ;;  %v2242_v52 = vld [vmem:[%s9160_s3 + $0xf8] sm:$0xff] }
 0x253   :  { %v8048_v0 = vmax.f32 %v2182_v30, 0.0  ;;  %v2158_v19 = vadd.f32 %v7944_v50, %v2114_v7  ;;  %v2016_v43 = vpop.f32.mrb[46].mxu1  ;;  %v2302_v37 = vsel %vm2293_vm0, %v2299_v26, %v2301_v16  ;;  %v5492_v26 = vpack.c.bf16 %v2234_v9, %v2232_v47 }
 0x254   :  { %v2115_v11 = vmax.f32 %v7877_v15, %v2016_v43  ;;  %v2018_v18 = vpop.f32.mrb[47].mxu1  ;;  %2426 = vmatmul.mubr.f32.gmra.mrb[38].mxu0 %v2302_v37  ;;  %v2233_v15 = vld [vmem:[%s9160_s3 + $0xb0] sm:$0xff]  ;;  %v5496_v7 = vpack.c.bf16 %v2238_v5, %v2236_v60 }
 0x255   :  { %v2183_v36 = vmax.f32 %v2157_v34, %v2158_v19  ;;  %v2116_v42 = vmax.f32 %v7880_v56, %v2018_v18  ;;  %2431 = vmatprep.mubr.f32.mxu0 %v6168_v3  ;;  %v2303_v1 = vrot.slane %v8048_v0, 1  ;;  %5487 = vmatpush1.bf16.msra.mxu0 %v5486_v46  ;;  %v5494_v13 = vpack.c.bf16 %v2233_v15, %v2231_v31  ;;  %v4596_v31 = vld [vmem:[%s9160_s3 + $0x218] sm:$0xff] }
 0x256   :  { %v2159_v25 = vadd.f32 %v7940_v61, %v2115_v11  ;;  %5489 = vmatprep.subr.bf16.mxu0 %v5488_v48 }
 0x257   :  { %v8069_v44 = vmax.f32 %v2183_v36, 0.0  ;;  %v2160_v56 = vadd.f32 %v7944_v50, %v2116_v42  ;;  %v2022_v63 = vpop.f32.mrb[48].mxu1  ;;  %v2304_v32 = vsel %vm2293_vm0, %v2301_v16, %v2303_v1  ;;  %v2235_v16 = vld [vmem:[%s9160_s3 + $0xc0] sm:$0xff]  ;;  %v5500_v36 = vpack.c.bf16 %v2242_v52, %v2240_v51 }
 0x258   :  { %v2117_v28 = vmax.f32 %v7883_v33, %v2022_v63  ;;  %v2024_v57 = vpop.f32.mrb[49].mxu1  ;;  %2432 = vmatmul.mubr.f32.gmra.mrb[40].mxu0 %v2304_v32  ;;  %v2237_v33 = vld [vmem:[%s9160_s3 + $0xd0] sm:$0xff]  ;;  %v2239_v42 = vld [vmem:[%s9160_s3 + $0xe0] sm:$0xff] }
 0x259   :  { %v2184_v45 = vmax.f32 %v2159_v25, %v2160_v56  ;;  %v2118_v12 = vmax.f32 %v7886_v21, %v2024_v57  ;;  %2437 = vmatprep.mubr.f32.mxu0 %v6168_v3  ;;  %v2305_v53 = vrot.slane %v8069_v44, 1  ;;  %5491 = vmatpush1.bf16.msra.mxu0 %v5490_v35  ;;  %v5498_v11 = vpack.c.bf16 %v2237_v33, %v2235_v16 }
 0x25a   :  { %v2161_v30 = vadd.f32 %v7940_v61, %v2117_v28  ;;  %5493 = vmatprep.subr.bf16.mxu0 %v5492_v26  ;;  %v4594_v26 = vld [vmem:[%s9160_s3 + $0x208] sm:$0xff] }
 0x25b   :  { %v8090_v46 = vmax.f32 %v2184_v45, 0.0  ;;  %v2162_v21 = vadd.f32 %v7944_v50, %v2118_v12  ;;  %v2028_v34 = vpop.f32.mrb[50].mxu1  ;;  %v2306_v48 = vsel %vm2293_vm0, %v2303_v1, %v2305_v53  ;;  %v5504_v57 = vpack.c.bf16 %v4596_v31, %v4594_v26 }
 0x25c   :  { %v2119_v19 = vmax.f32 %v7889_v27, %v2028_v34  ;;  %v2030_v43 = vpop.f32.mrb[51].mxu1  ;;  %2438 = vmatmul.mubr.f32.gmra.mrb[42].mxu0 %v2306_v48  ;;  %v2241_v27 = vld [vmem:[%s9160_s3 + $0xf0] sm:$0xff] }
 0x25d   :  { %v2185_v37 = vmax.f32 %v2161_v30, %v2162_v21  ;;  %v2120_v47 = vmax.f32 %v7892_v62, %v2030_v43  ;;  %2443 = vmatprep.mubr.f32.mxu0 %v6168_v3  ;;  %v2307_v9 = vrot.slane %v8090_v46, 1  ;;  %5495 = vmatpush1.bf16.msra.mxu0 %v5494_v13  ;;  %v5502_v5 = vpack.c.bf16 %v2241_v27, %v2239_v42 }
 0x25e   :  { %v2163_v18 = vadd.f32 %v7940_v61, %v2119_v19  ;;  %5497 = vmatprep.subr.bf16.mxu0 %v5496_v7 }
 0x25f   :  { %v8111_v1 = vmax.f32 %v2185_v37, 0.0  ;;  %v2164_v62 = vadd.f32 %v7944_v50, %v2120_v47  ;;  %v2034_v35 = vpop.f32.mrb[52].mxu1  ;;  %v2308_v25 = vsel %vm2293_vm0, %v2305_v53, %v2307_v9 }
 0x260   :  { %v2121_v15 = vmax.f32 %v7895_v41, %v2034_v35  ;;  %v2036_v56 = vpop.f32.mrb[53].mxu1  ;;  %2444 = vmatmul.mubr.f32.gmra.mrb[44].mxu0 %v2308_v25 }
 0x261   :  { %v2186_v63 = vmax.f32 %v2163_v18, %v2164_v62  ;;  %v2122_v32 = vmax.f32 %v7898_v40, %v2036_v56  ;;  %2449 = vmatprep.mubr.f32.mxu0 %v6168_v3  ;;  %v2309_v60 = vrot.slane %v8111_v1, 1  ;;  %5499 = vmatpush1.bf16.msra.mxu0 %v5498_v11 }
 0x262   :  { %v2165_v28 = vadd.f32 %v7940_v61, %v2121_v15  ;;  %5501 = vmatprep.subr.bf16.mxu0 %v5500_v36 }
 0x263   :  { %v8126_v45 = vmax.f32 %v2186_v63, 0.0  ;;  %v2166_v12 = vadd.f32 %v7944_v50, %v2122_v32  ;;  %v2040_v41 = vpop.f32.mrb[54].mxu1  ;;  %v2310_v53 = vsel %vm2293_vm0, %v2307_v9, %v2309_v60 }
 0x264   :  { %v2123_v13 = vmax.f32 %v7901_v4, %v2040_v41  ;;  %v2042_v40 = vpop.f32.mrb[55].mxu1  ;;  %2450 = vmatmul.mubr.f32.gmra.mrb[46].mxu0 %v2310_v53 }
 0x265   :  { %v2187_v30 = vmax.f32 %v2165_v28, %v2166_v12  ;;  %v2124_v7 = vmax.f32 %v7904_v55, %v2042_v40  ;;  %2455 = vmatprep.mubr.f32.mxu0 %v6168_v3  ;;  %v2311_v16 = vrot.slane %v8126_v45, 1  ;;  %5503 = vmatpush1.bf16.msra.mxu0 %v5502_v5 }
 0x266   :  { %v2167_v33 = vadd.f32 %v7940_v61, %v2123_v13  ;;  %5505 = vmatprep.subr.bf16.mxu0 %v5504_v57 }
 0x267   :  { %v8135_v21 = vmax.f32 %v2187_v30, 0.0  ;;  %v2168_v34 = vadd.f32 %v7944_v50, %v2124_v7  ;;  %v2046_v48 = vpop.f32.mrb[56].mxu1  ;;  %v2312_v4 = vsel %vm2293_vm0, %v2309_v60, %v2311_v16 }
 0x268   :  { %v2125_v51 = vmax.f32 %v7907_v58, %v2046_v48  ;;  %v2048_v52 = vpop.f32.mrb[57].mxu1  ;;  %2456 = vmatmul.mubr.f32.gmra.mrb[48].mxu0 %v2312_v4  ;;  %v2325_v48 = vrot.slane %v6168_v3, 1  ;;  %v4593_v4 = vld [vmem:[%s9160_s3 + $0x200] sm:$0xff] }
 0x269   :  { %v2188_v55 = vmax.f32 %v2167_v33, %v2168_v34  ;;  %v2126_v19 = vmax.f32 %v7910_v17, %v2048_v52  ;;  %2461 = vmatprep.mubr.f32.mxu0 %v6168_v3  ;;  %v2313_v43 = vrot.slane %v8135_v21, 1 }
 0x26a   :  { %v2169_v37 = vadd.f32 %v7940_v61, %v2125_v51  ;;  %v4595_v51 = vld [vmem:[%s9160_s3 + $0x210] sm:$0xff] }
 0x26b   :  { %v8144_v47 = vmax.f32 %v2188_v55, 0.0  ;;  %v2170_v9 = vadd.f32 %v7944_v50, %v2126_v19  ;;  %v2052_v11 = vpop.f32.mrb[58].mxu1  ;;  %v2314_v18 = vsel %vm2293_vm0, %v2311_v16, %v2313_v43  ;;  %v4598_v55 = vld [vmem:[%s9160_s3 + $0x228] sm:$0xff]  ;;  %v4600_v19 = vld [vmem:[%s9160_s3 + $0x238] sm:$0xff] }
 0x26c   :  { %v2127_v58 = vmax.f32 %v7913_v29, %v2052_v11  ;;  %v2054_v36 = vpop.f32.mrb[59].mxu1  ;;  %2462 = vmatmul.mubr.f32.gmra.mrb[50].mxu0 %v2314_v18  ;;  %v4599_v11 = vld [vmem:[%s9160_s3 + $0x230] sm:$0xff]  ;;  %v4602_v18 = vld [vmem:[%s9160_s3 + $0x248] sm:$0xff] }
 0x26d   :  { %v2189_v42 = vmax.f32 %v2169_v37, %v2170_v9  ;;  %v2128_v17 = vmax.f32 %v7916_v6, %v2054_v36  ;;  %2467 = vmatprep.mubr.f32.mxu0 %v6168_v3  ;;  %v2315_v27 = vrot.slane %v8144_v47, 1  ;;  %v5508_v37 = vpack.c.bf16 %v4600_v19, %v4598_v55  ;;  %v4597_v9 = vld [vmem:[%s9160_s3 + $0x220] sm:$0xff]  ;;  %v4626_v55 = vld [vmem:[%s9160_s3 + $0x308] sm:$0xff]  ;;  %v4628_v19 = vld [vmem:[%s9160_s3 + $0x318] sm:$0xff] }
 0x26e   :  { %v2171_v62 = vadd.f32 %v7940_v61, %v2127_v58  ;;  %v4604_v58 = vld [vmem:[%s9160_s3 + $0x258] sm:$0xff]  ;;  %v5510_v36 = vpack.c.bf16 %v4599_v11, %v4597_v9  ;;  %v4625_v9 = vld [vmem:[%s9160_s3 + $0x300] sm:$0xff]  ;;  %v4627_v11 = vld [vmem:[%s9160_s3 + $0x310] sm:$0xff] }
 0x26f   :  { %v8153_v35 = vmax.f32 %v2189_v42, 0.0  ;;  %v2172_v25 = vadd.f32 %v7944_v50, %v2128_v17  ;;  %v2058_v26 = vpop.f32.mrb[60].mxu1  ;;  %v2316_v31 = vsel %vm2293_vm0, %v2313_v43, %v2315_v27  ;;  %v5506_v43 = vpack.c.bf16 %v4595_v51, %v4593_v4  ;;  %v4601_v17 = vld [vmem:[%s9160_s3 + $0x240] sm:$0xff] }
 0x270   :  { %v2129_v29 = vmax.f32 %v7919_v10, %v2058_v26  ;;  %v2060_v15 = vpop.f32.mrb[61].mxu1  ;;  %2468 = vmatmul.mubr.f32.gmra.mrb[52].mxu0 %v2316_v31  ;;  %v5512_v42 = vpack.c.bf16 %v4604_v58, %v4602_v18  ;;  %v4621_v51 = vld [vmem:[%s9160_s3 + $0x2e0] sm:$0xff]  ;;  %v2699_v18 = vrot.slane %v7965_v54, 2  ;;  %v4630_v58 = vld [vmem:[%s9160_s3 + $0x328] sm:$0xff] }
 0x271   :  { %v2190_v56 = vmax.f32 %v2171_v62, %v2172_v25  ;;  %v2130_v6 = vmax.f32 %v7922_v23, %v2060_v15  ;;  %2473 = vmatprep.mubr.f32.mxu0 %v6168_v3  ;;  %v2317_v63 = vrot.slane %v8153_v35, 1  ;;  %v4606_v62 = vld [vmem:[%s9160_s3 + $0x268] sm:$0xff]  ;;  %v4608_v25 = vld [vmem:[%s9160_s3 + $0x278] sm:$0xff]  ;;  %v4607_v15 = vld [vmem:[%s9160_s3 + $0x270] sm:$0xff] }
 0x272   :  { %v2173_v32 = vadd.f32 %v7940_v61, %v2129_v29  ;;  %v5516_v31 = vpack.c.bf16 %v4608_v25, %v4606_v62  ;;  %v4605_v29 = vld [vmem:[%s9160_s3 + $0x260] sm:$0xff]  ;;  %v4631_v25 = vld [vmem:[%s9160_s3 + $0x330] sm:$0xff] }
 0x273   :  { %v8162_v60 = vmax.f32 %v2190_v56, 0.0  ;;  %v2174_v5 = vadd.f32 %v7944_v50, %v2130_v6  ;;  %v2064_v28 = vpop.f32.mrb[62].mxu1  ;;  %v2318_v57 = vsel %vm2293_vm0, %v2315_v27, %v2317_v63  ;;  %v4603_v27 = vld [vmem:[%s9160_s3 + $0x250] sm:$0xff]  ;;  %v4610_v56 = vld [vmem:[%s9160_s3 + $0x288] sm:$0xff]  ;;  %v4612_v6 = vld [vmem:[%s9160_s3 + $0x298] sm:$0xff] }
 0x274   :  { %v2131_v10 = vmax.f32 %v7925_v24, %v2064_v28  ;;  %v2066_v12 = vpop.f32.mrb[63].mxu1  ;;  %2474 = vmatmul.mubr.f32.gmra.mrb[54].mxu0 %v2318_v57  ;;  %v5514_v26 = vpack.c.bf16 %v4603_v27, %v4601_v17  ;;  %v4611_v28 = vld [vmem:[%s9160_s3 + $0x290] sm:$0xff]  ;;  %v4614_v57 = vld [vmem:[%s9160_s3 + $0x2a8] sm:$0xff]  ;;  %v5538_v17 = vpack.c.bf16 %v4627_v11, %v4625_v9  ;;  %v4629_v62 = vld [vmem:[%s9160_s3 + $0x320] sm:$0xff]  ;;  %v2709_v9 = vrot.slane %v8069_v44, 2 }
 0x275   :  { %v2191_v41 = vmax.f32 %v2173_v32, %v2174_v5  ;;  %v2132_v23 = vmax.f32 %v7928_v20, %v2066_v12  ;;  %2479 = vmatprep.mubr.f32.mxu0 %v6168_v3  ;;  %v2319_v53 = vrot.slane %v8162_v60, 1  ;;  %v5520_v32 = vpack.c.bf16 %v4612_v6, %v4610_v56  ;;  %v4609_v5 = vld [vmem:[%s9160_s3 + $0x280] sm:$0xff]  ;;  %v4650_v11 = vld [vmem:[%s9160_s3 + $0x3c8] sm:$0xff] }
 0x276   :  { %v2175_v13 = vadd.f32 %v7940_v61, %v2131_v10  ;;  %v4616_v10 = vld [vmem:[%s9160_s3 + $0x2b8] sm:$0xff]  ;;  %v5522_v12 = vpack.c.bf16 %v4611_v28, %v4609_v5  ;;  %v4633_v6 = vld [vmem:[%s9160_s3 + $0x340] sm:$0xff]  ;;  %v2703_v5 = vrot.slane %v8006_v14, 2  ;;  %v4638_v28 = vld [vmem:[%s9160_s3 + $0x368] sm:$0xff] }
 0x277   :  { %v8171_v40 = vmax.f32 %v2191_v41, 0.0  ;;  %v2176_v30 = vadd.f32 %v7944_v50, %v2132_v23  ;;  %v2320_v7 = vsel %vm2293_vm0, %v2317_v63, %v2319_v53  ;;  %v5518_v63 = vpack.c.bf16 %v4607_v15, %v4605_v29  ;;  %v4613_v23 = vld [vmem:[%s9160_s3 + $0x2a0] sm:$0xff]  ;;  %v4636_v29 = vld [vmem:[%s9160_s3 + $0x358] sm:$0xff] }
 0x278   :  { %2480 = vmatmul.mubr.f32.gmra.mrb[56].mxu0 %v2320_v7  ;;  %v5524_v41 = vpack.c.bf16 %v4616_v10, %v4614_v57  ;;  %v5542_v15 = vpack.c.bf16 %v4631_v25, %v4629_v62  ;;  %v4640_v57 = vld [vmem:[%s9160_s3 + $0x378] sm:$0xff]  ;;  %v2711_v62 = vrot.slane %v8090_v46, 2  ;;  %v4654_v25 = vld [vmem:[%s9160_s3 + $0x3e8] sm:$0xff] }
 0x279   :  { %v2192_v16 = vmax.f32 %v2175_v13, %v2176_v30  ;;  %2485 = vmatprep.mubr.f32.mxu0 %v6168_v3  ;;  %v2321_v24 = vrot.slane %v8171_v40, 1  ;;  %v4618_v13 = vld [vmem:[%s9160_s3 + $0x2c8] sm:$0xff]  ;;  %v4620_v30 = vld [vmem:[%s9160_s3 + $0x2d8] sm:$0xff] }
 0x27b   :  { %v8177_v33 = vmax.f32 %v2192_v16, 0.0  ;;  %v2322_v20 = vsel %vm2293_vm0, %v2319_v53, %v2321_v24  ;;  %v4615_v53 = vld [vmem:[%s9160_s3 + $0x2b0] sm:$0xff]  ;;  %v5528_v16 = vpack.c.bf16 %v4620_v30, %v4618_v13  ;;  %v2705_v13 = vrot.slane %v8027_v2, 2  ;;  %v4642_v30 = vld [vmem:[%s9160_s3 + $0x388] sm:$0xff] }
 0x27c   :  { %2486 = vmatmul.mubr.f32.gmra.mrb[58].mxu0 %v2322_v20  ;;  %v5526_v7 = vpack.c.bf16 %v4615_v53, %v4613_v23  ;;  %v4619_v20 = vld [vmem:[%s9160_s3 + $0x2d0] sm:$0xff] }
 0x27d   :  { %v8182_v61 = vsel %vm2209_vm1, %v8177_v33, 0.0  ;;  %2491 = vmatprep.mubr.f32.mxu0 %v6168_v3  ;;  %v4639_v23 = vld [vmem:[%s9160_s3 + $0x370] sm:$0xff] }
 0x27e   :  { %v2323_v50 = vrot.slane %v8182_v61, 1 }
 0x280   :  { %v2324_v34 = vsel %vm2293_vm0, %v2321_v24, %v2323_v50  ;;  %v2326_v52 = vsel %vm2293_vm0, %v2323_v50, %v2325_v48  ;;  %v4617_v24 = vld [vmem:[%s9160_s3 + $0x2c0] sm:$0xff]  ;;  %v4622_v50 = vld [vmem:[%s9160_s3 + $0x2e8] sm:$0xff] }
 0x281   :  { %2492 = vmatmul.mubr.f32.gmra.mrb[60].mxu0 %v2324_v34  ;;  %v4624_v34 = vld [vmem:[%s9160_s3 + $0x2f8] sm:$0xff]  ;;  %v5530_v48 = vpack.c.bf16 %v4619_v20, %v4617_v24  ;;  %v4641_v20 = vld [vmem:[%s9160_s3 + $0x380] sm:$0xff] }
 0x282   :  { %2497 = vmatprep.mubr.f32.mxu0 %v6168_v3  ;;  %v5532_v4 = vpack.c.bf16 %v4624_v34, %v4622_v50  ;;  %v4643_v50 = vld [vmem:[%s9160_s3 + $0x390] sm:$0xff]  ;;  %v2706_v34 = vsel %vm2209_vm1, %v2703_v5, %v2705_v13 }
 0x285   :  { %2498 = vmatmul.mubr.f32.gmra.mrb[62].mxu0 %v2326_v52  ;;  %v4623_v52 = vld [vmem:[%s9160_s3 + $0x2f0] sm:$0xff] }
 0x286   :  { %2568 = vmatprep.mubr.f32.mxu0 %v6168_v3 }
 0x289   :  { %2569 = vmatmul.mubr.f32.vlgmr.msra.gmra.mrb[32].mxu0 %v7955_v39 }
 0x28a   :  { %5507 = vmatpush1.bf16.msra.mxu0 %v5506_v43  ;;  %2574 = vmatprep.mubr.f32.mxu0 %v6168_v3  ;;  %v5534_v43 = vpack.c.bf16 %v4623_v52, %v4621_v51  ;;  %v4648_v51 = vld [vmem:[%s9160_s3 + $0x3b8] sm:$0xff]  ;;  %v5554_v52 = vpack.c.bf16 %v4643_v50, %v4641_v20  ;;  %v2725_v20 = vrot.slane %v8171_v40, 2 }
 0x28b   :  { %5509 = vmatprep.subr.bf16.mxu0 %v5508_v37  ;;  %v5536_v37 = vpack.c.bf16 %v4628_v19, %v4626_v55  ;;  %v4645_v19 = vld [vmem:[%s9160_s3 + $0x3a0] sm:$0xff] }
 0x28d   :  { %2575 = vmatmul.mubr.f32.gmra.mrb[34].mxu0 %v7965_v54 }
 0x28e   :  { %2580 = vmatprep.mubr.f32.mxu0 %v6168_v3  ;;  %5511 = vmatpush1.bf16.msra.mxu0 %v5510_v36  ;;  %v4632_v36 = vld [vmem:[%s9160_s3 + $0x338] sm:$0xff] }
 0x28f   :  { %5513 = vmatprep.subr.bf16.mxu0 %v5512_v42  ;;  %v2698_v42 = vrot.slane %v7955_v39, 2  ;;  %v5540_v27 = vpack.c.bf16 %v4632_v36, %v4630_v58 }
 0x291   :  { %2581 = vmatmul.mubr.f32.gmra.mrb[36].mxu0 %v7985_v49 }
 0x292   :  { %2586 = vmatprep.mubr.f32.mxu0 %v6168_v3  ;;  %5515 = vmatpush1.bf16.msra.mxu0 %v5514_v26  ;;  %v2700_v26 = vsel %vm2209_vm1, %v2698_v42, %v2699_v18  ;;  %v4649_v42 = vld [vmem:[%s9160_s3 + $0x3c0] sm:$0xff] }
 0x293   :  { %5517 = vmatprep.subr.bf16.mxu0 %v5516_v31  ;;  %v2701_v31 = vrot.slane %v7985_v49, 2 }
 0x295   :  { %2587 = vmatmul.mubr.f32.gmra.mrb[38].mxu0 %v8006_v14  ;;  %v2704_v53 = vsel %vm2209_vm1, %v2701_v31, %v2703_v5 }
 0x296   :  { %2592 = vmatprep.mubr.f32.mxu0 %v6168_v3  ;;  %5519 = vmatpush1.bf16.msra.mxu0 %v5518_v63  ;;  %v4635_v63 = vld [vmem:[%s9160_s3 + $0x350] sm:$0xff] }
 0x297   :  { %5521 = vmatprep.subr.bf16.mxu0 %v5520_v32  ;;  %v2702_v32 = vsel %vm2209_vm1, %v2699_v18, %v2701_v31  ;;  %v5546_v10 = vpack.c.bf16 %v4635_v63, %v4633_v6  ;;  %v4652_v18 = vld [vmem:[%s9160_s3 + $0x3d8] sm:$0xff]  ;;  %v2713_v6 = vrot.slane %v8111_v1, 2  ;;  %v4658_v63 = vld [vmem:[%s9160_s3 + $0x408] sm:$0xff] }
 0x298   :  { %v5560_v36 = vpack.c.bf16 %v4652_v18, %v4650_v11 }
 0x299   :  { %2593 = vmatmul.mubr.f32.gmra.mrb[40].mxu0 %v8027_v2 }
 0x29a   :  { %2598 = vmatprep.mubr.f32.mxu0 %v6168_v3  ;;  %5523 = vmatpush1.bf16.msra.mxu0 %v5522_v12  ;;  %v5548_v12 = vpack.c.bf16 %v4640_v57, %v4638_v28  ;;  %v2714_v57 = vsel %vm2209_vm1, %v2711_v62, %v2713_v6 }
 0x29b   :  { %5525 = vmatprep.subr.bf16.mxu0 %v5524_v41  ;;  %v4637_v41 = vld [vmem:[%s9160_s3 + $0x360] sm:$0xff] }
 0x29d   :  { %2599 = vmatmul.mubr.f32.gmra.mrb[42].mxu0 %v8048_v0 }
 0x29e   :  { %2604 = vmatprep.mubr.f32.mxu0 %v6168_v3  ;;  %5527 = vmatpush1.bf16.msra.mxu0 %v5526_v7  ;;  %v4644_v7 = vld [vmem:[%s9160_s3 + $0x398] sm:$0xff] }
 0x29f   :  { %5529 = vmatprep.subr.bf16.mxu0 %v5528_v16  ;;  %v5550_v16 = vpack.c.bf16 %v4639_v23, %v4637_v41  ;;  %v5552_v24 = vpack.c.bf16 %v4644_v7, %v4642_v30  ;;  %v2717_v41 = vrot.slane %v8135_v21, 2  ;;  %v2721_v30 = vrot.slane %v8153_v35, 2 }
 0x2a1   :  { %2605 = vmatmul.mubr.f32.gmra.mrb[44].mxu0 %v8069_v44 }
 0x2a2   :  { %2610 = vmatprep.mubr.f32.mxu0 %v6168_v3  ;;  %5531 = vmatpush1.bf16.msra.mxu0 %v5530_v48  ;;  %v2707_v48 = vrot.slane %v8048_v0, 2 }
 0x2a3   :  { %5533 = vmatprep.subr.bf16.mxu0 %v5532_v4  ;;  %v4646_v4 = vld [vmem:[%s9160_s3 + $0x3a8] sm:$0xff] }
 0x2a4   :  { %v5556_v55 = vpack.c.bf16 %v4648_v51, %v4646_v4  ;;  %v2729_v4 = vrot.slane %v6168_v3, 2  ;;  %v4657_v51 = vld [vmem:[%s9160_s3 + $0x400] sm:$0xff] }
 0x2a5   :  { %2611 = vmatmul.mubr.f32.gmra.mrb[46].mxu0 %v8090_v46 }
 0x2a6   :  { %2616 = vmatprep.mubr.f32.mxu0 %v6168_v3  ;;  %5535 = vmatpush1.bf16.msra.mxu0 %v5534_v43  ;;  %v4647_v43 = vld [vmem:[%s9160_s3 + $0x3b0] sm:$0xff] }
 0x2a7   :  { %5537 = vmatprep.subr.bf16.mxu0 %v5536_v37  ;;  %v2708_v37 = vsel %vm2209_vm1, %v2705_v13, %v2707_v48  ;;  %v5558_v58 = vpack.c.bf16 %v4647_v43, %v4645_v19  ;;  %v2975_v19 = vrot.slane %v7965_v54, 3  ;;  %v4662_v43 = vld [vmem:[%s9160_s3 + $0x428] sm:$0xff] }
 0x2a9   :  { %2617 = vmatmul.mubr.f32.gmra.mrb[48].mxu0 %v8111_v1 }
 0x2aa   :  { %2622 = vmatprep.mubr.f32.mxu0 %v6168_v3 }
 0x2ad   :  { %2623 = vmatmul.mubr.f32.gmra.mrb[50].mxu0 %v8126_v45 }
 0x2ae   :  { %2628 = vmatprep.mubr.f32.mxu0 %v6168_v3 }
 0x2b1   :  { %2629 = vmatmul.mubr.f32.gmra.mrb[52].mxu0 %v8135_v21 }
 0x2b2   :  { %2634 = vmatprep.mubr.f32.mxu0 %v6168_v3 }
 0x2b5   :  { %2635 = vmatmul.mubr.f32.gmra.mrb[54].mxu0 %v8144_v47 }
 0x2b6   :  { %2640 = vmatprep.mubr.f32.mxu0 %v6168_v3 }
 0x2b9   :  { %2641 = vmatmul.mubr.f32.gmra.mrb[56].mxu0 %v8153_v35 }
 0x2ba   :  { %2646 = vmatprep.mubr.f32.mxu0 %v6168_v3 }
 0x2bd   :  { %2647 = vmatmul.mubr.f32.gmra.mrb[58].mxu0 %v8162_v60 }
 0x2be   :  { %2652 = vmatprep.mubr.f32.mxu0 %v6168_v3 }
 0x2c1   :  { %2653 = vmatmul.mubr.f32.gmra.mrb[60].mxu0 %v8171_v40 }
 0x2c2   :  { %2658 = vmatprep.mubr.f32.mxu0 %v6168_v3 }
 0x2c5   :  { %4592 = vmatmul.mubr.msk.f32.gmra.mrb[62].mxu0 %vm2209_vm1, %v8177_v33  ;;  %v4634_v33 = vld [vmem:[%s9160_s3 + $0x348] sm:$0xff] }
 0x2c6   :  { %2811 = vmatprep.mubr.f32.mxu0 %v6168_v3  ;;  %v5544_v56 = vpack.c.bf16 %v4636_v29, %v4634_v33  ;;  %v4653_v29 = vld [vmem:[%s9160_s3 + $0x3e0] sm:$0xff] }
 0x2c9   :  { %2812 = vmatmul.mubr.f32.vlgmr.msra.gmra.mrb[32].mxu0 %v2700_v26  ;;  %v4656_v26 = vld [vmem:[%s9160_s3 + $0x3f8] sm:$0xff] }
 0x2ca   :  { %5539 = vmatpush1.bf16.msra.mxu0 %v5538_v17  ;;  %2817 = vmatprep.mubr.f32.mxu0 %v6168_v3  ;;  %v4651_v17 = vld [vmem:[%s9160_s3 + $0x3d0] sm:$0xff]  ;;  %v5564_v33 = vpack.c.bf16 %v4656_v26, %v4654_v25 }
 0x2cb   :  { %5541 = vmatprep.subr.bf16.mxu0 %v5540_v27  ;;  %v2710_v27 = vsel %vm2209_vm1, %v2707_v48, %v2709_v9  ;;  %v5562_v31 = vpack.c.bf16 %v4651_v17, %v4649_v42  ;;  %v2977_v17 = vrot.slane %v7985_v49, 3 }
 0x2cd   :  { %2818 = vmatmul.mubr.f32.gmra.mrb[34].mxu0 %v2702_v32  ;;  %v4660_v32 = vld [vmem:[%s9160_s3 + $0x418] sm:$0xff] }
 0x2ce   :  { %2823 = vmatprep.mubr.f32.mxu0 %v6168_v3  ;;  %5543 = vmatpush1.bf16.msra.mxu0 %v5542_v15  ;;  %v4655_v15 = vld [vmem:[%s9160_s3 + $0x3f0] sm:$0xff]  ;;  %v5568_v28 = vpack.c.bf16 %v4660_v32, %v4658_v63 }
 0x2cf   :  { %5545 = vmatprep.subr.bf16.mxu0 %v5544_v56  ;;  %v2712_v56 = vsel %vm2209_vm1, %v2709_v9, %v2711_v62  ;;  %v5566_v5 = vpack.c.bf16 %v4655_v15, %v4653_v29  ;;  %v2974_v9 = vrot.slane %v7955_v39, 3  ;;  %v4668_v62 = vld [vmem:[%s9160_s3 + $0x458] sm:$0xff]  ;;  %v2978_v29 = vsel %vm2973_vm2, %v2975_v19, %v2977_v17 }
 0x2d0   :  { %v2979_v15 = vrot.slane %v8006_v14, 3 }
 0x2d1   :  { %2824 = vmatmul.mubr.f32.gmra.mrb[36].mxu0 %v2704_v53  ;;  %v2719_v53 = vrot.slane %v8144_v47, 2  ;;  %v2976_v42 = vsel %vm2973_vm2, %v2974_v9, %v2975_v19  ;;  %v4684_v19 = vld [vmem:[%s9160_s3 + $0x4d8] sm:$0xff]  ;;  %v4681_v9 = vld [vmem:[%s9160_s3 + $0x4c0] sm:$0xff] }
 0x2d2   :  { %2829 = vmatprep.mubr.f32.mxu0 %v6168_v3  ;;  %5547 = vmatpush1.bf16.msra.mxu0 %v5546_v10  ;;  %v2715_v10 = vrot.slane %v8126_v45, 2 }
 0x2d3   :  { %5549 = vmatprep.subr.bf16.mxu0 %v5548_v12  ;;  %v2720_v13 = vsel %vm2209_vm1, %v2717_v41, %v2719_v53  ;;  %v2722_v7 = vsel %vm2209_vm1, %v2719_v53, %v2721_v30 }
 0x2d4   :  { %v2716_v12 = vsel %vm2209_vm1, %v2713_v6, %v2715_v10  ;;  %v2718_v23 = vsel %vm2209_vm1, %v2715_v10, %v2717_v41  ;;  %v4672_v6 = vld [vmem:[%s9160_s3 + $0x478] sm:$0xff]  ;;  %v2981_v10 = vrot.slane %v8027_v2, 3 }
 0x2d5   :  { %2830 = vmatmul.mubr.f32.gmra.mrb[38].mxu0 %v2706_v34  ;;  %v2727_v34 = vrot.slane %v8182_v61, 2  ;;  %v4676_v41 = vld [vmem:[%s9160_s3 + $0x498] sm:$0xff] }
 0x2d6   :  { %2835 = vmatprep.mubr.f32.mxu0 %v6168_v3  ;;  %5551 = vmatpush1.bf16.msra.mxu0 %v5550_v16  ;;  %v2723_v16 = vrot.slane %v8162_v60, 2 }
 0x2d7   :  { %5553 = vmatprep.subr.bf16.mxu0 %v5552_v24  ;;  %v2728_v48 = vsel %vm2209_vm1, %v2725_v20, %v2727_v34 }
 0x2d8   :  { %v2724_v24 = vsel %vm2209_vm1, %v2721_v30, %v2723_v16  ;;  %v2726_v50 = vsel %vm2209_vm1, %v2723_v16, %v2725_v20  ;;  %v4675_v30 = vld [vmem:[%s9160_s3 + $0x490] sm:$0xff]  ;;  %v2983_v16 = vrot.slane %v8048_v0, 3  ;;  %v4680_v20 = vld [vmem:[%s9160_s3 + $0x4b8] sm:$0xff] }
 0x2d9   :  { %2836 = vmatmul.mubr.f32.gmra.mrb[40].mxu0 %v2708_v37  ;;  %v4664_v37 = vld [vmem:[%s9160_s3 + $0x438] sm:$0xff] }
 0x2da   :  { %2841 = vmatprep.mubr.f32.mxu0 %v6168_v3  ;;  %5555 = vmatpush1.bf16.msra.mxu0 %v5554_v52  ;;  %v4659_v52 = vld [vmem:[%s9160_s3 + $0x410] sm:$0xff]  ;;  %v5572_v18 = vpack.c.bf16 %v4664_v37, %v4662_v43 }
 0x2db   :  { %5557 = vmatprep.subr.bf16.mxu0 %v5556_v55  ;;  %v2730_v55 = vsel %vm2209_vm1, %v2727_v34, %v2729_v4  ;;  %v5570_v11 = vpack.c.bf16 %v4659_v52, %v4657_v51  ;;  %v4679_v4 = vld [vmem:[%s9160_s3 + $0x4b0] sm:$0xff]  ;;  %v2984_v51 = vsel %vm2973_vm2, %v2981_v10, %v2983_v16  ;;  %v2985_v52 = vrot.slane %v8069_v44, 3 }
 0x2dd   :  { %2842 = vmatmul.mubr.f32.gmra.mrb[42].mxu0 %v2710_v27  ;;  %v4666_v27 = vld [vmem:[%s9160_s3 + $0x448] sm:$0xff] }
 0x2de   :  { %2847 = vmatprep.mubr.f32.mxu0 %v6168_v3  ;;  %5559 = vmatpush1.bf16.msra.mxu0 %v5558_v58  ;;  %v4661_v58 = vld [vmem:[%s9160_s3 + $0x420] sm:$0xff]  ;;  %v5576_v26 = vpack.c.bf16 %v4668_v62, %v4666_v27 }
 0x2df   :  { %5561 = vmatprep.subr.bf16.mxu0 %v5560_v36  ;;  %v4663_v36 = vld [vmem:[%s9160_s3 + $0x430] sm:$0xff]  ;;  %v4685_v62 = vld [vmem:[%s9160_s3 + $0x4e0] sm:$0xff] }
 0x2e0   :  { %v5574_v25 = vpack.c.bf16 %v4663_v36, %v4661_v58  ;;  %v2987_v58 = vrot.slane %v8090_v46, 3  ;;  %v4686_v36 = vld [vmem:[%s9160_s3 + $0x4e8] sm:$0xff] }
 0x2e1   :  { %2848 = vmatmul.mubr.f32.gmra.mrb[44].mxu0 %v2712_v56  ;;  %v4670_v56 = vld [vmem:[%s9160_s3 + $0x468] sm:$0xff] }
 0x2e2   :  { %2853 = vmatprep.mubr.f32.mxu0 %v6168_v3  ;;  %5563 = vmatpush1.bf16.msra.mxu0 %v5562_v31  ;;  %v4665_v31 = vld [vmem:[%s9160_s3 + $0x440] sm:$0xff]  ;;  %v5580_v32 = vpack.c.bf16 %v4672_v6, %v4670_v56  ;;  %v2993_v6 = vrot.slane %v8135_v21, 3 }
 0x2e3   :  { %5565 = vmatprep.subr.bf16.mxu0 %v5564_v33  ;;  %v4667_v33 = vld [vmem:[%s9160_s3 + $0x450] sm:$0xff] }
 0x2e4   :  { %v5578_v63 = vpack.c.bf16 %v4667_v33, %v4665_v31  ;;  %v2989_v31 = vrot.slane %v8111_v1, 3 }
 0x2e5   :  { %2854 = vmatmul.mubr.f32.gmra.mrb[46].mxu0 %v2714_v57  ;;  %v2980_v57 = vsel %vm2973_vm2, %v2977_v17, %v2979_v15 }
 0x2e6   :  { %2859 = vmatprep.mubr.f32.mxu0 %v6168_v3  ;;  %5567 = vmatpush1.bf16.msra.mxu0 %v5566_v5  ;;  %v4669_v5 = vld [vmem:[%s9160_s3 + $0x460] sm:$0xff] }
 0x2e7   :  { %5569 = vmatprep.subr.bf16.mxu0 %v5568_v28  ;;  %v4671_v28 = vld [vmem:[%s9160_s3 + $0x470] sm:$0xff] }
 0x2e9   :  { %2860 = vmatmul.mubr.f32.gmra.mrb[48].mxu0 %v2716_v12  ;;  %v4674_v12 = vld [vmem:[%s9160_s3 + $0x488] sm:$0xff] }
 0x2ea   :  { %2865 = vmatprep.mubr.f32.mxu0 %v6168_v3  ;;  %v5584_v53 = vpack.c.bf16 %v4676_v41, %v4674_v12  ;;  %v3001_v41 = vrot.slane %v8171_v40, 3 }
 0x2ed   :  { %2866 = vmatmul.mubr.f32.gmra.mrb[50].mxu0 %v2718_v23  ;;  %v5582_v23 = vpack.c.bf16 %v4671_v28, %v4669_v5  ;;  %v2997_v28 = vrot.slane %v8153_v35, 3 }
 0x2ee   :  { %2871 = vmatprep.mubr.f32.mxu0 %v6168_v3 }
 0x2f1   :  { %2872 = vmatmul.mubr.f32.gmra.mrb[52].mxu0 %v2720_v13  ;;  %v4673_v13 = vld [vmem:[%s9160_s3 + $0x480] sm:$0xff] }
 0x2f2   :  { %2877 = vmatprep.mubr.f32.mxu0 %v6168_v3 }
 0x2f5   :  { %2878 = vmatmul.mubr.f32.gmra.mrb[54].mxu0 %v2722_v7  ;;  %v2982_v7 = vsel %vm2973_vm2, %v2979_v15, %v2981_v10  ;;  %v2991_v15 = vrot.slane %v8126_v45, 3  ;;  %v2999_v10 = vrot.slane %v8162_v60, 3 }
 0x2f6   :  { %2883 = vmatprep.mubr.f32.mxu0 %v6168_v3 }
 0x2f7   :  { %v2992_v56 = vsel %vm2973_vm2, %v2989_v31, %v2991_v15  ;;  %v3000_v12 = vsel %vm2973_vm2, %v2997_v28, %v2999_v10 }
 0x2f9   :  { %2884 = vmatmul.mubr.f32.gmra.mrb[56].mxu0 %v2724_v24  ;;  %v4678_v24 = vld [vmem:[%s9160_s3 + $0x4a8] sm:$0xff] }
 0x2fa   :  { %2889 = vmatprep.mubr.f32.mxu0 %v6168_v3  ;;  %v5588_v34 = vpack.c.bf16 %v4680_v20, %v4678_v24  ;;  %v3250_v24 = vrot.slane %v7955_v39, 4 }
 0x2fd   :  { %2890 = vmatmul.mubr.f32.gmra.mrb[58].mxu0 %v2726_v50  ;;  %v5586_v50 = vpack.c.bf16 %v4675_v30, %v4673_v13  ;;  %v3005_v30 = vrot.slane %v6168_v3, 3 }
 0x2fe   :  { %2895 = vmatprep.mubr.f32.mxu0 %v6168_v3 }
 0x301   :  { %2896 = vmatmul.mubr.f32.gmra.mrb[60].mxu0 %v2728_v48  ;;  %v4677_v48 = vld [vmem:[%s9160_s3 + $0x4a0] sm:$0xff] }
 0x302   :  { %2901 = vmatprep.mubr.f32.mxu0 %v6168_v3  ;;  %v5590_v43 = vpack.c.bf16 %v4679_v4, %v4677_v48  ;;  %v3255_v48 = vrot.slane %v8006_v14, 4  ;;  %v3257_v4 = vrot.slane %v8027_v2, 4  ;;  %v3261_v14 = vrot.slane %v8069_v44, 4 }
 0x303   :  { %v3263_v2 = vrot.slane %v8090_v46, 4  ;;  %v3267_v44 = vrot.slane %v8126_v45, 4  ;;  %v3269_v46 = vrot.slane %v8135_v21, 4  ;;  %v3273_v45 = vrot.slane %v8153_v35, 4 }
 0x304   :  { %v3258_v39 = vsel %vm3249_vm3, %v3255_v48, %v3257_v4  ;;  %v3275_v21 = vrot.slane %v8162_v60, 4  ;;  %v3279_v35 = vrot.slane %v8182_v61, 4  ;;  %v3281_v60 = vrot.slane %v6168_v3, 4 }
 0x305   :  { %2902 = vmatmul.mubr.f32.gmra.mrb[62].mxu0 %v2730_v55  ;;  %v4682_v55 = vld [vmem:[%s9160_s3 + $0x4c8] sm:$0xff] }
 0x306   :  { %3087 = vmatprep.mubr.f32.mxu0 %v6168_v3  ;;  %v5592_v37 = vpack.c.bf16 %v4684_v19, %v4682_v55  ;;  %v3264_v55 = vsel %vm3249_vm3, %v3261_v14, %v3263_v2 }
 0x309   :  { %3088 = vmatmul.mubr.f32.vlgmr.msra.gmra.mrb[32].mxu0 %v2976_v42  ;;  %v4688_v42 = vld [vmem:[%s9160_s3 + $0x4f8] sm:$0xff] }
 0x30a   :  { %5571 = vmatpush1.bf16.msra.mxu0 %v5570_v11  ;;  %3093 = vmatprep.mubr.f32.mxu0 %v6168_v3  ;;  %v4683_v11 = vld [vmem:[%s9160_s3 + $0x4d0] sm:$0xff]  ;;  %v5596_v27 = vpack.c.bf16 %v4688_v42, %v4686_v36  ;;  %v3282_v42 = vsel %vm3249_vm3, %v3279_v35, %v3281_v60 }
 0x30b   :  { %5573 = vmatprep.subr.bf16.mxu0 %v5572_v18  ;;  %v2986_v18 = vsel %vm2973_vm2, %v2983_v16, %v2985_v52  ;;  %v5594_v17 = vpack.c.bf16 %v4683_v11, %v4681_v9  ;;  %v3251_v16 = vrot.slane %v7965_v54, 4 }
 0x30d   :  { %3094 = vmatmul.mubr.f32.gmra.mrb[34].mxu0 %v2978_v29  ;;  %v2990_v29 = vsel %vm2973_vm2, %v2987_v58, %v2989_v31  ;;  %v3252_v20 = vsel %vm3249_vm3, %v3250_v24, %v3251_v16  ;;  %v3612_v31 = vld [vmem:[%s9162_s5 + $0x20] sm:$0xff] }
 0x30e   :  { %3099 = vmatprep.mubr.f32.mxu0 %v6168_v3  ;;  %5575 = vmatpush1.bf16.msra.mxu0 %v5574_v25  ;;  %v4687_v25 = vld [vmem:[%s9160_s3 + $0x4f0] sm:$0xff] }
 0x30f   :  { %5577 = vmatprep.subr.bf16.mxu0 %v5576_v26  ;;  %v2988_v26 = vsel %vm2973_vm2, %v2985_v52, %v2987_v58  ;;  %v5598_v33 = vpack.c.bf16 %v4687_v25, %v4685_v62  ;;  %v3610_v62 = vld [vmem:[%s9162_s5 + $0x10] sm:$0xff]  ;;  %v3611_v25 = vld [vmem:[%s9162_s5 + $0x18] sm:$0xff] }
 0x311   :  { %3100 = vmatmul.mubr.f32.gmra.mrb[36].mxu0 %v2980_v57 }
 0x312   :  { %3105 = vmatprep.mubr.f32.mxu0 %v6168_v3  ;;  %5579 = vmatpush1.bf16.msra.mxu0 %v5578_v63  ;;  %v2994_v63 = vsel %vm2973_vm2, %v2991_v15, %v2993_v6  ;;  %v3614_v15 = vld [vmem:[%s9162_s5 + $0x30] sm:$0xff] }
 0x313   :  { %5581 = vmatprep.subr.bf16.mxu0 %v5580_v32  ;;  %v2995_v32 = vrot.slane %v8144_v47, 3 }
 0x315   :  { %3106 = vmatmul.mubr.f32.gmra.mrb[38].mxu0 %v2982_v7  ;;  %v2996_v5 = vsel %vm2973_vm2, %v2993_v6, %v2995_v32  ;;  %v2998_v57 = vsel %vm2973_vm2, %v2995_v32, %v2997_v28  ;;  %v3617_v32 = vld [vmem:[%s9162_s5 + $0x48] sm:$0xff]  ;;  %v3618_v28 = vld [vmem:[%s9162_s5 + $0x50] sm:$0xff] }
 0x316   :  { %3111 = vmatprep.mubr.f32.mxu0 %v6168_v3  ;;  %5583 = vmatpush1.bf16.msra.mxu0 %v5582_v23  ;;  %v3002_v23 = vsel %vm2973_vm2, %v2999_v10, %v3001_v41 }
 0x317   :  { %5585 = vmatprep.subr.bf16.mxu0 %v5584_v53  ;;  %v3003_v53 = vrot.slane %v8182_v61, 3  ;;  %v3608_v61 = vld [vmem:[%s9162_s5] sm:$0xff] }
 0x319   :  { %3112 = vmatmul.mubr.f32.gmra.mrb[40].mxu0 %v2984_v51  ;;  %v3004_v13 = vsel %vm2973_vm2, %v3001_v41, %v3003_v53  ;;  %v3006_v7 = vsel %vm2973_vm2, %v3003_v53, %v3005_v30  ;;  %v3621_v41 = vld [vmem:[%s9162_s5 + $0x68] sm:$0xff]  ;;  %v3622_v53 = vld [vmem:[%s9162_s5 + $0x70] sm:$0xff] }
 0x31a   :  { %3117 = vmatprep.mubr.f32.mxu0 %v6168_v3  ;;  %5587 = vmatpush1.bf16.msra.mxu0 %v5586_v50  ;;  %v3253_v50 = vrot.slane %v7985_v49, 4  ;;  %v3259_v49 = vrot.slane %v8048_v0, 4  ;;  %v3265_v0 = vrot.slane %v8111_v1, 4  ;;  %v3271_v1 = vrot.slane %v8144_v47, 4 }
 0x31b   :  { %5589 = vmatprep.subr.bf16.mxu0 %v5588_v34  ;;  %v3277_v47 = vrot.slane %v8171_v40, 4  ;;  %v6169_v40 = vmov 0.0|0.0  }
 0x31c   :  { %v3254_v34 = vsel %vm3249_vm3, %v3251_v16, %v3253_v50  ;;  %v3256_v54 = vsel %vm3249_vm3, %v3253_v50, %v3255_v48  ;;  %v3260_v51 = vsel %vm3249_vm3, %v3257_v4, %v3259_v49  ;;  %v3262_v52 = vsel %vm3249_vm3, %v3259_v49, %v3261_v14  ;;  %5600 = vmatprep.subr.bf16.mxu1 %v6169_v40 }
 0x31d   :  { %3118 = vmatmul.mubr.f32.gmra.mrb[42].mxu0 %v2986_v18  ;;  %v3266_v19 = vsel %vm3249_vm3, %v3263_v2, %v3265_v0  ;;  %v3272_v9 = vsel %vm3249_vm3, %v3269_v46, %v3271_v1  ;;  %v3274_v11 = vsel %vm3249_vm3, %v3271_v1, %v3273_v45  ;;  %v3276_v18 = vsel %vm3249_vm3, %v3273_v45, %v3275_v21 }
 0x31e   :  { %3123 = vmatprep.mubr.f32.mxu0 %v6168_v3  ;;  %5591 = vmatpush1.bf16.msra.mxu0 %v5590_v43  ;;  %v3268_v43 = vsel %vm3249_vm3, %v3265_v0, %v3267_v44  ;;  %v3278_v58 = vsel %vm3249_vm3, %v3275_v21, %v3277_v47  ;;  %v3280_v36 = vsel %vm3249_vm3, %v3277_v47, %v3279_v35 }
 0x31f   :  { %5593 = vmatprep.subr.bf16.mxu0 %v5592_v37  ;;  %v3270_v37 = vsel %vm3249_vm3, %v3267_v44, %v3269_v46 }
 0x321   :  { %3124 = vmatmul.mubr.f32.gmra.mrb[44].mxu0 %v2988_v26  ;;  %v5604_v26 = vpack.c.bf16 %v3611_v25, %v3610_v62 }
 0x322   :  { %3129 = vmatprep.mubr.f32.mxu0 %v6168_v3  ;;  %5595 = vmatpush1.bf16.msra.mxu0 %v5594_v17  ;;  %v3609_v17 = vld [vmem:[%s9162_s5 + $0x8] sm:$0xff] }
 0x323   :  { %5597 = vmatprep.subr.bf16.mxu0 %v5596_v27  ;;  %v5601_v27 = vpack.c.bf16 %v3609_v17, %v3608_v61 }
 0x325   :  { %3130 = vmatmul.mubr.f32.gmra.mrb[46].mxu0 %v2990_v29  ;;  %5602 = vmatpush3.bf16.msra.mxu1 %v5601_v27 }
 0x326   :  { %3135 = vmatprep.mubr.f32.mxu0 %v6168_v3  ;;  %5599 = vmatpush1.bf16.msra.mxu0 %v5598_v33  ;;  %v3613_v33 = vld [vmem:[%s9162_s5 + $0x28] sm:$0xff] }
 0x327   :  { %5603 = vmatprep.subr.bf16.mxu1 %v6169_v40  ;;  %v5607_v29 = vpack.c.bf16 %v3613_v33, %v3612_v31 }
 0x329   :  { %3136 = vmatmul.mubr.f32.gmra.mrb[48].mxu0 %v2992_v56  ;;  %5605 = vmatpush3.bf16.msra.mxu1 %v5604_v26  ;;  %v3615_v56 = vld [vmem:[%s9162_s5 + $0x38] sm:$0xff] }
 0x32a   :  { %3141 = vmatprep.mubr.f32.mxu0 %v6168_v3  ;;  %5606 = vmatprep.subr.bf16.mxu1 %v6169_v40  ;;  %v5610_v6 = vpack.c.bf16 %v3615_v56, %v3614_v15 }
 0x32d   :  { %3142 = vmatmul.mubr.f32.gmra.mrb[50].mxu0 %v2994_v63  ;;  %5608 = vmatpush3.bf16.msra.mxu1 %v5607_v29  ;;  %v3616_v63 = vld [vmem:[%s9162_s5 + $0x40] sm:$0xff] }
 0x32e   :  { %3147 = vmatprep.mubr.f32.mxu0 %v6168_v3  ;;  %5609 = vmatprep.subr.bf16.mxu1 %v6169_v40 }
 0x331   :  { %3148 = vmatmul.mubr.f32.gmra.mrb[52].mxu0 %v2996_v5  ;;  %5611 = vmatpush3.bf16.msra.mxu1 %v5610_v6  ;;  %v5613_v5 = vpack.c.bf16 %v3617_v32, %v3616_v63 }
 0x332   :  { %3153 = vmatprep.mubr.f32.mxu0 %v6168_v3  ;;  %5612 = vmatprep.subr.bf16.mxu1 %v6169_v40 }
 0x335   :  { %3154 = vmatmul.mubr.f32.gmra.mrb[54].mxu0 %v2998_v57  ;;  %5614 = vmatpush3.bf16.msra.mxu1 %v5613_v5  ;;  %v3619_v57 = vld [vmem:[%s9162_s5 + $0x58] sm:$0xff] }
 0x336   :  { %3159 = vmatprep.mubr.f32.mxu0 %v6168_v3  ;;  %5615 = vmatprep.subr.bf16.mxu1 %v6169_v40  ;;  %v5616_v10 = vpack.c.bf16 %v3619_v57, %v3618_v28 }
 0x339   :  { %3160 = vmatmul.mubr.f32.gmra.mrb[56].mxu0 %v3000_v12  ;;  %5617 = vmatpush3.bf16.msra.mxu1 %v5616_v10  ;;  %v3620_v12 = vld [vmem:[%s9162_s5 + $0x60] sm:$0xff] }
 0x33a   :  { %3165 = vmatprep.mubr.f32.mxu0 %v6168_v3  ;;  %5618 = vmatprep.subr.bf16.mxu1 %v6169_v40 }
 0x33d   :  { %3166 = vmatmul.mubr.f32.gmra.mrb[58].mxu0 %v3002_v23  ;;  %v5619_v23 = vpack.c.bf16 %v3621_v41, %v3620_v12 }
 0x33e   :  { %3171 = vmatprep.mubr.f32.mxu0 %v6168_v3 }
 0x33f   :  { %5620 = vmatpush3.bf16.msra.mxu1 %v5619_v23 }
 0x340   :  { %5621 = vmatprep.subr.bf16.mxu1 %v6169_v40 }
 0x341   :  { %3172 = vmatmul.mubr.f32.gmra.mrb[60].mxu0 %v3004_v13  ;;  %v3623_v13 = vld [vmem:[%s9162_s5 + $0x78] sm:$0xff] }
 0x342   :  { %3177 = vmatprep.mubr.f32.mxu0 %v6168_v3  ;;  %v5622_v30 = vpack.c.bf16 %v3623_v13, %v3622_v53 }
 0x344   :  { %5623 = vmatpush3.bf16.msra.mxu1 %v5622_v30 }
 0x345   :  { %3178 = vmatmul.mubr.f32.gmra.mrb[62].mxu0 %v3006_v7  ;;  %5624 = vmatprep.subr.bf16.mxu1 %v6169_v40  ;;  %v3492_v7 = vld [vmem:[%s9163_s4] sm:$0x3] }
 0x346   :  { %3363 = vmatprep.mubr.f32.mxu0 %v6168_v3  ;;  %v8716_v16 = vrot.slane %v3492_v7, %v2137_v59  ;;  %v8720_v24 = vrot.slane %v3492_v7, %v2141_v22 }
 0x349   :  { %3364 = vmatmul.mubr.f32.vlgmr.msra.gmra.mrb[32].mxu0 %v3252_v20 }
 0x34a   :  { %3369 = vmatprep.mubr.f32.mxu0 %v6168_v3 }
 0x34d   :  { %3370 = vmatmul.mubr.f32.gmra.mrb[34].mxu0 %v3254_v34 }
 0x34e   :  { %3375 = vmatprep.mubr.f32.mxu0 %v6168_v3 }
 0x351   :  { %3376 = vmatmul.mubr.f32.gmra.mrb[36].mxu0 %v3256_v54 }
 0x352   :  { %3381 = vmatprep.mubr.f32.mxu0 %v6168_v3 }
 0x355   :  { %3382 = vmatmul.mubr.f32.gmra.mrb[38].mxu0 %v3258_v39 }
 0x356   :  { %3387 = vmatprep.mubr.f32.mxu0 %v6168_v3 }
 0x359   :  { %3388 = vmatmul.mubr.f32.gmra.mrb[40].mxu0 %v3260_v51 }
 0x35a   :  { %3393 = vmatprep.mubr.f32.mxu0 %v6168_v3 }
 0x35d   :  { %3394 = vmatmul.mubr.f32.gmra.mrb[42].mxu0 %v3262_v52 }
 0x35e   :  { %3399 = vmatprep.mubr.f32.mxu0 %v6168_v3 }
 0x361   :  { %3400 = vmatmul.mubr.f32.gmra.mrb[44].mxu0 %v3264_v55 }
 0x362   :  { %3405 = vmatprep.mubr.f32.mxu0 %v6168_v3 }
 0x365   :  { %3406 = vmatmul.mubr.f32.gmra.mrb[46].mxu0 %v3266_v19 }
 0x366   :  { %3411 = vmatprep.mubr.f32.mxu0 %v6168_v3 }
 0x369   :  { %3412 = vmatmul.mubr.f32.gmra.mrb[48].mxu0 %v3268_v43 }
 0x36a   :  { %3417 = vmatprep.mubr.f32.mxu0 %v6168_v3 }
 0x36d   :  { %3418 = vmatmul.mubr.f32.gmra.mrb[50].mxu0 %v3270_v37 }
 0x36e   :  { %3423 = vmatprep.mubr.f32.mxu0 %v6168_v3 }
 0x371   :  { %3424 = vmatmul.mubr.f32.gmra.mrb[52].mxu0 %v3272_v9 }
 0x372   :  { %3429 = vmatprep.mubr.f32.mxu0 %v6168_v3 }
 0x375   :  { %3430 = vmatmul.mubr.f32.gmra.mrb[54].mxu0 %v3274_v11 }
 0x376   :  { %3435 = vmatprep.mubr.f32.mxu0 %v6168_v3 }
 0x379   :  { %3436 = vmatmul.mubr.f32.gmra.mrb[56].mxu0 %v3276_v18 }
 0x37a   :  { %3441 = vmatprep.mubr.f32.mxu0 %v6168_v3 }
 0x37d   :  { %3442 = vmatmul.mubr.f32.gmra.mrb[58].mxu0 %v3278_v58 }
 0x37e   :  { %3447 = vmatprep.mubr.f32.mxu0 %v6168_v3 }
 0x381   :  { %3448 = vmatmul.mubr.f32.gmra.mrb[60].mxu0 %v3280_v36 }
 0x382   :  { %3453 = vmatprep.mubr.f32.mxu0 %v6168_v3 }
 0x385   :  { %3454 = vmatmul.mubr.f32.gmra.mrb[62].mxu0 %v3282_v42 }
 0x41c   :  { %v3365_v20 = vpop.f32.mrb[32].mxu0 }
 0x41d   :  { %v3504_v50 = vadd.f32 %v8716_v16, %v3365_v20  ;;  %v3367_v34 = vpop.f32.mrb[33].mxu0 }
 0x41e   :  { %v3505_v48 = vadd.f32 %v8720_v24, %v3367_v34 }
 0x420   :  { %v3536_v54 = vmax.f32 %v3504_v50, %v3505_v48  ;;  %v3371_v4 = vpop.f32.mrb[34].mxu0 }
 0x421   :  { %v3506_v39 = vadd.f32 %v8716_v16, %v3371_v4  ;;  %v3373_v49 = vpop.f32.mrb[35].mxu0 }
 0x422   :  { %v3507_v51 = vadd.f32 %v8720_v24, %v3373_v49  ;;  %v3552_v14 = vmax.f32 %v3536_v54, 0.0 }
 0x424   :  { %v3537_v59 = vmax.f32 %v3506_v39, %v3507_v51  ;;  %v3377_v52 = vpop.f32.mrb[36].mxu0  ;;  %v3584_v55 = vrot.slane %v3552_v14, 1 }
 0x425   :  { %v3508_v38 = vadd.f32 %v8716_v16, %v3377_v52  ;;  %v3379_v22 = vpop.f32.mrb[37].mxu0 }
 0x426   :  { %v3509_v2 = vadd.f32 %v8720_v24, %v3379_v22  ;;  %v3600_v37 = vmax.f32 %v3552_v14, %v3584_v55  ;;  %v3553_v1 = vmax.f32 %v3537_v59, 0.0 }
 0x428   :  { %v3383_v0 = vpop.f32.mrb[38].mxu0  ;;  %v3538_v19 = vmax.f32 %v3508_v38, %v3509_v2  ;;  %v3742_v36 = vrot.slane %v3600_v37, 2  ;;  %v4042_v60 = vrot.slane %v3553_v1, 1  ;;  %v3845_v61 = vrot.slane %v3600_v37, 4 }
 0x429   :  { %v3510_v44 = vadd.f32 %v8716_v16, %v3383_v0  ;;  %v3385_v43 = vpop.f32.mrb[39].mxu0  ;;  %v3948_v17 = vrot.slane %v3600_v37, 6 }
 0x42a   :  { %v3511_v46 = vadd.f32 %v8720_v24, %v3385_v43  ;;  %v3554_v9 = vmax.f32 %v3538_v19, 0.0  ;;  %v4058_v5 = vmax.f32 %v3553_v1, %v4042_v60 }
 0x42c   :  { %v3539_v45 = vmax.f32 %v3510_v44, %v3511_v46  ;;  %v3389_v11 = vpop.f32.mrb[40].mxu0  ;;  %v3585_v21 = vrot.slane %v3554_v9, 1 }
 0x42d   :  { %v3512_v18 = vadd.f32 %v8716_v16, %v3389_v11  ;;  %v3391_v47 = vpop.f32.mrb[41].mxu0 }
 0x42e   :  { %v3555_v58 = vmax.f32 %v3539_v45, 0.0  ;;  %v3513_v35 = vadd.f32 %v8720_v24, %v3391_v47  ;;  %v3601_v42 = vmax.f32 %v3554_v9, %v3585_v21 }
 0x430   :  { %v4043_v27 = vrot.slane %v3555_v58, 1  ;;  %v3540_v62 = vmax.f32 %v3512_v18, %v3513_v35  ;;  %v3395_v25 = vpop.f32.mrb[42].mxu0  ;;  %v3632_v26 = vrot.slane %v3601_v42, 7  ;;  %v3743_v31 = vrot.slane %v3601_v42, 1 }
 0x431   :  { %v3846_v33 = vrot.slane %v3601_v42, 3  ;;  %v3949_v29 = vrot.slane %v3601_v42, 5  ;;  %v3397_v15 = vpop.f32.mrb[43].mxu0  ;;  %v3514_v63 = vadd.f32 %v8716_v16, %v3395_v25 }
 0x432   :  { %v4059_v56 = vmax.f32 %v3555_v58, %v4043_v27  ;;  %v3556_v6 = vmax.f32 %v3540_v62, 0.0  ;;  %v3515_v32 = vadd.f32 %v8720_v24, %v3397_v15  ;;  %v3744_v28 = vsel %vm3633_vm5, %v3743_v31, %v3742_v36 }
 0x433   :  { %v3634_v57 = vsel %vm3633_vm5, %v3632_v26, %v3600_v37  ;;  %v3847_v10 = vsel %vm3633_vm5, %v3846_v33, %v3845_v61  ;;  %v3950_v13 = vsel %vm3633_vm5, %v3949_v29, %v3948_v17 }
 0x434   :  { %v4091_v12 = vrot.slane %v4059_v56, 7  ;;  %v3586_v41 = vrot.slane %v3556_v6, 1  ;;  %v3541_v23 = vmax.f32 %v3514_v63, %v3515_v32  ;;  %v3401_v53 = vpop.f32.mrb[44].mxu0 }
 0x435   :  { %v3516_v30 = vadd.f32 %v8716_v16, %v3401_v53  ;;  %v3403_v7 = vpop.f32.mrb[45].mxu0 }
 0x436   :  { %v4092_v20 = vsel %vm3633_vm5, %v4091_v12, %v4058_v5  ;;  %v3602_v50 = vmax.f32 %v3556_v6, %v3586_v41  ;;  %v3557_v34 = vmax.f32 %v3541_v23, 0.0  ;;  %v3517_v48 = vadd.f32 %v8720_v24, %v3403_v7 }
 0x438   :  { %v3635_v54 = vrot.slane %v3602_v50, 6  ;;  %v3745_v4 = vsel %vm3636_vm6, %v3602_v50, %v3744_v28  ;;  %v3848_v39 = vrot.slane %v3602_v50, 2  ;;  %v3951_v49 = vrot.slane %v3602_v50, 4  ;;  %v3407_v51 = vpop.f32.mrb[46].mxu0 }
 0x439   :  { %v4044_v14 = vrot.slane %v3557_v34, 1  ;;  %v3542_v59 = vmax.f32 %v3516_v30, %v3517_v48  ;;  %v3518_v52 = vadd.f32 %v8716_v16, %v3407_v51  ;;  %v3409_v38 = vpop.f32.mrb[47].mxu0 }
 0x43a   :  { %v3519_v22 = vadd.f32 %v8720_v24, %v3409_v38  ;;  %v3637_v2 = vsel %vm3636_vm6, %v3635_v54, %v3634_v57  ;;  %v3849_v55 = vsel %vm3636_vm6, %v3848_v39, %v3847_v10  ;;  %v3952_v44 = vsel %vm3636_vm6, %v3951_v49, %v3950_v13 }
 0x43b   :  { %v4060_v0 = vmax.f32 %v3557_v34, %v4044_v14  ;;  %v3558_v19 = vmax.f32 %v3542_v59, 0.0 }
 0x43c   :  { %v3543_v43 = vmax.f32 %v3518_v52, %v3519_v22  ;;  %v3413_v46 = vpop.f32.mrb[48].mxu0 }
 0x43d   :  { %v4093_v37 = vrot.slane %v4060_v0, 6  ;;  %v3587_v1 = vrot.slane %v3558_v19, 1  ;;  %v3520_v9 = vadd.f32 %v8716_v16, %v3413_v46  ;;  %v3415_v45 = vpop.f32.mrb[49].mxu0 }
 0x43e   :  { %v3559_v11 = vmax.f32 %v3543_v43, 0.0  ;;  %v3521_v21 = vadd.f32 %v8720_v24, %v3415_v45 }
 0x43f   :  { %v4094_v18 = vsel %vm3636_vm6, %v4093_v37, %v4092_v20  ;;  %v3603_v47 = vmax.f32 %v3558_v19, %v3587_v1 }
 0x440   :  { %v4045_v58 = vrot.slane %v3559_v11, 1  ;;  %v3544_v35 = vmax.f32 %v3520_v9, %v3521_v21  ;;  %v3419_v36 = vpop.f32.mrb[50].mxu0 }
 0x441   :  { %v3638_v60 = vrot.slane %v3603_v47, 5  ;;  %v3746_v42 = vrot.slane %v3603_v47, 7  ;;  %v3850_v61 = vrot.slane %v3603_v47, 1  ;;  %v3953_v17 = vrot.slane %v3603_v47, 3  ;;  %v3421_v27 = vpop.f32.mrb[51].mxu0 }
 0x442   :  { %v4061_v62 = vmax.f32 %v3559_v11, %v4045_v58  ;;  %v3560_v25 = vmax.f32 %v3544_v35, 0.0  ;;  %v3522_v26 = vadd.f32 %v8716_v16, %v3419_v36  ;;  %v3523_v31 = vadd.f32 %v8720_v24, %v3421_v27 }
 0x443   :  { %v3640_v33 = vsel %vm3639_vm7, %v3638_v60, %v3637_v2  ;;  %v3747_v29 = vsel %vm3639_vm7, %v3746_v42, %v3745_v4  ;;  %v3851_v15 = vsel %vm3639_vm7, %v3850_v61, %v3849_v55  ;;  %v3954_v56 = vsel %vm3639_vm7, %v3953_v17, %v3952_v44 }
 0x444   :  { %v4095_v6 = vrot.slane %v4061_v62, 5  ;;  %v3588_v63 = vrot.slane %v3560_v25, 1  ;;  %v3545_v32 = vmax.f32 %v3522_v26, %v3523_v31  ;;  %v3425_v5 = vpop.f32.mrb[52].mxu0 }
 0x445   :  { %v3524_v28 = vadd.f32 %v8716_v16, %v3425_v5  ;;  %v3427_v57 = vpop.f32.mrb[53].mxu0 }
 0x446   :  { %v4096_v10 = vsel %vm3639_vm7, %v4095_v6, %v4094_v18  ;;  %v3604_v12 = vmax.f32 %v3560_v25, %v3588_v63  ;;  %v3561_v41 = vmax.f32 %v3545_v32, 0.0  ;;  %v3525_v23 = vadd.f32 %v8720_v24, %v3427_v57 }
 0x448   :  { %v3641_v53 = vrot.slane %v3604_v12, 4  ;;  %v3748_v13 = vrot.slane %v3604_v12, 6  ;;  %v3955_v30 = vrot.slane %v3604_v12, 2  ;;  %v4046_v7 = vrot.slane %v3561_v41, 1  ;;  %v3431_v20 = vpop.f32.mrb[54].mxu0 }
 0x449   :  { %v3546_v50 = vmax.f32 %v3524_v28, %v3525_v23  ;;  %v3526_v34 = vadd.f32 %v8716_v16, %v3431_v20  ;;  %v3433_v48 = vpop.f32.mrb[55].mxu0  ;;  %v3852_v54 = vsel %vm3642_vm8, %v3604_v12, %v3851_v15 }
 0x44a   :  { %v4062_v4 = vmax.f32 %v3561_v41, %v4046_v7  ;;  %v3527_v39 = vadd.f32 %v8720_v24, %v3433_v48  ;;  %v3643_v49 = vsel %vm3642_vm8, %v3641_v53, %v3640_v33  ;;  %v3749_v51 = vsel %vm3642_vm8, %v3748_v13, %v3747_v29 }
 0x44b   :  { %v3562_v14 = vmax.f32 %v3546_v50, 0.0  ;;  %v3956_v59 = vsel %vm3642_vm8, %v3955_v30, %v3954_v56 }
 0x44c   :  { %v4097_v52 = vrot.slane %v4062_v4, 4  ;;  %v3547_v38 = vmax.f32 %v3526_v34, %v3527_v39  ;;  %v3437_v22 = vpop.f32.mrb[56].mxu0  ;;  %v4691_v39 = vld [vmem:[%s9162_s5 + $0x88] sm:$0xff] }
 0x44d   :  { %v3589_v2 = vrot.slane %v3562_v14, 1  ;;  %v3528_v55 = vadd.f32 %v8716_v16, %v3437_v22  ;;  %v3439_v0 = vpop.f32.mrb[57].mxu0 }
 0x44e   :  { %v4098_v19 = vsel %vm3642_vm8, %v4097_v52, %v4096_v10  ;;  %v3563_v44 = vmax.f32 %v3547_v38, 0.0  ;;  %v3529_v43 = vadd.f32 %v8720_v24, %v3439_v0 }
 0x44f   :  { %v3605_v46 = vmax.f32 %v3562_v14, %v3589_v2  ;;  %v4692_v2 = vld [vmem:[%s9162_s5 + $0x90] sm:$0xff] }
 0x450   :  { %v4047_v37 = vrot.slane %v3563_v44, 1  ;;  %v3548_v1 = vmax.f32 %v3528_v55, %v3529_v43  ;;  %v3443_v9 = vpop.f32.mrb[58].mxu0  ;;  %v4693_v55 = vld [vmem:[%s9162_s5 + $0x98] sm:$0xff] }
 0x451   :  { %v3644_v45 = vrot.slane %v3605_v46, 3  ;;  %v3530_v11 = vadd.f32 %v8716_v16, %v3443_v9  ;;  %v3445_v21 = vpop.f32.mrb[59].mxu0  ;;  %v3750_v18 = vrot.slane %v3605_v46, 5  ;;  %v3853_v47 = vrot.slane %v3605_v46, 7 }
 0x452   :  { %v4063_v58 = vmax.f32 %v3563_v44, %v4047_v37  ;;  %v3564_v35 = vmax.f32 %v3548_v1, 0.0  ;;  %v3531_v36 = vadd.f32 %v8720_v24, %v3445_v21  ;;  %v3957_v60 = vrot.slane %v3605_v46, 1 }
 0x453   :  { %v3646_v42 = vsel %vm3645_vm9, %v3644_v45, %v3643_v49  ;;  %v3751_v61 = vsel %vm3645_vm9, %v3750_v18, %v3749_v51  ;;  %v3854_v17 = vsel %vm3645_vm9, %v3853_v47, %v3852_v54  ;;  %v5628_v9 = vpack.c.bf16 %v4693_v55, %v4692_v2  ;;  %v4694_v45 = vld [vmem:[%s9162_s5 + $0xa0] sm:$0xff]  ;;  %v4696_v47 = vld [vmem:[%s9162_s5 + $0xb0] sm:$0xff] }
 0x454   :  { %v4099_v27 = vrot.slane %v4063_v58, 3  ;;  %v3590_v62 = vrot.slane %v3564_v35, 1  ;;  %v3549_v25 = vmax.f32 %v3530_v11, %v3531_v36  ;;  %v3449_v26 = vpop.f32.mrb[60].mxu0  ;;  %v3958_v31 = vsel %vm3645_vm9, %v3957_v60, %v3956_v59  ;;  %v4695_v11 = vld [vmem:[%s9162_s5 + $0xa8] sm:$0xff]  ;;  %v4697_v58 = vld [vmem:[%s9162_s5 + $0xb8] sm:$0xff]  ;;  %v4698_v36 = vld [vmem:[%s9162_s5 + $0xc0] sm:$0xff] }
 0x455   :  { %v3532_v33 = vadd.f32 %v8716_v16, %v3449_v26  ;;  %v3451_v29 = vpop.f32.mrb[61].mxu0  ;;  %v5631_v18 = vpack.c.bf16 %v4695_v11, %v4694_v45  ;;  %v4699_v60 = vld [vmem:[%s9162_s5 + $0xc8] sm:$0xff]  ;;  %v4728_v55 = vld [vmem:[%s9162_s5 + $0x1b0] sm:$0xff]  ;;  %v4734_v11 = vld [vmem:[%s9162_s5 + $0x1e0] sm:$0xff] }
 0x456   :  { %v3606_v15 = vmax.f32 %v3564_v35, %v3590_v62  ;;  %v3565_v56 = vmax.f32 %v3549_v25, 0.0  ;;  %v3533_v6 = vadd.f32 %v8720_v24, %v3451_v29  ;;  %v4100_v63 = vsel %vm3645_vm9, %v4099_v27, %v4098_v19  ;;  %v4702_v62 = vld [vmem:[%s9162_s5 + $0xe0] sm:$0xff]  ;;  %v4703_v25 = vld [vmem:[%s9162_s5 + $0xe8] sm:$0xff] }
 0x457   :  { %v5634_v35 = vpack.c.bf16 %v4697_v58, %v4696_v47  ;;  %v5643_v26 = vpack.c.bf16 %v4703_v25, %v4702_v62  ;;  %v4736_v58 = vld [vmem:[%s9162_s5 + $0x1f0] sm:$0xff]  ;;  %v4742_v25 = vld [vmem:[%s9162_s5 + $0x220] sm:$0xff] }
 0x458   :  { %v4048_v32 = vrot.slane %v3565_v56, 1  ;;  %v3550_v5 = vmax.f32 %v3532_v33, %v3533_v6  ;;  %v3455_v28 = vpop.f32.mrb[62].mxu0  ;;  %v3647_v57 = vrot.slane %v3606_v15, 2  ;;  %v3752_v10 = vrot.slane %v3606_v15, 4  ;;  %v4705_v33 = vld [vmem:[%s9162_s5 + $0xf8] sm:$0xff] }
 0x459   :  { %v3534_v12 = vadd.f32 %v8716_v16, %v3455_v28  ;;  %v3457_v41 = vpop.f32.mrb[63].mxu0  ;;  %v3855_v23 = vrot.slane %v3606_v15, 6  ;;  %v3959_v53 = vsel %vm3648_vm10, %v3606_v15, %v3958_v31  ;;  %v4690_v16 = vld [vmem:[%s9162_s5 + $0x80] sm:$0xff]  ;;  %v4704_v31 = vld [vmem:[%s9162_s5 + $0xf0] sm:$0xff] }
 0x45a   :  { %v4064_v13 = vmax.f32 %v3565_v56, %v4048_v32  ;;  %v3566_v30 = vmax.f32 %v3550_v5, 0.0  ;;  %v3535_v7 = vadd.f32 %v8720_v24, %v3457_v41  ;;  %v3649_v20 = vsel %vm3648_vm10, %v3647_v57, %v3646_v42  ;;  %v4706_v15 = vld [vmem:[%s9162_s5 + $0x100] sm:$0xff]  ;;  %v4707_v56 = vld [vmem:[%s9162_s5 + $0x108] sm:$0xff]  ;;  %v4709_v32 = vld [vmem:[%s9162_s5 + $0x118] sm:$0xff] }
 0x45b   :  { %v3753_v50 = vsel %vm3648_vm10, %v3752_v10, %v3751_v61  ;;  %v3856_v34 = vsel %vm3648_vm10, %v3855_v23, %v3854_v17  ;;  %v5625_v14 = vpack.c.bf16 %v4691_v39, %v4690_v16  ;;  %v5637_v42 = vpack.c.bf16 %v4699_v60, %v4698_v36  ;;  %v4700_v61 = vld [vmem:[%s9162_s5 + $0xd0] sm:$0xff]  ;;  %v4701_v17 = vld [vmem:[%s9162_s5 + $0xd8] sm:$0xff]  ;;  %v4710_v28 = vld [vmem:[%s9162_s5 + $0x120] sm:$0xff] }
 0x45c   :  { %v4101_v48 = vrot.slane %v4064_v13, 2  ;;  %v3591_v54 = vrot.slane %v3566_v30, 1  ;;  %v3551_v4 = vmax.f32 %v3534_v12, %v3535_v7  ;;  %v5640_v27 = vpack.c.bf16 %v4701_v17, %v4700_v61  ;;  %v4711_v57 = vld [vmem:[%s9162_s5 + $0x128] sm:$0xff]  ;;  %v4712_v12 = vld [vmem:[%s9162_s5 + $0x130] sm:$0xff]  ;;  %v4713_v41 = vld [vmem:[%s9162_s5 + $0x138] sm:$0xff] }
 0x45d   :  { %v5646_v29 = vpack.c.bf16 %v4705_v33, %v4704_v31  ;;  %v5649_v6 = vpack.c.bf16 %v4707_v56, %v4706_v15  ;;  %v5655_v10 = vpack.c.bf16 %v4711_v57, %v4710_v28  ;;  %v5658_v23 = vpack.c.bf16 %v4713_v41, %v4712_v12  ;;  %v4715_v13 = vld [vmem:[%s9162_s5 + $0x148] sm:$0xff]  ;;  %v4716_v7 = vld [vmem:[%s9162_s5 + $0x150] sm:$0xff]  ;;  %v4721_v16 = vld [vmem:[%s9162_s5 + $0x178] sm:$0xff] }
 0x45e   :  { %v3607_v49 = vmax.f32 %v3566_v30, %v3591_v54  ;;  %v3567_v51 = vmax.f32 %v3551_v4, 0.0  ;;  %v4102_v24 = vsel %vm3648_vm10, %v4101_v48, %v4100_v63  ;;  %v4708_v63 = vld [vmem:[%s9162_s5 + $0x110] sm:$0xff]  ;;  %v4719_v48 = vld [vmem:[%s9162_s5 + $0x168] sm:$0xff]  ;;  %v4738_v60 = vld [vmem:[%s9162_s5 + $0x200] sm:$0xff] }
 0x45f   :  { %v5652_v5 = vpack.c.bf16 %v4709_v32, %v4708_v63  ;;  %v4720_v4 = vld [vmem:[%s9162_s5 + $0x170] sm:$0xff]  ;;  %v4745_v33 = vld [vmem:[%s9162_s5 + $0x238] sm:$0xff]  ;;  %v4746_v15 = vld [vmem:[%s9162_s5 + $0x240] sm:$0xff] }
 0x460   :  { %v4049_v59 = vrot.slane %v3567_v51, 1  ;;  %v3650_v52 = vrot.slane %v3607_v49, 1  ;;  %v3754_v38 = vrot.slane %v3607_v49, 3  ;;  %v3857_v22 = vrot.slane %v3607_v49, 5  ;;  %v4740_v17 = vld [vmem:[%s9162_s5 + $0x210] sm:$0xff]  ;;  %v4747_v56 = vld [vmem:[%s9162_s5 + $0x248] sm:$0xff] }
 0x461   :  { %v3960_v0 = vrot.slane %v3607_v49, 7  ;;  %v5670_v39 = vpack.c.bf16 %v4721_v16, %v4720_v4  ;;  %v4722_v49 = vld [vmem:[%s9162_s5 + $0x180] sm:$0xff]  ;;  %v4748_v63 = vld [vmem:[%s9162_s5 + $0x250] sm:$0xff]  ;;  %v4749_v32 = vld [vmem:[%s9162_s5 + $0x258] sm:$0xff] }
 0x462   :  { %v4065_v19 = vmax.f32 %v3567_v51, %v4049_v59  ;;  %v3652_v44 = vsel %vm3651_vm11, %v3650_v52, %v3649_v20  ;;  %v3755_v43 = vsel %vm3651_vm11, %v3754_v38, %v3753_v50  ;;  %v8799_v46 = vsel %vm3651_vm11, %v3857_v22, %v3856_v34  ;;  %v4717_v20 = vld [vmem:[%s9162_s5 + $0x158] sm:$0xff]  ;;  %v4718_v34 = vld [vmem:[%s9162_s5 + $0x160] sm:$0xff]  ;;  %v4723_v51 = vld [vmem:[%s9162_s5 + $0x188] sm:$0xff] }
 0x463   :  { %4908 = vmatmul.mubr.f32.vlgmr.msra.gmra.mrb[64].mxu1 %v3652_v44  ;;  %v8802_v37 = vsel %vm3651_vm11, %v3960_v0, %v3959_v53  ;;  %v4714_v53 = vld [vmem:[%s9162_s5 + $0x140] sm:$0xff]  ;;  %v5664_v50 = vpack.c.bf16 %v4717_v20, %v4716_v7  ;;  %v5667_v54 = vpack.c.bf16 %v4719_v48, %v4718_v34  ;;  %v4725_v59 = vld [vmem:[%s9162_s5 + $0x198] sm:$0xff]  ;;  %v4727_v22 = vld [vmem:[%s9162_s5 + $0x1a8] sm:$0xff] }
 0x464   :  { %v4103_v1 = vrot.slane %v4065_v19, 1  ;;  %5626 = vmatpush3.bf16.msra.mxu1 %v5625_v14  ;;  %4942 = vmatprep.mubr.msk.f32.mxu1 %vm6170_vm4, %v6168_v3  ;;  %v5661_v30 = vpack.c.bf16 %v4715_v13, %v4714_v53  ;;  %v4724_v14 = vld [vmem:[%s9162_s5 + $0x190] sm:$0xff]  ;;  %v4726_v38 = vld [vmem:[%s9162_s5 + $0x1a0] sm:$0xff]  ;;  %v4729_v0 = vld [vmem:[%s9162_s5 + $0x1b8] sm:$0xff] }
 0x465   :  { %5627 = vmatprep.subr.bf16.mxu1 %v6169_v40  ;;  %v5676_v52 = vpack.c.bf16 %v4725_v59, %v4724_v14  ;;  %v5679_v2 = vpack.c.bf16 %v4727_v22, %v4726_v38  ;;  %v5682_v19 = vpack.c.bf16 %v4729_v0, %v4728_v55  ;;  %v4730_v44 = vld [vmem:[%s9162_s5 + $0x1c0] sm:$0xff]  ;;  %v4751_v57 = vld [vmem:[%s9162_s5 + $0x268] sm:$0xff]  ;;  %v4752_v12 = vld [vmem:[%s9162_s5 + $0x270] sm:$0xff] }
 0x466   :  { %v8814_v21 = vsel %vm3651_vm11, %v4103_v1, %v4102_v24  ;;  %v5673_v24 = vpack.c.bf16 %v4723_v51, %v4722_v49  ;;  %v4732_v1 = vld [vmem:[%s9162_s5 + $0x1d0] sm:$0xff]  ;;  %v4750_v28 = vld [vmem:[%s9162_s5 + $0x260] sm:$0xff]  ;;  %v4753_v41 = vld [vmem:[%s9162_s5 + $0x278] sm:$0xff] }
 0x467   :  { %v4178_v53 = vld [vmem:[%s9164_s7] sm:$0xff]  ;;  %v4179_v13 = vld [vmem:[%s9164_s7 + $0x8] sm:$0xff]  ;;  %v4180_v7 = vld [vmem:[%s9164_s7 + $0x10] sm:$0xff] }
 0x468   :  { %5629 = vmatpush3.bf16.msra.mxu1 %v5628_v9  ;;  %v4733_v9 = vld [vmem:[%s9162_s5 + $0x1d8] sm:$0xff]  ;;  %v4182_v34 = vld [vmem:[%s9164_s7 + $0x20] sm:$0xff]  ;;  %v4183_v48 = vld [vmem:[%s9164_s7 + $0x28] sm:$0xff] }
 0x469   :  { %5630 = vmatprep.subr.bf16.mxu1 %v6169_v40  ;;  %v5688_v45 = vpack.c.bf16 %v4733_v9, %v4732_v1  ;;  %v4181_v20 = vld [vmem:[%s9164_s7 + $0x18] sm:$0xff]  ;;  %v4187_v49 = vld [vmem:[%s9164_s7 + $0x48] sm:$0xff] }
 0x46a   :  { %v4185_v4 = vld [vmem:[%s9164_s7 + $0x38] sm:$0xff]  ;;  %v4191_v38 = vld [vmem:[%s9164_s7 + $0x68] sm:$0xff] }
 0x46b   :  { %v4189_v14 = vld [vmem:[%s9164_s7 + $0x58] sm:$0xff] }
 0x46c   :  { %5632 = vmatpush3.bf16.msra.mxu1 %v5631_v18  ;;  %v4735_v18 = vld [vmem:[%s9162_s5 + $0x1e8] sm:$0xff]  ;;  %v4193_v55 = vld [vmem:[%s9164_s7 + $0x78] sm:$0xff] }
 0x46d   :  { %5633 = vmatprep.subr.bf16.mxu1 %v6169_v40  ;;  %v5691_v47 = vpack.c.bf16 %v4735_v18, %v4734_v11  ;;  %v4274_v18 = vld [vmem:[%s9166_s9 + $0x10] sm:$0xff] }
 0x470   :  { %5635 = vmatpush3.bf16.msra.mxu1 %v5634_v35  ;;  %v4737_v35 = vld [vmem:[%s9162_s5 + $0x1f8] sm:$0xff] }
 0x471   :  { %5636 = vmatprep.subr.bf16.mxu1 %v6169_v40  ;;  %v5694_v36 = vpack.c.bf16 %v4737_v35, %v4736_v58  ;;  %v4276_v35 = vld [vmem:[%s9166_s9 + $0x20] sm:$0xff] }
 0x474   :  { %5638 = vmatpush3.bf16.msra.mxu1 %v5637_v42  ;;  %v4739_v42 = vld [vmem:[%s9162_s5 + $0x208] sm:$0xff] }
 0x475   :  { %5639 = vmatprep.subr.bf16.mxu1 %v6169_v40  ;;  %v5697_v61 = vpack.c.bf16 %v4739_v42, %v4738_v60  ;;  %v4278_v42 = vld [vmem:[%s9166_s9 + $0x30] sm:$0xff] }
 0x478   :  { %5641 = vmatpush3.bf16.msra.mxu1 %v5640_v27  ;;  %v4741_v27 = vld [vmem:[%s9162_s5 + $0x218] sm:$0xff] }
 0x479   :  { %5642 = vmatprep.subr.bf16.mxu1 %v6169_v40  ;;  %v5700_v62 = vpack.c.bf16 %v4741_v27, %v4740_v17  ;;  %v4280_v17 = vld [vmem:[%s9166_s9 + $0x40] sm:$0xff]  ;;  %v4281_v27 = vld [vmem:[%s9166_s9 + $0x48] sm:$0xff] }
 0x47c   :  { %5644 = vmatpush3.bf16.msra.mxu1 %v5643_v26  ;;  %v4743_v26 = vld [vmem:[%s9162_s5 + $0x228] sm:$0xff] }
 0x47d   :  { %5645 = vmatprep.subr.bf16.mxu1 %v6169_v40  ;;  %v5703_v31 = vpack.c.bf16 %v4743_v26, %v4742_v25  ;;  %v4282_v25 = vld [vmem:[%s9166_s9 + $0x50] sm:$0xff]  ;;  %v4283_v26 = vld [vmem:[%s9166_s9 + $0x58] sm:$0xff] }
 0x480   :  { %5647 = vmatpush3.bf16.msra.mxu1 %v5646_v29 }
 0x481   :  { %5648 = vmatprep.subr.bf16.mxu1 %v6169_v40 }
 0x483   :  { %4943 = vmatmul.mubr.f32.vlgmr.msra.gmra.mrb[64].mxu1 %v3755_v43  ;;  %v4731_v43 = vld [vmem:[%s9162_s5 + $0x1c8] sm:$0xff] }
 0x484   :  { %5650 = vmatpush3.bf16.msra.mxu1 %v5649_v6  ;;  %4977 = vmatprep.mubr.msk.f32.mxu1 %vm6170_vm4, %v6168_v3  ;;  %v5709_v6 = vpack.c.bf16 %v4747_v56, %v4746_v15  ;;  %v4286_v15 = vld [vmem:[%s9166_s9 + $0x70] sm:$0xff]  ;;  %v4287_v56 = vld [vmem:[%s9166_s9 + $0x78] sm:$0xff] }
 0x485   :  { %5651 = vmatprep.subr.bf16.mxu1 %v6169_v40 }
 0x488   :  { %5653 = vmatpush3.bf16.msra.mxu1 %v5652_v5  ;;  %v5712_v5 = vpack.c.bf16 %v4749_v32, %v4748_v63  ;;  %v4754_v63 = vld [vmem:[%s9167_s8] ss:$0 sm:$0xff] }
 0x489   :  { %5654 = vmatprep.subr.bf16.mxu1 %v6169_v40 }
 0x48c   :  { %5656 = vmatpush3.bf16.msra.mxu1 %v5655_v10  ;;  %v5715_v10 = vpack.c.bf16 %v4751_v57, %v4750_v28 }
 0x48d   :  { %5657 = vmatprep.subr.bf16.mxu1 %v6169_v40 }
 0x490   :  { %5659 = vmatpush3.bf16.msra.mxu1 %v5658_v23  ;;  %v5718_v23 = vpack.c.bf16 %v4753_v41, %v4752_v12 }
 0x491   :  { %5660 = vmatprep.subr.bf16.mxu1 %v6169_v40 }
 0x494   :  { %5662 = vmatpush3.bf16.msra.mxu1 %v5661_v30  ;;  %v5721_v30 = vpack.c.bf16 %v4179_v13, %v4178_v53 }
 0x495   :  { %5663 = vmatprep.subr.bf16.mxu1 %v6169_v40 }
 0x498   :  { %5665 = vmatpush3.bf16.msra.mxu1 %v5664_v50  ;;  %v5724_v50 = vpack.c.bf16 %v4181_v20, %v4180_v7 }
 0x499   :  { %5666 = vmatprep.subr.bf16.mxu1 %v6169_v40 }
 0x49c   :  { %5668 = vmatpush3.bf16.msra.mxu1 %v5667_v54  ;;  %v5727_v54 = vpack.c.bf16 %v4183_v48, %v4182_v34 }
 0x49d   :  { %5669 = vmatprep.subr.bf16.mxu1 %v6169_v40 }
 0x4a0   :  { %5671 = vmatpush3.bf16.msra.mxu1 %v5670_v39  ;;  %v4186_v39 = vld [vmem:[%s9164_s7 + $0x40] sm:$0xff] }
 0x4a1   :  { %5672 = vmatprep.subr.bf16.mxu1 %v6169_v40  ;;  %v5733_v51 = vpack.c.bf16 %v4187_v49, %v4186_v39 }
 0x4a3   :  { %4978 = vmatmul.mubr.f32.vlgmr.msra.gmra.mrb[64].mxu1 %v8799_v46  ;;  %v5685_v46 = vpack.c.bf16 %v4731_v43, %v4730_v44  ;;  %v4272_v44 = vld [vmem:[%s9166_s9] sm:$0xff]  ;;  %v4273_v43 = vld [vmem:[%s9166_s9 + $0x8] sm:$0xff] }
 0x4a4   :  { %5674 = vmatpush3.bf16.msra.mxu1 %v5673_v24  ;;  %5012 = vmatprep.mubr.msk.f32.mxu1 %vm6170_vm4, %v6168_v3  ;;  %v4188_v24 = vld [vmem:[%s9164_s7 + $0x50] sm:$0xff] }
 0x4a5   :  { %5675 = vmatprep.subr.bf16.mxu1 %v6169_v40  ;;  %v5736_v59 = vpack.c.bf16 %v4189_v14, %v4188_v24 }
 0x4a8   :  { %5677 = vmatpush3.bf16.msra.mxu1 %v5676_v52  ;;  %v4190_v52 = vld [vmem:[%s9164_s7 + $0x60] sm:$0xff] }
 0x4a9   :  { %5678 = vmatprep.subr.bf16.mxu1 %v6169_v40  ;;  %v5739_v22 = vpack.c.bf16 %v4191_v38, %v4190_v52 }
 0x4ac   :  { %5680 = vmatpush3.bf16.msra.mxu1 %v5679_v2  ;;  %v4192_v2 = vld [vmem:[%s9164_s7 + $0x70] sm:$0xff] }
 0x4ad   :  { %5681 = vmatprep.subr.bf16.mxu1 %v6169_v40  ;;  %v5742_v0 = vpack.c.bf16 %v4193_v55, %v4192_v2 }
 0x4b0   :  { %5683 = vmatpush3.bf16.msra.mxu1 %v5682_v19  ;;  %v4689_v19 = vld [vmem:[%s9165_s6] ss:$0 sm:$0xff] }
 0x4b1   :  { %5684 = vmatprep.subr.bf16.mxu1 %v6169_v40 }
 0x4b4   :  { %5686 = vmatpush3.bf16.msra.mxu1 %v5685_v46 }
 0x4b5   :  { %5687 = vmatprep.subr.bf16.mxu1 %v6169_v40 }
 0x4b8   :  { %5689 = vmatpush3.bf16.msra.mxu1 %v5688_v45  ;;  %v5745_v45 = vpack.c.bf16 %v4273_v43, %v4272_v44 }
 0x4b9   :  { %5690 = vmatprep.subr.bf16.mxu1 %v6169_v40 }
 0x4bc   :  { %5692 = vmatpush3.bf16.msra.mxu1 %v5691_v47  ;;  %v4275_v47 = vld [vmem:[%s9166_s9 + $0x18] sm:$0xff] }
 0x4bd   :  { %5693 = vmatprep.subr.bf16.mxu1 %v6169_v40  ;;  %v5748_v58 = vpack.c.bf16 %v4275_v47, %v4274_v18 }
 0x4c0   :  { %5695 = vmatpush3.bf16.msra.mxu1 %v5694_v36  ;;  %v4277_v36 = vld [vmem:[%s9166_s9 + $0x28] sm:$0xff] }
 0x4c1   :  { %5696 = vmatprep.subr.bf16.mxu1 %v6169_v40  ;;  %v5751_v60 = vpack.c.bf16 %v4277_v36, %v4276_v35 }
 0x4c3   :  { %5013 = vmatmul.mubr.f32.vlgmr.msra.gmra.mrb[64].mxu1 %v8802_v37  ;;  %v4744_v37 = vld [vmem:[%s9162_s5 + $0x230] sm:$0xff] }
 0x4c4   :  { %5698 = vmatpush3.bf16.msra.mxu1 %v5697_v61  ;;  %5047 = vmatprep.mubr.msk.f32.mxu1 %vm6170_vm4, %v6168_v3  ;;  %v5706_v29 = vpack.c.bf16 %v4745_v33, %v4744_v37  ;;  %v4284_v37 = vld [vmem:[%s9166_s9 + $0x60] sm:$0xff]  ;;  %v4285_v33 = vld [vmem:[%s9166_s9 + $0x68] sm:$0xff] }
 0x4c5   :  { %5699 = vmatprep.subr.bf16.mxu1 %v6169_v40 }
 0x4c8   :  { %5701 = vmatpush3.bf16.msra.mxu1 %v5700_v62  ;;  %v5757_v62 = vpack.c.bf16 %v4281_v27, %v4280_v17 }
 0x4c9   :  { %5702 = vmatprep.subr.bf16.mxu1 %v6169_v40 }
 0x4cc   :  { %5704 = vmatpush3.bf16.msra.mxu1 %v5703_v31  ;;  %v5760_v31 = vpack.c.bf16 %v4283_v26, %v4282_v25 }
 0x4cd   :  { %5705 = vmatprep.subr.bf16.mxu1 %v6169_v40 }
 0x4d0   :  { %5707 = vmatpush3.bf16.msra.mxu1 %v5706_v29  ;;  %v5763_v29 = vpack.c.bf16 %v4285_v33, %v4284_v37 }
 0x4d1   :  { %5708 = vmatprep.subr.bf16.mxu1 %v6169_v40 }
 0x4d4   :  { %5710 = vmatpush3.bf16.msra.mxu1 %v5709_v6  ;;  %v5766_v6 = vpack.c.bf16 %v4287_v56, %v4286_v15 }
 0x4d5   :  { %5711 = vmatprep.subr.bf16.mxu1 %v6169_v40 }
 0x4d8   :  { %5713 = vmatpush3.bf16.msra.mxu1 %v5712_v5 }
 0x4d9   :  { %5714 = vmatprep.subr.bf16.mxu1 %v6169_v40 }
 0x4dc   :  { %5716 = vmatpush3.bf16.msra.mxu1 %v5715_v10  ;;  %v4755_v10 = vld [vmem:[%s9168_s10] ss:$0 sm:$0xff] }
 0x4dd   :  { %5717 = vmatprep.subr.bf16.mxu1 %v6169_v40 }
 0x4e0   :  { %5719 = vmatpush3.bf16.msra.mxu1 %v5718_v23 }
 0x4e1   :  { %5720 = vmatprep.subr.bf16.mxu1 %v6169_v40 }
 0x4e3   :  { %5048 = vmatmul.mubr.f32.vlgmr.msra.gmra.mrb[64].mxu1 %v8814_v21  ;;  %v4184_v21 = vld [vmem:[%s9164_s7 + $0x30] sm:$0xff] }
 0x4e4   :  { %5722 = vmatpush3.bf16.msra.mxu1 %v5721_v30  ;;  %5082 = vmatprep.mubr.msk.f32.mxu1 %vm6170_vm4, %v6168_v3  ;;  %v5730_v16 = vpack.c.bf16 %v4185_v4, %v4184_v21 }
 0x4e5   :  { %5723 = vmatprep.subr.bf16.mxu1 %v6169_v40 }
 0x4e8   :  { %5725 = vmatpush3.bf16.msra.mxu1 %v5724_v50 }
 0x4e9   :  { %5726 = vmatprep.subr.bf16.mxu1 %v6169_v40 }
 0x4ec   :  { %5728 = vmatpush3.bf16.msra.mxu1 %v5727_v54 }
 0x4ed   :  { %5729 = vmatprep.subr.bf16.mxu1 %v6169_v40 }
 0x4f0   :  { %5731 = vmatpush3.bf16.msra.mxu1 %v5730_v16 }
 0x4f1   :  { %5732 = vmatprep.subr.bf16.mxu1 %v6169_v40 }
 0x4f4   :  { %5734 = vmatpush3.bf16.msra.mxu1 %v5733_v51 }
 0x4f5   :  { %5735 = vmatprep.subr.bf16.mxu1 %v6169_v40 }
 0x4f8   :  { %5737 = vmatpush3.bf16.msra.mxu1 %v5736_v59 }
 0x4f9   :  { %5738 = vmatprep.subr.bf16.mxu1 %v6169_v40 }
 0x4fc   :  { %5740 = vmatpush3.bf16.msra.mxu1 %v5739_v22 }
 0x4fd   :  { %5741 = vmatprep.subr.bf16.mxu1 %v6169_v40 }
 0x500   :  { %5743 = vmatpush3.bf16.msra.mxu1 %v5742_v0 }
 0x501   :  { %5744 = vmatprep.subr.bf16.mxu1 %v6169_v40 }
 0x5b6   :  { %v4172_v46 = vpop.f32.mrb[64].mxu1 }
 0x5b7   :  { %v5800_v1 = vadd.f32 %v4689_v19, %v4172_v46  ;;  %v5049_v9 = vpop.f32.mrb[65].mxu1 }
 0x5b9   :  { %v4177_v11 = vmax.f32 %v5800_v1, 0.0 }
 0x5bb   :  { %5083 = vmatmul.mubr.f32.vlgmr.msra.gmra.mrb[66].mxu1 %v4177_v11 }
 0x5bc   :  { %5746 = vmatpush3.bf16.msra.mxu1 %v5745_v45  ;;  %5117 = vmatprep.mubr.msk.f32.mxu1 %vm6170_vm4, %v6168_v3  ;;  %v4279_v3 = vld [vmem:[%s9166_s9 + $0x38] sm:$0xff] }
 0x5bd   :  { %5747 = vmatprep.subr.bf16.mxu1 %v6169_v40  ;;  %v5754_v61 = vpack.c.bf16 %v4279_v3, %v4278_v42 }
 0x5c0   :  { %5749 = vmatpush3.bf16.msra.mxu1 %v5748_v58 }
 0x5c1   :  { %5750 = vmatprep.subr.bf16.mxu1 %v6169_v40 }
 0x5c4   :  { %5752 = vmatpush3.bf16.msra.mxu1 %v5751_v60 }
 0x5c5   :  { %5753 = vmatprep.subr.bf16.mxu1 %v6169_v40 }
 0x5c8   :  { %5755 = vmatpush3.bf16.msra.mxu1 %v5754_v61 }
 0x5c9   :  { %5756 = vmatprep.subr.bf16.mxu1 %v6169_v40 }
 0x5cc   :  { %5758 = vmatpush3.bf16.msra.mxu1 %v5757_v62 }
 0x5cd   :  { %5759 = vmatprep.subr.bf16.mxu1 %v6169_v40 }
 0x5d0   :  { %5761 = vmatpush3.bf16.msra.mxu1 %v5760_v31 }
 0x5d1   :  { %5762 = vmatprep.subr.bf16.mxu1 %v6169_v40 }
 0x5d4   :  { %5764 = vmatpush3.bf16.msra.mxu1 %v5763_v29 }
 0x5d5   :  { %5765 = vmatprep.subr.bf16.mxu1 %v6169_v40  ;;  %v4366_v40 = vand.u32 127, %v2135_v8 }
 0x5d7   :  { %vm4367_vm12 = vcmp.lt.s32.totalorder %v4366_v40, 10 }
 0x5d8   :  { %5767 = vmatpush3.bf16.msra.mxu1 %v5766_v6 }
 0x68e   :  { %v4267_v32 = vpop.f32.mrb[66].mxu1 }
 0x68f   :  { %v4268_v5 = vadd.f32 %v4754_v63, %v4267_v32  ;;  %v5084_v28 = vpop.f32.mrb[67].mxu1 }
 0x691   :  { %v4271_v57 = vmax.f32 %v4268_v5, 0.0 }
 0x693   :  { %5118 = vmatmul.mubr.f32.vlgmr.msra.gmra.mrb[68].mxu1 %v4271_v57 }
 0x766   :  { %v4361_v12 = vpop.f32.mrb[68].mxu1 }
 0x767   :  { %v4362_v41 = vadd.f32 %v4755_v10, %v4361_v12  ;;  %v5119_v23 = vpop.f32.mrb[69].mxu1 }
 0x769   :  { %v4368_v53 = vsel %vm4367_vm12, %v4362_v41, -1e+30 }
 0x76a   :  { %4369 = vmax.xlane.f32.xlu0 %v4368_v53 }
 0x7f7   :  { %v4370_v13 = vpop.xlane.xlu0 %4369 }
 0x7f8   :  { %v4371_v30 = vsub.f32 %v4368_v53, %v4370_v13 }
 0x7fa   :  { %v4372_v7 = vmul.f32 1.442695, %v4371_v30 }
 0x7fc   :  { %6164 = vpow2.f32 %v4372_v7 }
 0x806   :  { %v6165_v20 = vpop.eup %6164 }
 0x807   :  { %4374 = vadd.xlane.f32.xlu0 %v6165_v20 }
 0x894   :  { %v4375_v50 = vpop.xlane.xlu0 %4374 }
 0x895   :  { %6166 = vlog2.f32 %v4375_v50 }
 0x89f   :  { %v6167_v34 = vpop.eup %6166 }
 0x8a0   :  { %v4377_v8 = vmul.f32 0.6931472, %v6167_v34 }
 0x8a2   :  { %v4378_v48 = vsub.f32 %v4371_v30, %v4377_v8 }
 0x8a4   :  { %4379 = vst [vmem:[%s9169_s11] sm:$0xff] %v4378_v48 }

</bundles_post_ra>
